<compile_context>
chip_gen: v6e
topology: v6e:2x2x1
jax: 0.10.0
libtpu: 0.0.40
codegen_flags: <defaults>
</compile_context>

<pallas_src>
import jax
import jax.numpy as jnp
from jax import lax
from jax.experimental import pallas as pl
from jax.experimental.pallas import tpu as pltpu

EPS = 1e-5
LANE = 128


def _round_up(x, m):
    return ((x + m - 1) // m) * m


# ---------------------------------------------------------------------------
# Fused DenseBlock Pallas kernel
# ---------------------------------------------------------------------------

def make_dense_block_kernel(num_layers, cin, growth, cout_p, H, W, Nb):
    """Fused DenseBlock kernel for a fixed (static) configuration."""
    cm = 4 * growth                        # DenseLayer bottleneck width
    c_final = cin + num_layers * growth    # channels after all concats
    M = Nb * H * W                         # matmul M dimension per grid step
    taps = [(ky, kx) for ky in range(3) for kx in range(3)]

    def kernel(*refs):
        x_ref = refs[0]
        pos = 1
        layer_refs = []
        for _ in range(num_layers):
            layer_refs.append(refs[pos:pos + 6])
            pos += 6
        wf_ref, bf_ref = refs[pos], refs[pos + 1]
        o_ref = refs[pos + 2]
        feat_ref, pad_ref = refs[pos + 3], refs[pos + 4]

        # Stage the fusion input into the concat scratch (f32).
        feat_ref[:, 0:cin] = x_ref[...]

        # Zero only the 1-pixel halo of the padded mid-activation buffer; the
        # interior is fully overwritten every layer (no full-buffer zeroing).
        zrow = jnp.zeros((Nb, 1, W + 2, cm), jnp.bfloat16)
        zcol = jnp.zeros((Nb, H + 2, 1, cm), jnp.bfloat16)
        pad_ref[:, 0:1, :, :] = zrow
        pad_ref[:, H + 1:H + 2, :, :] = zrow
        pad_ref[:, :, 0:1, :] = zcol
        pad_ref[:, :, W + 1:W + 2, :] = zcol

        c_cur = cin
        for l in range(num_layers):
            bn1s, bn1h, w1, b1, w2, b2 = layer_refs[l]

            # conv1(relu(bn1(x))) with bn2 pre-folded into (w1, b1): one MXU dot,
            # bf16 operands / f32 accumulation.
            a1 = jnp.maximum(feat_ref[:, 0:c_cur] * bn1s[...] + bn1h[...], 0.0)
            mid = jnp.dot(a1.astype(jnp.bfloat16), w1[...],
                          preferred_element_type=jnp.float32) + b1[...]
            a2 = jnp.maximum(mid, 0.0)      # relu(bn2(.)) -- bn2 already folded

            # Write the interior of the zero-halo buffer, casting to bf16 once.
            pad_ref[:, 1:H + 1, 1:W + 1, :] = (
                a2.astype(jnp.bfloat16).reshape(Nb, H, W, cm))

            # 3x3 conv (padding=1) as 9 accumulating MXU matmuls over shifted
            # views of the padded buffer (no im2col staging, no patch scratch).
            acc = jnp.zeros((M, growth), jnp.float32)
            for t, (ky, kx) in enumerate(taps):
                view = pad_ref[:, ky:ky + H, kx:kx + W, :].reshape(M, cm)
                acc = acc + jnp.dot(view, w2[t],
                                    preferred_element_type=jnp.float32)

            # DenseNet concat: append the new channels in VMEM (no HBM traffic).
            feat_ref[:, c_cur:c_cur + growth] = acc + b2[...]
            c_cur += growth

        # Final 1x1 conv with BN folded into the (lane-padded) weights, then ReLU.
        # Output channels are zero-padded to a multiple of 128 -> lane-dense store.
        y = jnp.maximum(
            jnp.dot(feat_ref[...].astype(jnp.bfloat16), wf_ref[...],
                    preferred_element_type=jnp.float32) + bf_ref[...], 0.0)
        o_ref[...] = y

    return kernel


def dense_block_apply(p, x):
    """x: (N, H, W, Cin) float32 NHWC -> (N, H, W, Cout) float32."""
    N, H, W, cin = x.shape
    growth, cout, coutp = p["growth"], p["cout"], p["coutp"]
    num_layers = len(p["layers"])
    cm = 4 * growth
    c_final = cin + num_layers * growth
    HW = H * W

    # Batch-block size: target matmul M = Nb*HW >= 128 rows (largest divisor of N
    # not exceeding the target), so the MXU is not starved at small spatial sizes.
    target = max(1, -(-128 // HW))
    Nb = 1
    for d in range(1, N + 1):
        if N % d == 0 and d <= target:
            Nb = d
    M = Nb * HW

    kernel = make_dense_block_kernel(num_layers, cin, growth, coutp, H, W, Nb)

    args = [x.reshape(N * HW, cin)]
    in_specs = [pl.BlockSpec((M, cin), lambda n: (n, 0))]

    def add_param(a):   # whole-array block, resident across the grid
        args.append(a)
        idx = (0,) * a.ndim
        in_specs.append(pl.BlockSpec(a.shape, lambda n, _i=idx: _i))

    for lp in p["layers"]:
        for name in ("bn1_scale", "bn1_shift", "conv1_w", "conv1_b",
                     "conv2_w", "conv2_b"):
            add_param(lp[name])
    add_param(p["conv1x1_w"])
    add_param(p["conv1x1_b"])

    out = pl.pallas_call(
        kernel,
        out_shape=jax.ShapeDtypeStruct((N * HW, coutp), jnp.float32),
        grid=(N // Nb,),
        in_specs=in_specs,
        out_specs=pl.BlockSpec((M, coutp), lambda n: (n, 0)),
        scratch_shapes=[
            pltpu.VMEM((M, c_final), jnp.float32),              # growing concat
            pltpu.VMEM((Nb, H + 2, W + 2, cm), jnp.bfloat16),   # zero-halo mid act
        ],
        compiler_params=pltpu.CompilerParams(
            dimension_semantics=("parallel",),
            vmem_limit_bytes=32 * 1024 * 1024),
    )(*args)
    return out[:, :cout].reshape(N, H, W, cout)


# ---------------------------------------------------------------------------
# CrossEncoderFusion forward (functional, NHWC)
# ---------------------------------------------------------------------------

def nlc_to_nhwc(x, hw_shape):
    N, L, C = x.shape
    H, W = hw_shape
    return x.reshape(N, H, W, C)


def cross_encoder_fusion_forward(fusion_params, x, cnn_encoder_layers,
                                 transformer_encoder_layers, out_indices):
    outs = []
    cnn_encoder_out = x
    for i, (cnn_layer, tlayer) in enumerate(zip(cnn_encoder_layers,
                                                transformer_encoder_layers)):
        cnn_encoder_out = cnn_layer(cnn_encoder_out)
        x, hw_shape = tlayer[0](x)
        for block in tlayer[1]:
            x = block(x, hw_shape)
        x = tlayer[2](x)
        x = nlc_to_nhwc(x, hw_shape)
        fusion_input = jnp.concatenate((cnn_encoder_out, x), axis=-1)
        x = dense_block_apply(fusion_params[i], fusion_input)
        if i in out_indices:
            outs.append(x)
    return outs


# ---------------------------------------------------------------------------
# Deterministic parameter initialization (eval-mode BN, folds done in f32)
# ---------------------------------------------------------------------------

def init_bn(key, c):
    kg, kb = jax.random.split(key)
    gamma = 1.0 + 0.1 * jax.random.normal(kg, (c,), jnp.float32)
    beta = 0.1 * jax.random.normal(kb, (c,), jnp.float32)
    running_mean = jnp.zeros((c,), jnp.float32)
    running_var = jnp.ones((c,), jnp.float32)
    scale = gamma / jnp.sqrt(running_var + EPS)
    shift = beta - running_mean * scale
    return scale.reshape(1, c), shift.reshape(1, c)


def init_conv1x1(key, cin, cout):
    kw, kb = jax.random.split(key)
    w = jax.random.normal(kw, (cin, cout), jnp.float32) / jnp.sqrt(cin)
    b = 0.01 * jax.random.normal(kb, (1, cout), jnp.float32)
    return w, b


def init_conv3x3(key, cin, cout):
    kw, kb = jax.random.split(key)
    w = jax.random.normal(kw, (9, cin, cout), jnp.float32) / jnp.sqrt(9.0 * cin)
    b = 0.01 * jax.random.normal(kb, (1, cout), jnp.float32)
    return w, b      # taps row-major (ky*3 + kx)


def init_dense_layer(key, cin, growth):
    k = jax.random.split(key, 4)
    bn1_s, bn1_h = init_bn(k[0], cin)
    c1_w, c1_b = init_conv1x1(k[1], cin, 4 * growth)
    bn2_s, bn2_h = init_bn(k[2], 4 * growth)
    c2_w, c2_b = init_conv3x3(k[3], 4 * growth, growth)
    # Exact fold of bn2 into conv1 (affine o affine), in f32 BEFORE the bf16 cast:
    # bn2(conv1(z)) = z @ (w1 * s2) + (b1 * s2 + h2)
    w1f = c1_w * bn2_s
    b1f = c1_b * bn2_s + bn2_h
    return dict(bn1_scale=bn1_s, bn1_shift=bn1_h,
                conv1_w=w1f.astype(jnp.bfloat16), conv1_b=b1f,
                conv2_w=c2_w.astype(jnp.bfloat16), conv2_b=c2_b)


def init_dense_block(key, num_layers, cin, growth, cout):
    keys = jax.random.split(key, num_layers + 2)
    layers = []
    cur = cin
    for l in range(num_layers):
        layers.append(init_dense_layer(keys[l], cur, growth))
        cur += growth
    cw, cb = init_conv1x1(keys[num_layers], cur, cout)
    bs, bh = init_bn(keys[num_layers + 1], cout)
    # relu(bn(conv(x))) == relu(x @ (w*scale) + (b*scale + shift)) -- exact fold.
    wf = cw * bs
    bf = cb * bs + bh
    # Zero-pad output channels to a lane multiple so the kernel's store is dense;
    # padded bias entries are 0 -> padded output columns are exactly 0 after ReLU.
    coutp = _round_up(cout, LANE)
    wf_p = jnp.zeros((cur, coutp), jnp.float32).at[:, :cout].set(wf)
    bf_p = jnp.zeros((1, coutp), jnp.float32).at[:, :cout].set(bf)
    return dict(layers=layers, conv1x1_w=wf_p.astype(jnp.bfloat16),
                conv1x1_b=bf_p, growth=growth, cout=cout, coutp=coutp)


# ---------------------------------------------------------------------------
# Minimal plain-JAX stand-ins for the externally supplied encoder layers (glue)
# ---------------------------------------------------------------------------

def _conv2d_nhwc(x, w, b, stride, padding):
    y = lax.conv_general_dilated(x, w, (stride, stride), padding,
                                 dimension_numbers=("NHWC", "HWIO", "NHWC"))
    return y + b


def make_cnn_layer(key, cin, cout):
    kw, kb = jax.random.split(key)
    w = jax.random.normal(kw, (3, 3, cin, cout), jnp.float32) / jnp.sqrt(9.0 * cin)
    b = 0.01 * jax.random.normal(kb, (1, 1, 1, cout), jnp.float32)

    def apply(x):
        return jax.nn.relu(_conv2d_nhwc(x, w, b, 2, "SAME"))
    return apply


def make_transformer_layer(key, cin, cemb):
    k1, k2, k3, k4 = jax.random.split(key, 4)
    pw = jax.random.normal(k1, (2, 2, cin, cemb), jnp.float32) / jnp.sqrt(4.0 * cin)
    pb = jnp.zeros((1, 1, 1, cemb), jnp.float32)
    w1 = jax.random.normal(k2, (cemb, 2 * cemb), jnp.float32) / jnp.sqrt(cemb)
    w2 = jax.random.normal(k3, (2 * cemb, cemb), jnp.float32) / jnp.sqrt(2.0 * cemb)
    ln1_g = jnp.ones((cemb,), jnp.float32)
    ln1_b = jnp.zeros((cemb,), jnp.float32)
    ln2_g = 1.0 + 0.05 * jax.random.normal(k4, (cemb,), jnp.float32)
    ln2_b = jnp.zeros((cemb,), jnp.float32)

    def layernorm(x, g, b):
        m = jnp.mean(x, -1, keepdims=True)
        v = jnp.var(x, -1, keepdims=True)
        return (x - m) * lax.rsqrt(v + 1e-6) * g + b

    def patch_embed(x):
        y = _conv2d_nhwc(x, pw, pb, 2, "VALID")
        N, H, W, C = y.shape
        return y.reshape(N, H * W, C), (H, W)

    def block(x, hw_shape):
        h = layernorm(x, ln1_g, ln1_b)
        h = jax.nn.gelu(h @ w1) @ w2
        return x + h

    def norm(x):
        return layernorm(x, ln2_g, ln2_b)

    return (patch_embed, [block], norm)


# ---------------------------------------------------------------------------
# Main
# ---------------------------------------------------------------------------

if __name__ == "__main__":
    key = jax.random.PRNGKey(0)
    kx, kf0, kf1, kc0, kc1, kt0, kt1 = jax.random.split(key, 7)

    # (in_channels, growth_rate, num_layers, out_channels) per fusion stage
    fusion_params = [
        init_dense_block(kf0, num_layers=2, cin=16, growth=8, cout=16),
        init_dense_block(kf1, num_layers=2, cin=32, growth=8, cout=32),
    ]

    # Stand-in external encoders:
    #   stage 0: cnn 4 -> 8 (16x16 -> 8x8),  transformer 4 -> 8  (8x8)
    #   stage 1: cnn 8 -> 16 (8x8 -> 4x4),   transformer 16 -> 16 (4x4)
    cnn_encoder_layers = [make_cnn_layer(kc0, 4, 8), make_cnn_layer(kc1, 8, 16)]
    transformer_encoder_layers = [make_transformer_layer(kt0, 4, 8),
                                  make_transformer_layer(kt1, 16, 16)]
    out_indices = (0, 1)

    # Input: NHWC (2, 16, 16, 4)  ==  PyTorch NCHW (2, 4, 16, 16)
    x = jax.random.normal(kx, (2, 16, 16, 4), jnp.float32)

    outs = cross_encoder_fusion_forward(fusion_params, x, cnn_encoder_layers,
                                        transformer_encoder_layers, out_indices)
    for o in outs:
        jax.block_until_ready(o)

    assert outs[0].shape == (2, 8, 8, 16)
    assert outs[1].shape == (2, 4, 4, 32)
    print("KERNEL_OK")
</pallas_src>

<mosaic_0001>
module attributes {stable_mosaic.version = 11 : i64} {
  func.func @kernel(%arg0: i32, %arg1: memref<128x16xf32, #tpu.memory_space<vmem>>, %arg2: memref<1x16xf32, #tpu.memory_space<vmem>>, %arg3: memref<1x16xf32, #tpu.memory_space<vmem>>, %arg4: memref<16x32xbf16, #tpu.memory_space<vmem>>, %arg5: memref<1x32xf32, #tpu.memory_space<vmem>>, %arg6: memref<9x32x8xbf16, #tpu.memory_space<vmem>>, %arg7: memref<1x8xf32, #tpu.memory_space<vmem>>, %arg8: memref<1x24xf32, #tpu.memory_space<vmem>>, %arg9: memref<1x24xf32, #tpu.memory_space<vmem>>, %arg10: memref<24x32xbf16, #tpu.memory_space<vmem>>, %arg11: memref<1x32xf32, #tpu.memory_space<vmem>>, %arg12: memref<9x32x8xbf16, #tpu.memory_space<vmem>>, %arg13: memref<1x8xf32, #tpu.memory_space<vmem>>, %arg14: memref<32x128xbf16, #tpu.memory_space<vmem>>, %arg15: memref<1x128xf32, #tpu.memory_space<vmem>>, %arg16: memref<128x128xf32, #tpu.memory_space<vmem>>, %arg17: memref<128x32xf32, #tpu.memory_space<vmem>>, %arg18: memref<2x10x10x32xbf16, #tpu.memory_space<vmem>>) attributes {dimension_semantics = [#tpu.dimension_semantics<parallel>], iteration_bounds = array<i64: 1>, scalar_prefetch = 0 : i64, scratch_operands = 2 : i64, tpu.core_type = #tpu.core_type<tc>, window_params = [{transform_indices = @transform_0, window_bounds = array<i64: 128, 16>}, {pipeline_mode = #tpu.pipeline_mode<synchronous>, transform_indices = @transform_1, window_bounds = array<i64: 1, 16>}, {pipeline_mode = #tpu.pipeline_mode<synchronous>, transform_indices = @transform_2, window_bounds = array<i64: 1, 16>}, {pipeline_mode = #tpu.pipeline_mode<synchronous>, transform_indices = @transform_3, window_bounds = array<i64: 16, 32>}, {pipeline_mode = #tpu.pipeline_mode<synchronous>, transform_indices = @transform_4, window_bounds = array<i64: 1, 32>}, {pipeline_mode = #tpu.pipeline_mode<synchronous>, transform_indices = @transform_5, window_bounds = array<i64: 9, 32, 8>}, {pipeline_mode = #tpu.pipeline_mode<synchronous>, transform_indices = @transform_6, window_bounds = array<i64: 1, 8>}, {pipeline_mode = #tpu.pipeline_mode<synchronous>, transform_indices = @transform_7, window_bounds = array<i64: 1, 24>}, {pipeline_mode = #tpu.pipeline_mode<synchronous>, transform_indices = @transform_8, window_bounds = array<i64: 1, 24>}, {pipeline_mode = #tpu.pipeline_mode<synchronous>, transform_indices = @transform_9, window_bounds = array<i64: 24, 32>}, {pipeline_mode = #tpu.pipeline_mode<synchronous>, transform_indices = @transform_10, window_bounds = array<i64: 1, 32>}, {pipeline_mode = #tpu.pipeline_mode<synchronous>, transform_indices = @transform_11, window_bounds = array<i64: 9, 32, 8>}, {pipeline_mode = #tpu.pipeline_mode<synchronous>, transform_indices = @transform_12, window_bounds = array<i64: 1, 8>}, {pipeline_mode = #tpu.pipeline_mode<synchronous>, transform_indices = @transform_13, window_bounds = array<i64: 32, 128>}, {pipeline_mode = #tpu.pipeline_mode<synchronous>, transform_indices = @transform_14, window_bounds = array<i64: 1, 128>}, {transform_indices = @transform_15, window_bounds = array<i64: 128, 128>}]} {
    %c0 = arith.constant 0 : index
    %c0_0 = arith.constant 0 : index
    %0 = vector.load %arg1[%c0, %c0_0] : memref<128x16xf32, #tpu.memory_space<vmem>>, vector<128x16xf32>
    %c0_1 = arith.constant 0 : index
    %c0_2 = arith.constant 0 : index
    %1 = vector.load %arg17[%c0_1, %c0_2] : memref<128x32xf32, #tpu.memory_space<vmem>>, vector<128x16xf32>
    tpu.vector_store %arg17[%c0_1, %c0_2], %0 {strides = array<i32>} : memref<128x32xf32, #tpu.memory_space<vmem>>, vector<128x16xf32>,
    %cst = arith.constant 0.000000e+00 : bf16
    %2 = vector.broadcast %cst : bf16 to vector<2x1x10x32xbf16>
    %cst_3 = arith.constant 0.000000e+00 : bf16
    %3 = vector.broadcast %cst_3 : bf16 to vector<2x10x1x32xbf16>
    %c0_4 = arith.constant 0 : index
    %c0_5 = arith.constant 0 : index
    %c0_6 = arith.constant 0 : index
    %c0_7 = arith.constant 0 : index
    %4 = vector.load %arg18[%c0_4, %c0_5, %c0_6, %c0_7] : memref<2x10x10x32xbf16, #tpu.memory_space<vmem>>, vector<2x1x10x32xbf16>
    tpu.vector_store %arg18[%c0_4, %c0_5, %c0_6, %c0_7], %2 {strides = array<i32>} : memref<2x10x10x32xbf16, #tpu.memory_space<vmem>>, vector<2x1x10x32xbf16>,
    %c0_8 = arith.constant 0 : index
    %c9 = arith.constant 9 : index
    %c0_9 = arith.constant 0 : index
    %c0_10 = arith.constant 0 : index
    %5 = vector.load %arg18[%c0_8, %c9, %c0_9, %c0_10] : memref<2x10x10x32xbf16, #tpu.memory_space<vmem>>, vector<2x1x10x32xbf16>
    tpu.vector_store %arg18[%c0_8, %c9, %c0_9, %c0_10], %2 {strides = array<i32>} : memref<2x10x10x32xbf16, #tpu.memory_space<vmem>>, vector<2x1x10x32xbf16>,
    %c0_11 = arith.constant 0 : index
    %c0_12 = arith.constant 0 : index
    %c0_13 = arith.constant 0 : index
    %c0_14 = arith.constant 0 : index
    %6 = vector.load %arg18[%c0_11, %c0_12, %c0_13, %c0_14] : memref<2x10x10x32xbf16, #tpu.memory_space<vmem>>, vector<2x10x1x32xbf16>
    tpu.vector_store %arg18[%c0_11, %c0_12, %c0_13, %c0_14], %3 {strides = array<i32>} : memref<2x10x10x32xbf16, #tpu.memory_space<vmem>>, vector<2x10x1x32xbf16>,
    %c0_15 = arith.constant 0 : index
    %c0_16 = arith.constant 0 : index
    %c9_17 = arith.constant 9 : index
    %c0_18 = arith.constant 0 : index
    %7 = vector.load %arg18[%c0_15, %c0_16, %c9_17, %c0_18] : memref<2x10x10x32xbf16, #tpu.memory_space<vmem>>, vector<2x10x1x32xbf16>
    tpu.vector_store %arg18[%c0_15, %c0_16, %c9_17, %c0_18], %3 {strides = array<i32>} : memref<2x10x10x32xbf16, #tpu.memory_space<vmem>>, vector<2x10x1x32xbf16>,
    %c0_19 = arith.constant 0 : index
    %c0_20 = arith.constant 0 : index
    %8 = vector.load %arg17[%c0_19, %c0_20] : memref<128x32xf32, #tpu.memory_space<vmem>>, vector<128x16xf32>
    %c0_21 = arith.constant 0 : index
    %c0_22 = arith.constant 0 : index
    %9 = vector.load %arg2[%c0_21, %c0_22] : memref<1x16xf32, #tpu.memory_space<vmem>>, vector<1x16xf32>
    %10 = vector.broadcast %9 : vector<1x16xf32> to vector<128x16xf32>
    %11 = arith.mulf %8, %10 : vector<128x16xf32>
    %c0_23 = arith.constant 0 : index
    %c0_24 = arith.constant 0 : index
    %12 = vector.load %arg3[%c0_23, %c0_24] : memref<1x16xf32, #tpu.memory_space<vmem>>, vector<1x16xf32>
    %13 = vector.broadcast %12 : vector<1x16xf32> to vector<128x16xf32>
    %14 = arith.addf %11, %13 : vector<128x16xf32>
    %cst_25 = arith.constant 0.000000e+00 : f32
    %15 = vector.broadcast %cst_25 : f32 to vector<128x16xf32>
    %16 = arith.maximumf %14, %15 : vector<128x16xf32>
    %17 = arith.truncf %16 : vector<128x16xf32> to vector<128x16xbf16>
    %c0_26 = arith.constant 0 : index
    %c0_27 = arith.constant 0 : index
    %18 = vector.load %arg4[%c0_26, %c0_27] : memref<16x32xbf16, #tpu.memory_space<vmem>>, vector<16x32xbf16>
    %cst_28 = arith.constant dense<0.000000e+00> : vector<128x32xf32>
    %19 = tpu.matmul %17, %18, %cst_28 {dimension_numbers = #tpu.dot_dimension_numbers<[1], [0], [0], [1], [0, 0, 1, 1], [], []>} : vector<128x16xbf16>, vector<16x32xbf16>, vector<128x32xf32> -> vector<128x32xf32>
    %c0_29 = arith.constant 0 : index
    %c0_30 = arith.constant 0 : index
    %20 = vector.load %arg5[%c0_29, %c0_30] : memref<1x32xf32, #tpu.memory_space<vmem>>, vector<1x32xf32>
    %21 = vector.broadcast %20 : vector<1x32xf32> to vector<128x32xf32>
    %22 = arith.addf %19, %21 : vector<128x32xf32>
    %cst_31 = arith.constant 0.000000e+00 : f32
    %23 = vector.broadcast %cst_31 : f32 to vector<128x32xf32>
    %24 = arith.maximumf %22, %23 : vector<128x32xf32>
    %25 = arith.truncf %24 : vector<128x32xf32> to vector<128x32xbf16>
    %26 = vector.shape_cast %25 : vector<128x32xbf16> to vector<2x8x8x32xbf16>
    %c0_32 = arith.constant 0 : index
    %c1 = arith.constant 1 : index
    %c1_33 = arith.constant 1 : index
    %c0_34 = arith.constant 0 : index
    %27 = vector.load %arg18[%c0_32, %c1, %c1_33, %c0_34] : memref<2x10x10x32xbf16, #tpu.memory_space<vmem>>, vector<2x8x8x32xbf16>
    tpu.vector_store %arg18[%c0_32, %c1, %c1_33, %c0_34], %26 {strides = array<i32>} : memref<2x10x10x32xbf16, #tpu.memory_space<vmem>>, vector<2x8x8x32xbf16>,
    %cst_35 = arith.constant 0.000000e+00 : f32
    %28 = vector.broadcast %cst_35 : f32 to vector<128x8xf32>
    %c0_36 = arith.constant 0 : index
    %c0_37 = arith.constant 0 : index
    %c0_38 = arith.constant 0 : index
    %c0_39 = arith.constant 0 : index
    %29 = vector.load %arg18[%c0_36, %c0_37, %c0_38, %c0_39] : memref<2x10x10x32xbf16, #tpu.memory_space<vmem>>, vector<2x8x8x32xbf16>
    %30 = vector.shape_cast %29 : vector<2x8x8x32xbf16> to vector<128x32xbf16>
    %c0_40 = arith.constant 0 : index
    %c0_41 = arith.constant 0 : index
    %c0_42 = arith.constant 0 : index
    %31 = vector.load %arg6[%c0_40, %c0_41, %c0_42] : memref<9x32x8xbf16, #tpu.memory_space<vmem>>, vector<1x32x8xbf16>
    %32 = vector.shape_cast %31 : vector<1x32x8xbf16> to vector<32x8xbf16>
    %cst_43 = arith.constant dense<0.000000e+00> : vector<128x8xf32>
    %33 = tpu.matmul %30, %32, %cst_43 {dimension_numbers = #tpu.dot_dimension_numbers<[1], [0], [0], [1], [0, 0, 1, 1], [], []>} : vector<128x32xbf16>, vector<32x8xbf16>, vector<128x8xf32> -> vector<128x8xf32>
    %34 = arith.addf %28, %33 : vector<128x8xf32>
    %c0_44 = arith.constant 0 : index
    %c0_45 = arith.constant 0 : index
    %c1_46 = arith.constant 1 : index
    %c0_47 = arith.constant 0 : index
    %35 = vector.load %arg18[%c0_44, %c0_45, %c1_46, %c0_47] : memref<2x10x10x32xbf16, #tpu.memory_space<vmem>>, vector<2x8x8x32xbf16>
    %36 = vector.shape_cast %35 : vector<2x8x8x32xbf16> to vector<128x32xbf16>
    %c1_48 = arith.constant 1 : index
    %c0_49 = arith.constant 0 : index
    %c0_50 = arith.constant 0 : index
    %37 = vector.load %arg6[%c1_48, %c0_49, %c0_50] : memref<9x32x8xbf16, #tpu.memory_space<vmem>>, vector<1x32x8xbf16>
    %38 = vector.shape_cast %37 : vector<1x32x8xbf16> to vector<32x8xbf16>
    %cst_51 = arith.constant dense<0.000000e+00> : vector<128x8xf32>
    %39 = tpu.matmul %36, %38, %cst_51 {dimension_numbers = #tpu.dot_dimension_numbers<[1], [0], [0], [1], [0, 0, 1, 1], [], []>} : vector<128x32xbf16>, vector<32x8xbf16>, vector<128x8xf32> -> vector<128x8xf32>
    %40 = arith.addf %34, %39 : vector<128x8xf32>
    %c0_52 = arith.constant 0 : index
    %c0_53 = arith.constant 0 : index
    %c2 = arith.constant 2 : index
    %c0_54 = arith.constant 0 : index
    %41 = vector.load %arg18[%c0_52, %c0_53, %c2, %c0_54] : memref<2x10x10x32xbf16, #tpu.memory_space<vmem>>, vector<2x8x8x32xbf16>
    %42 = vector.shape_cast %41 : vector<2x8x8x32xbf16> to vector<128x32xbf16>
    %c2_55 = arith.constant 2 : index
    %c0_56 = arith.constant 0 : index
    %c0_57 = arith.constant 0 : index
    %43 = vector.load %arg6[%c2_55, %c0_56, %c0_57] : memref<9x32x8xbf16, #tpu.memory_space<vmem>>, vector<1x32x8xbf16>
    %44 = vector.shape_cast %43 : vector<1x32x8xbf16> to vector<32x8xbf16>
    %cst_58 = arith.constant dense<0.000000e+00> : vector<128x8xf32>
    %45 = tpu.matmul %42, %44, %cst_58 {dimension_numbers = #tpu.dot_dimension_numbers<[1], [0], [0], [1], [0, 0, 1, 1], [], []>} : vector<128x32xbf16>, vector<32x8xbf16>, vector<128x8xf32> -> vector<128x8xf32>
    %46 = arith.addf %40, %45 : vector<128x8xf32>
    %c0_59 = arith.constant 0 : index
    %c1_60 = arith.constant 1 : index
    %c0_61 = arith.constant 0 : index
    %c0_62 = arith.constant 0 : index
    %47 = vector.load %arg18[%c0_59, %c1_60, %c0_61, %c0_62] : memref<2x10x10x32xbf16, #tpu.memory_space<vmem>>, vector<2x8x8x32xbf16>
    %48 = vector.shape_cast %47 : vector<2x8x8x32xbf16> to vector<128x32xbf16>
    %c3 = arith.constant 3 : index
    %c0_63 = arith.constant 0 : index
    %c0_64 = arith.constant 0 : index
    %49 = vector.load %arg6[%c3, %c0_63, %c0_64] : memref<9x32x8xbf16, #tpu.memory_space<vmem>>, vector<1x32x8xbf16>
    %50 = vector.shape_cast %49 : vector<1x32x8xbf16> to vector<32x8xbf16>
    %cst_65 = arith.constant dense<0.000000e+00> : vector<128x8xf32>
    %51 = tpu.matmul %48, %50, %cst_65 {dimension_numbers = #tpu.dot_dimension_numbers<[1], [0], [0], [1], [0, 0, 1, 1], [], []>} : vector<128x32xbf16>, vector<32x8xbf16>, vector<128x8xf32> -> vector<128x8xf32>
    %52 = arith.addf %46, %51 : vector<128x8xf32>
    %c0_66 = arith.constant 0 : index
    %c1_67 = arith.constant 1 : index
    %c1_68 = arith.constant 1 : index
    %c0_69 = arith.constant 0 : index
    %53 = vector.load %arg18[%c0_66, %c1_67, %c1_68, %c0_69] : memref<2x10x10x32xbf16, #tpu.memory_space<vmem>>, vector<2x8x8x32xbf16>
    %54 = vector.shape_cast %53 : vector<2x8x8x32xbf16> to vector<128x32xbf16>
    %c4 = arith.constant 4 : index
    %c0_70 = arith.constant 0 : index
    %c0_71 = arith.constant 0 : index
    %55 = vector.load %arg6[%c4, %c0_70, %c0_71] : memref<9x32x8xbf16, #tpu.memory_space<vmem>>, vector<1x32x8xbf16>
    %56 = vector.shape_cast %55 : vector<1x32x8xbf16> to vector<32x8xbf16>
    %cst_72 = arith.constant dense<0.000000e+00> : vector<128x8xf32>
    %57 = tpu.matmul %54, %56, %cst_72 {dimension_numbers = #tpu.dot_dimension_numbers<[1], [0], [0], [1], [0, 0, 1, 1], [], []>} : vector<128x32xbf16>, vector<32x8xbf16>, vector<128x8xf32> -> vector<128x8xf32>
    %58 = arith.addf %52, %57 : vector<128x8xf32>
    %c0_73 = arith.constant 0 : index
    %c1_74 = arith.constant 1 : index
    %c2_75 = arith.constant 2 : index
    %c0_76 = arith.constant 0 : index
    %59 = vector.load %arg18[%c0_73, %c1_74, %c2_75, %c0_76] : memref<2x10x10x32xbf16, #tpu.memory_space<vmem>>, vector<2x8x8x32xbf16>
    %60 = vector.shape_cast %59 : vector<2x8x8x32xbf16> to vector<128x32xbf16>
    %c5 = arith.constant 5 : index
    %c0_77 = arith.constant 0 : index
    %c0_78 = arith.constant 0 : index
    %61 = vector.load %arg6[%c5, %c0_77, %c0_78] : memref<9x32x8xbf16, #tpu.memory_space<vmem>>, vector<1x32x8xbf16>
    %62 = vector.shape_cast %61 : vector<1x32x8xbf16> to vector<32x8xbf16>
    %cst_79 = arith.constant dense<0.000000e+00> : vector<128x8xf32>
    %63 = tpu.matmul %60, %62, %cst_79 {dimension_numbers = #tpu.dot_dimension_numbers<[1], [0], [0], [1], [0, 0, 1, 1], [], []>} : vector<128x32xbf16>, vector<32x8xbf16>, vector<128x8xf32> -> vector<128x8xf32>
    %64 = arith.addf %58, %63 : vector<128x8xf32>
    %c0_80 = arith.constant 0 : index
    %c2_81 = arith.constant 2 : index
    %c0_82 = arith.constant 0 : index
    %c0_83 = arith.constant 0 : index
    %65 = vector.load %arg18[%c0_80, %c2_81, %c0_82, %c0_83] : memref<2x10x10x32xbf16, #tpu.memory_space<vmem>>, vector<2x8x8x32xbf16>
    %66 = vector.shape_cast %65 : vector<2x8x8x32xbf16> to vector<128x32xbf16>
    %c6 = arith.constant 6 : index
    %c0_84 = arith.constant 0 : index
    %c0_85 = arith.constant 0 : index
    %67 = vector.load %arg6[%c6, %c0_84, %c0_85] : memref<9x32x8xbf16, #tpu.memory_space<vmem>>, vector<1x32x8xbf16>
    %68 = vector.shape_cast %67 : vector<1x32x8xbf16> to vector<32x8xbf16>
    %cst_86 = arith.constant dense<0.000000e+00> : vector<128x8xf32>
    %69 = tpu.matmul %66, %68, %cst_86 {dimension_numbers = #tpu.dot_dimension_numbers<[1], [0], [0], [1], [0, 0, 1, 1], [], []>} : vector<128x32xbf16>, vector<32x8xbf16>, vector<128x8xf32> -> vector<128x8xf32>
    %70 = arith.addf %64, %69 : vector<128x8xf32>
    %c0_87 = arith.constant 0 : index
    %c2_88 = arith.constant 2 : index
    %c1_89 = arith.constant 1 : index
    %c0_90 = arith.constant 0 : index
    %71 = vector.load %arg18[%c0_87, %c2_88, %c1_89, %c0_90] : memref<2x10x10x32xbf16, #tpu.memory_space<vmem>>, vector<2x8x8x32xbf16>
    %72 = vector.shape_cast %71 : vector<2x8x8x32xbf16> to vector<128x32xbf16>
    %c7 = arith.constant 7 : index
    %c0_91 = arith.constant 0 : index
    %c0_92 = arith.constant 0 : index
    %73 = vector.load %arg6[%c7, %c0_91, %c0_92] : memref<9x32x8xbf16, #tpu.memory_space<vmem>>, vector<1x32x8xbf16>
    %74 = vector.shape_cast %73 : vector<1x32x8xbf16> to vector<32x8xbf16>
    %cst_93 = arith.constant dense<0.000000e+00> : vector<128x8xf32>
    %75 = tpu.matmul %72, %74, %cst_93 {dimension_numbers = #tpu.dot_dimension_numbers<[1], [0], [0], [1], [0, 0, 1, 1], [], []>} : vector<128x32xbf16>, vector<32x8xbf16>, vector<128x8xf32> -> vector<128x8xf32>
    %76 = arith.addf %70, %75 : vector<128x8xf32>
    %c0_94 = arith.constant 0 : index
    %c2_95 = arith.constant 2 : index
    %c2_96 = arith.constant 2 : index
    %c0_97 = arith.constant 0 : index
    %77 = vector.load %arg18[%c0_94, %c2_95, %c2_96, %c0_97] : memref<2x10x10x32xbf16, #tpu.memory_space<vmem>>, vector<2x8x8x32xbf16>
    %78 = vector.shape_cast %77 : vector<2x8x8x32xbf16> to vector<128x32xbf16>
    %c8 = arith.constant 8 : index
    %c0_98 = arith.constant 0 : index
    %c0_99 = arith.constant 0 : index
    %79 = vector.load %arg6[%c8, %c0_98, %c0_99] : memref<9x32x8xbf16, #tpu.memory_space<vmem>>, vector<1x32x8xbf16>
    %80 = vector.shape_cast %79 : vector<1x32x8xbf16> to vector<32x8xbf16>
    %cst_100 = arith.constant dense<0.000000e+00> : vector<128x8xf32>
    %81 = tpu.matmul %78, %80, %cst_100 {dimension_numbers = #tpu.dot_dimension_numbers<[1], [0], [0], [1], [0, 0, 1, 1], [], []>} : vector<128x32xbf16>, vector<32x8xbf16>, vector<128x8xf32> -> vector<128x8xf32>
    %82 = arith.addf %76, %81 : vector<128x8xf32>
    %c0_101 = arith.constant 0 : index
    %c0_102 = arith.constant 0 : index
    %83 = vector.load %arg7[%c0_101, %c0_102] : memref<1x8xf32, #tpu.memory_space<vmem>>, vector<1x8xf32>
    %84 = vector.broadcast %83 : vector<1x8xf32> to vector<128x8xf32>
    %85 = arith.addf %82, %84 : vector<128x8xf32>
    %c0_103 = arith.constant 0 : index
    %c16 = arith.constant 16 : index
    %86 = vector.load %arg17[%c0_103, %c16] : memref<128x32xf32, #tpu.memory_space<vmem>>, vector<128x8xf32>
    tpu.vector_store %arg17[%c0_103, %c16], %85 {strides = array<i32>} : memref<128x32xf32, #tpu.memory_space<vmem>>, vector<128x8xf32>,
    %c0_104 = arith.constant 0 : index
    %c0_105 = arith.constant 0 : index
    %87 = vector.load %arg17[%c0_104, %c0_105] : memref<128x32xf32, #tpu.memory_space<vmem>>, vector<128x24xf32>
    %c0_106 = arith.constant 0 : index
    %c0_107 = arith.constant 0 : index
    %88 = vector.load %arg8[%c0_106, %c0_107] : memref<1x24xf32, #tpu.memory_space<vmem>>, vector<1x24xf32>
    %89 = vector.broadcast %88 : vector<1x24xf32> to vector<128x24xf32>
    %90 = arith.mulf %87, %89 : vector<128x24xf32>
    %c0_108 = arith.constant 0 : index
    %c0_109 = arith.constant 0 : index
    %91 = vector.load %arg9[%c0_108, %c0_109] : memref<1x24xf32, #tpu.memory_space<vmem>>, vector<1x24xf32>
    %92 = vector.broadcast %91 : vector<1x24xf32> to vector<128x24xf32>
    %93 = arith.addf %90, %92 : vector<128x24xf32>
    %cst_110 = arith.constant 0.000000e+00 : f32
    %94 = vector.broadcast %cst_110 : f32 to vector<128x24xf32>
    %95 = arith.maximumf %93, %94 : vector<128x24xf32>
    %96 = arith.truncf %95 : vector<128x24xf32> to vector<128x24xbf16>
    %c0_111 = arith.constant 0 : index
    %c0_112 = arith.constant 0 : index
    %97 = vector.load %arg10[%c0_111, %c0_112] : memref<24x32xbf16, #tpu.memory_space<vmem>>, vector<24x32xbf16>
    %cst_113 = arith.constant dense<0.000000e+00> : vector<128x32xf32>
    %98 = tpu.matmul %96, %97, %cst_113 {dimension_numbers = #tpu.dot_dimension_numbers<[1], [0], [0], [1], [0, 0, 1, 1], [], []>} : vector<128x24xbf16>, vector<24x32xbf16>, vector<128x32xf32> -> vector<128x32xf32>
    %c0_114 = arith.constant 0 : index
    %c0_115 = arith.constant 0 : index
    %99 = vector.load %arg11[%c0_114, %c0_115] : memref<1x32xf32, #tpu.memory_space<vmem>>, vector<1x32xf32>
    %100 = vector.broadcast %99 : vector<1x32xf32> to vector<128x32xf32>
    %101 = arith.addf %98, %100 : vector<128x32xf32>
    %cst_116 = arith.constant 0.000000e+00 : f32
    %102 = vector.broadcast %cst_116 : f32 to vector<128x32xf32>
    %103 = arith.maximumf %101, %102 : vector<128x32xf32>
    %104 = arith.truncf %103 : vector<128x32xf32> to vector<128x32xbf16>
    %105 = vector.shape_cast %104 : vector<128x32xbf16> to vector<2x8x8x32xbf16>
    %c0_117 = arith.constant 0 : index
    %c1_118 = arith.constant 1 : index
    %c1_119 = arith.constant 1 : index
    %c0_120 = arith.constant 0 : index
    %106 = vector.load %arg18[%c0_117, %c1_118, %c1_119, %c0_120] : memref<2x10x10x32xbf16, #tpu.memory_space<vmem>>, vector<2x8x8x32xbf16>
    tpu.vector_store %arg18[%c0_117, %c1_118, %c1_119, %c0_120], %105 {strides = array<i32>} : memref<2x10x10x32xbf16, #tpu.memory_space<vmem>>, vector<2x8x8x32xbf16>,
    %cst_121 = arith.constant 0.000000e+00 : f32
    %107 = vector.broadcast %cst_121 : f32 to vector<128x8xf32>
    %c0_122 = arith.constant 0 : index
    %c0_123 = arith.constant 0 : index
    %c0_124 = arith.constant 0 : index
    %c0_125 = arith.constant 0 : index
    %108 = vector.load %arg18[%c0_122, %c0_123, %c0_124, %c0_125] : memref<2x10x10x32xbf16, #tpu.memory_space<vmem>>, vector<2x8x8x32xbf16>
    %109 = vector.shape_cast %108 : vector<2x8x8x32xbf16> to vector<128x32xbf16>
    %c0_126 = arith.constant 0 : index
    %c0_127 = arith.constant 0 : index
    %c0_128 = arith.constant 0 : index
    %110 = vector.load %arg12[%c0_126, %c0_127, %c0_128] : memref<9x32x8xbf16, #tpu.memory_space<vmem>>, vector<1x32x8xbf16>
    %111 = vector.shape_cast %110 : vector<1x32x8xbf16> to vector<32x8xbf16>
    %cst_129 = arith.constant dense<0.000000e+00> : vector<128x8xf32>
    %112 = tpu.matmul %109, %111, %cst_129 {dimension_numbers = #tpu.dot_dimension_numbers<[1], [0], [0], [1], [0, 0, 1, 1], [], []>} : vector<128x32xbf16>, vector<32x8xbf16>, vector<128x8xf32> -> vector<128x8xf32>
    %113 = arith.addf %107, %112 : vector<128x8xf32>
    %c0_130 = arith.constant 0 : index
    %c0_131 = arith.constant 0 : index
    %c1_132 = arith.constant 1 : index
    %c0_133 = arith.constant 0 : index
    %114 = vector.load %arg18[%c0_130, %c0_131, %c1_132, %c0_133] : memref<2x10x10x32xbf16, #tpu.memory_space<vmem>>, vector<2x8x8x32xbf16>
    %115 = vector.shape_cast %114 : vector<2x8x8x32xbf16> to vector<128x32xbf16>
    %c1_134 = arith.constant 1 : index
    %c0_135 = arith.constant 0 : index
    %c0_136 = arith.constant 0 : index
    %116 = vector.load %arg12[%c1_134, %c0_135, %c0_136] : memref<9x32x8xbf16, #tpu.memory_space<vmem>>, vector<1x32x8xbf16>
    %117 = vector.shape_cast %116 : vector<1x32x8xbf16> to vector<32x8xbf16>
    %cst_137 = arith.constant dense<0.000000e+00> : vector<128x8xf32>
    %118 = tpu.matmul %115, %117, %cst_137 {dimension_numbers = #tpu.dot_dimension_numbers<[1], [0], [0], [1], [0, 0, 1, 1], [], []>} : vector<128x32xbf16>, vector<32x8xbf16>, vector<128x8xf32> -> vector<128x8xf32>
    %119 = arith.addf %113, %118 : vector<128x8xf32>
    %c0_138 = arith.constant 0 : index
    %c0_139 = arith.constant 0 : index
    %c2_140 = arith.constant 2 : index
    %c0_141 = arith.constant 0 : index
    %120 = vector.load %arg18[%c0_138, %c0_139, %c2_140, %c0_141] : memref<2x10x10x32xbf16, #tpu.memory_space<vmem>>, vector<2x8x8x32xbf16>
    %121 = vector.shape_cast %120 : vector<2x8x8x32xbf16> to vector<128x32xbf16>
    %c2_142 = arith.constant 2 : index
    %c0_143 = arith.constant 0 : index
    %c0_144 = arith.constant 0 : index
    %122 = vector.load %arg12[%c2_142, %c0_143, %c0_144] : memref<9x32x8xbf16, #tpu.memory_space<vmem>>, vector<1x32x8xbf16>
    %123 = vector.shape_cast %122 : vector<1x32x8xbf16> to vector<32x8xbf16>
    %cst_145 = arith.constant dense<0.000000e+00> : vector<128x8xf32>
    %124 = tpu.matmul %121, %123, %cst_145 {dimension_numbers = #tpu.dot_dimension_numbers<[1], [0], [0], [1], [0, 0, 1, 1], [], []>} : vector<128x32xbf16>, vector<32x8xbf16>, vector<128x8xf32> -> vector<128x8xf32>
    %125 = arith.addf %119, %124 : vector<128x8xf32>
    %c0_146 = arith.constant 0 : index
    %c1_147 = arith.constant 1 : index
    %c0_148 = arith.constant 0 : index
    %c0_149 = arith.constant 0 : index
    %126 = vector.load %arg18[%c0_146, %c1_147, %c0_148, %c0_149] : memref<2x10x10x32xbf16, #tpu.memory_space<vmem>>, vector<2x8x8x32xbf16>
    %127 = vector.shape_cast %126 : vector<2x8x8x32xbf16> to vector<128x32xbf16>
    %c3_150 = arith.constant 3 : index
    %c0_151 = arith.constant 0 : index
    %c0_152 = arith.constant 0 : index
    %128 = vector.load %arg12[%c3_150, %c0_151, %c0_152] : memref<9x32x8xbf16, #tpu.memory_space<vmem>>, vector<1x32x8xbf16>
    %129 = vector.shape_cast %128 : vector<1x32x8xbf16> to vector<32x8xbf16>
    %cst_153 = arith.constant dense<0.000000e+00> : vector<128x8xf32>
    %130 = tpu.matmul %127, %129, %cst_153 {dimension_numbers = #tpu.dot_dimension_numbers<[1], [0], [0], [1], [0, 0, 1, 1], [], []>} : vector<128x32xbf16>, vector<32x8xbf16>, vector<128x8xf32> -> vector<128x8xf32>
    %131 = arith.addf %125, %130 : vector<128x8xf32>
    %c0_154 = arith.constant 0 : index
    %c1_155 = arith.constant 1 : index
    %c1_156 = arith.constant 1 : index
    %c0_157 = arith.constant 0 : index
    %132 = vector.load %arg18[%c0_154, %c1_155, %c1_156, %c0_157] : memref<2x10x10x32xbf16, #tpu.memory_space<vmem>>, vector<2x8x8x32xbf16>
    %133 = vector.shape_cast %132 : vector<2x8x8x32xbf16> to vector<128x32xbf16>
    %c4_158 = arith.constant 4 : index
    %c0_159 = arith.constant 0 : index
    %c0_160 = arith.constant 0 : index
    %134 = vector.load %arg12[%c4_158, %c0_159, %c0_160] : memref<9x32x8xbf16, #tpu.memory_space<vmem>>, vector<1x32x8xbf16>
    %135 = vector.shape_cast %134 : vector<1x32x8xbf16> to vector<32x8xbf16>
    %cst_161 = arith.constant dense<0.000000e+00> : vector<128x8xf32>
    %136 = tpu.matmul %133, %135, %cst_161 {dimension_numbers = #tpu.dot_dimension_numbers<[1], [0], [0], [1], [0, 0, 1, 1], [], []>} : vector<128x32xbf16>, vector<32x8xbf16>, vector<128x8xf32> -> vector<128x8xf32>
    %137 = arith.addf %131, %136 : vector<128x8xf32>
    %c0_162 = arith.constant 0 : index
    %c1_163 = arith.constant 1 : index
    %c2_164 = arith.constant 2 : index
    %c0_165 = arith.constant 0 : index
    %138 = vector.load %arg18[%c0_162, %c1_163, %c2_164, %c0_165] : memref<2x10x10x32xbf16, #tpu.memory_space<vmem>>, vector<2x8x8x32xbf16>
    %139 = vector.shape_cast %138 : vector<2x8x8x32xbf16> to vector<128x32xbf16>
    %c5_166 = arith.constant 5 : index
    %c0_167 = arith.constant 0 : index
    %c0_168 = arith.constant 0 : index
    %140 = vector.load %arg12[%c5_166, %c0_167, %c0_168] : memref<9x32x8xbf16, #tpu.memory_space<vmem>>, vector<1x32x8xbf16>
    %141 = vector.shape_cast %140 : vector<1x32x8xbf16> to vector<32x8xbf16>
    %cst_169 = arith.constant dense<0.000000e+00> : vector<128x8xf32>
    %142 = tpu.matmul %139, %141, %cst_169 {dimension_numbers = #tpu.dot_dimension_numbers<[1], [0], [0], [1], [0, 0, 1, 1], [], []>} : vector<128x32xbf16>, vector<32x8xbf16>, vector<128x8xf32> -> vector<128x8xf32>
    %143 = arith.addf %137, %142 : vector<128x8xf32>
    %c0_170 = arith.constant 0 : index
    %c2_171 = arith.constant 2 : index
    %c0_172 = arith.constant 0 : index
    %c0_173 = arith.constant 0 : index
    %144 = vector.load %arg18[%c0_170, %c2_171, %c0_172, %c0_173] : memref<2x10x10x32xbf16, #tpu.memory_space<vmem>>, vector<2x8x8x32xbf16>
    %145 = vector.shape_cast %144 : vector<2x8x8x32xbf16> to vector<128x32xbf16>
    %c6_174 = arith.constant 6 : index
    %c0_175 = arith.constant 0 : index
    %c0_176 = arith.constant 0 : index
    %146 = vector.load %arg12[%c6_174, %c0_175, %c0_176] : memref<9x32x8xbf16, #tpu.memory_space<vmem>>, vector<1x32x8xbf16>
    %147 = vector.shape_cast %146 : vector<1x32x8xbf16> to vector<32x8xbf16>
    %cst_177 = arith.constant dense<0.000000e+00> : vector<128x8xf32>
    %148 = tpu.matmul %145, %147, %cst_177 {dimension_numbers = #tpu.dot_dimension_numbers<[1], [0], [0], [1], [0, 0, 1, 1], [], []>} : vector<128x32xbf16>, vector<32x8xbf16>, vector<128x8xf32> -> vector<128x8xf32>
    %149 = arith.addf %143, %148 : vector<128x8xf32>
    %c0_178 = arith.constant 0 : index
    %c2_179 = arith.constant 2 : index
    %c1_180 = arith.constant 1 : index
    %c0_181 = arith.constant 0 : index
    %150 = vector.load %arg18[%c0_178, %c2_179, %c1_180, %c0_181] : memref<2x10x10x32xbf16, #tpu.memory_space<vmem>>, vector<2x8x8x32xbf16>
    %151 = vector.shape_cast %150 : vector<2x8x8x32xbf16> to vector<128x32xbf16>
    %c7_182 = arith.constant 7 : index
    %c0_183 = arith.constant 0 : index
    %c0_184 = arith.constant 0 : index
    %152 = vector.load %arg12[%c7_182, %c0_183, %c0_184] : memref<9x32x8xbf16, #tpu.memory_space<vmem>>, vector<1x32x8xbf16>
    %153 = vector.shape_cast %152 : vector<1x32x8xbf16> to vector<32x8xbf16>
    %cst_185 = arith.constant dense<0.000000e+00> : vector<128x8xf32>
    %154 = tpu.matmul %151, %153, %cst_185 {dimension_numbers = #tpu.dot_dimension_numbers<[1], [0], [0], [1], [0, 0, 1, 1], [], []>} : vector<128x32xbf16>, vector<32x8xbf16>, vector<128x8xf32> -> vector<128x8xf32>
    %155 = arith.addf %149, %154 : vector<128x8xf32>
    %c0_186 = arith.constant 0 : index
    %c2_187 = arith.constant 2 : index
    %c2_188 = arith.constant 2 : index
    %c0_189 = arith.constant 0 : index
    %156 = vector.load %arg18[%c0_186, %c2_187, %c2_188, %c0_189] : memref<2x10x10x32xbf16, #tpu.memory_space<vmem>>, vector<2x8x8x32xbf16>
    %157 = vector.shape_cast %156 : vector<2x8x8x32xbf16> to vector<128x32xbf16>
    %c8_190 = arith.constant 8 : index
    %c0_191 = arith.constant 0 : index
    %c0_192 = arith.constant 0 : index
    %158 = vector.load %arg12[%c8_190, %c0_191, %c0_192] : memref<9x32x8xbf16, #tpu.memory_space<vmem>>, vector<1x32x8xbf16>
    %159 = vector.shape_cast %158 : vector<1x32x8xbf16> to vector<32x8xbf16>
    %cst_193 = arith.constant dense<0.000000e+00> : vector<128x8xf32>
    %160 = tpu.matmul %157, %159, %cst_193 {dimension_numbers = #tpu.dot_dimension_numbers<[1], [0], [0], [1], [0, 0, 1, 1], [], []>} : vector<128x32xbf16>, vector<32x8xbf16>, vector<128x8xf32> -> vector<128x8xf32>
    %161 = arith.addf %155, %160 : vector<128x8xf32>
    %c0_194 = arith.constant 0 : index
    %c0_195 = arith.constant 0 : index
    %162 = vector.load %arg13[%c0_194, %c0_195] : memref<1x8xf32, #tpu.memory_space<vmem>>, vector<1x8xf32>
    %163 = vector.broadcast %162 : vector<1x8xf32> to vector<128x8xf32>
    %164 = arith.addf %161, %163 : vector<128x8xf32>
    %c0_196 = arith.constant 0 : index
    %c24 = arith.constant 24 : index
    %165 = vector.load %arg17[%c0_196, %c24] : memref<128x32xf32, #tpu.memory_space<vmem>>, vector<128x8xf32>
    tpu.vector_store %arg17[%c0_196, %c24], %164 {strides = array<i32>} : memref<128x32xf32, #tpu.memory_space<vmem>>, vector<128x8xf32>,
    %c0_197 = arith.constant 0 : index
    %c0_198 = arith.constant 0 : index
    %166 = vector.load %arg17[%c0_197, %c0_198] : memref<128x32xf32, #tpu.memory_space<vmem>>, vector<128x32xf32>
    %167 = arith.truncf %166 : vector<128x32xf32> to vector<128x32xbf16>
    %c0_199 = arith.constant 0 : index
    %c0_200 = arith.constant 0 : index
    %168 = vector.load %arg14[%c0_199, %c0_200] : memref<32x128xbf16, #tpu.memory_space<vmem>>, vector<32x128xbf16>
    %cst_201 = arith.constant dense<0.000000e+00> : vector<128x128xf32>
    %169 = tpu.matmul %167, %168, %cst_201 {dimension_numbers = #tpu.dot_dimension_numbers<[1], [0], [0], [1], [0, 0, 1, 1], [], []>} : vector<128x32xbf16>, vector<32x128xbf16>, vector<128x128xf32> -> vector<128x128xf32>
    %c0_202 = arith.constant 0 : index
    %c0_203 = arith.constant 0 : index
    %170 = vector.load %arg15[%c0_202, %c0_203] : memref<1x128xf32, #tpu.memory_space<vmem>>, vector<1x128xf32>
    %171 = vector.broadcast %170 : vector<1x128xf32> to vector<128x128xf32>
    %172 = arith.addf %169, %171 : vector<128x128xf32>
    %cst_204 = arith.constant 0.000000e+00 : f32
    %173 = vector.broadcast %cst_204 : f32 to vector<128x128xf32>
    %174 = arith.maximumf %172, %173 : vector<128x128xf32>
    %c0_205 = arith.constant 0 : index
    %c0_206 = arith.constant 0 : index
    %175 = vector.load %arg16[%c0_205, %c0_206] : memref<128x128xf32, #tpu.memory_space<vmem>>, vector<128x128xf32>
    tpu.vector_store %arg16[%c0_205, %c0_206], %174 {strides = array<i32>} : memref<128x128xf32, #tpu.memory_space<vmem>>, vector<128x128xf32>,
    return
  }
  func.func @transform_0(%arg0: i32) -> (i32, i32) {
    %c0_i32 = arith.constant 0 : i32
    %c0_i32_0 = arith.constant 0 : i32
    return %arg0, %c0_i32 : i32, i32
  }
  func.func @transform_1(%arg0: i32) -> (i32, i32) {
    %c0_i32 = arith.constant 0 : i32
    %c0_i32_0 = arith.constant 0 : i32
    %c0_i32_1 = arith.constant 0 : i32
    return %c0_i32, %c0_i32_0 : i32, i32
  }
  func.func @transform_2(%arg0: i32) -> (i32, i32) {
    %c0_i32 = arith.constant 0 : i32
    %c0_i32_0 = arith.constant 0 : i32
    %c0_i32_1 = arith.constant 0 : i32
    return %c0_i32, %c0_i32_0 : i32, i32
  }
  func.func @transform_3(%arg0: i32) -> (i32, i32) {
    %c0_i32 = arith.constant 0 : i32
    %c0_i32_0 = arith.constant 0 : i32
    %c0_i32_1 = arith.constant 0 : i32
    return %c0_i32, %c0_i32_0 : i32, i32
  }
  func.func @transform_4(%arg0: i32) -> (i32, i32) {
    %c0_i32 = arith.constant 0 : i32
    %c0_i32_0 = arith.constant 0 : i32
    %c0_i32_1 = arith.constant 0 : i32
    return %c0_i32, %c0_i32_0 : i32, i32
  }
  func.func @transform_5(%arg0: i32) -> (i32, i32, i32) {
    %c0_i32 = arith.constant 0 : i32
    %c0_i32_0 = arith.constant 0 : i32
    %c0_i32_1 = arith.constant 0 : i32
    %c0_i32_2 = arith.constant 0 : i32
    return %c0_i32, %c0_i32_0, %c0_i32_1 : i32, i32, i32
  }
  func.func @transform_6(%arg0: i32) -> (i32, i32) {
    %c0_i32 = arith.constant 0 : i32
    %c0_i32_0 = arith.constant 0 : i32
    %c0_i32_1 = arith.constant 0 : i32
    return %c0_i32, %c0_i32_0 : i32, i32
  }
  func.func @transform_7(%arg0: i32) -> (i32, i32) {
    %c0_i32 = arith.constant 0 : i32
    %c0_i32_0 = arith.constant 0 : i32
    %c0_i32_1 = arith.constant 0 : i32
    return %c0_i32, %c0_i32_0 : i32, i32
  }
  func.func @transform_8(%arg0: i32) -> (i32, i32) {
    %c0_i32 = arith.constant 0 : i32
    %c0_i32_0 = arith.constant 0 : i32
    %c0_i32_1 = arith.constant 0 : i32
    return %c0_i32, %c0_i32_0 : i32, i32
  }
  func.func @transform_9(%arg0: i32) -> (i32, i32) {
    %c0_i32 = arith.constant 0 : i32
    %c0_i32_0 = arith.constant 0 : i32
    %c0_i32_1 = arith.constant 0 : i32
    return %c0_i32, %c0_i32_0 : i32, i32
  }
  func.func @transform_10(%arg0: i32) -> (i32, i32) {
    %c0_i32 = arith.constant 0 : i32
    %c0_i32_0 = arith.constant 0 : i32
    %c0_i32_1 = arith.constant 0 : i32
    return %c0_i32, %c0_i32_0 : i32, i32
  }
  func.func @transform_11(%arg0: i32) -> (i32, i32, i32) {
    %c0_i32 = arith.constant 0 : i32
    %c0_i32_0 = arith.constant 0 : i32
    %c0_i32_1 = arith.constant 0 : i32
    %c0_i32_2 = arith.constant 0 : i32
    return %c0_i32, %c0_i32_0, %c0_i32_1 : i32, i32, i32
  }
  func.func @transform_12(%arg0: i32) -> (i32, i32) {
    %c0_i32 = arith.constant 0 : i32
    %c0_i32_0 = arith.constant 0 : i32
    %c0_i32_1 = arith.constant 0 : i32
    return %c0_i32, %c0_i32_0 : i32, i32
  }
  func.func @transform_13(%arg0: i32) -> (i32, i32) {
    %c0_i32 = arith.constant 0 : i32
    %c0_i32_0 = arith.constant 0 : i32
    %c0_i32_1 = arith.constant 0 : i32
    return %c0_i32, %c0_i32_0 : i32, i32
  }
  func.func @transform_14(%arg0: i32) -> (i32, i32) {
    %c0_i32 = arith.constant 0 : i32
    %c0_i32_0 = arith.constant 0 : i32
    %c0_i32_1 = arith.constant 0 : i32
    return %c0_i32, %c0_i32_0 : i32, i32
  }
  func.func @transform_15(%arg0: i32) -> (i32, i32) {
    %c0_i32 = arith.constant 0 : i32
    %c0_i32_0 = arith.constant 0 : i32
    return %arg0, %c0_i32 : i32, i32
  }
}

</mosaic_0001>

<bundles_post_ra>
// kernel: tpu_custom_call.1
= control target key start
LH: loop header
LB: loop body
LE: loop exit
PB: predicated region body
PF: predicated region fallthrough
CT: control target
= control target key end

     0   :  { %vm68_vm0 = vcmask 130048   ;;  %vm87_vm1 = vcmask 253952   ;;  %vm97_vm2 = vsmask.f32 256  ;;  %vm159_vm3 = vsmask.f32 7938  ;;  %s11291_s0 = inlined_call_operand.vmem [shape: f32[128,16], index: 0, kind: input, shape index: {}]   ;;  %s11292_s1 = inlined_call_operand.vmem [shape: f32[1,16], index: 1, kind: input, shape index: {}]   ;;  %s11293_s2 = inlined_call_operand.vmem [shape: f32[1,16], index: 2, kind: input, shape index: {}]   ;;  %s11294_s3 = inlined_call_operand.vmem [shape: bf16[16,32], index: 3, kind: input, shape index: {}]   ;;  %s11295_s4 = inlined_call_operand.vmem [shape: f32[1,32], index: 4, kind: input, shape index: {}]   ;;  %s11296_s5 = inlined_call_operand.vmem [shape: bf16[9,32,8], index: 5, kind: input, shape index: {}]   ;;  %s11297_s6 = inlined_call_operand.vmem [shape: f32[1,8], index: 6, kind: input, shape index: {}]   ;;  %s11298_s7 = inlined_call_operand.vmem [shape: f32[1,24], index: 7, kind: input, shape index: {}]   ;;  %s11299_s8 = inlined_call_operand.vmem [shape: f32[1,24], index: 8, kind: input, shape index: {}]   ;;  %s11300_s9 = inlined_call_operand.vmem [shape: bf16[24,32], index: 9, kind: input, shape index: {}]   ;;  %s11301_s10 = inlined_call_operand.vmem [shape: f32[1,32], index: 10, kind: input, shape index: {}]   ;;  %s11302_s11 = inlined_call_operand.vmem [shape: bf16[9,32,8], index: 11, kind: input, shape index: {}]   ;;  %s11303_s12 = inlined_call_operand.vmem [shape: f32[1,8], index: 12, kind: input, shape index: {}]   ;;  %s11304_s13 = inlined_call_operand.vmem [shape: bf16[32,128], index: 13, kind: input, shape index: {}]   ;;  %s11305_s14 = inlined_call_operand.vmem [shape: f32[1,128], index: 14, kind: input, shape index: {}]   ;;  %s11306_s15 = inlined_call_operand.hbm [shape: f32[128,128], index: 15, kind: output, shape index: {}]  }
   0x1   :  { %v8477_v0 = vld [vmem:[%s11294_s3] sm:$0xff]   ;;  %v53_v2 = vld [vmem:[%s11291_s0 + $0x8] sm:$0xff]  ;;  %v54_v3 = vld [vmem:[%s11291_s0 + $0x10] sm:$0xff]  ;;  %v11315_v19 = vmov 0 }
   0x2   :  { %v52_v1 = vld [vmem:[%s11291_s0] sm:$0xff]  ;;  %8050 = vmatprep.subr.bf16.mxu0 %v8477_v0  ;;  %8468 = vmatprep.subr.bf16.mxu1 %v8477_v0  ;;  %70 = vst.msk [vmem:[#allocation2 + $0x8] sm:$0xff] %vm68_vm0, %v53_v2  ;;  %v55_v4 = vld [vmem:[%s11291_s0 + $0x18] sm:$0xff]  ;;  %71 = vst.msk [vmem:[#allocation2 + $0x10] sm:$0xff] %vm68_vm0, %v54_v3 }
   0x3   :  { %69 = vst.msk [vmem:[#allocation2] sm:$0xff] %vm68_vm0, %v52_v1  ;;  %8051 = vmatpush3.bf16.msra.mxu0 %v8477_v0  ;;  %8469 = vmatpush3.bf16.msra.mxu1 %v8477_v0  ;;  %72 = vst.msk [vmem:[#allocation2 + $0x18] sm:$0xff] %vm68_vm0, %v55_v4  ;;  %v60_v5 = vld [vmem:[%s11291_s0 + $0x40] sm:$0xff]  ;;  %v61_v6 = vld [vmem:[%s11291_s0 + $0x48] sm:$0xff] }
   0x4   :  { %v62_v7 = vld [vmem:[%s11291_s0 + $0x50] sm:$0xff]  ;;  %77 = vst.msk [vmem:[#allocation2 + $0x40] sm:$0xff] %vm68_vm0, %v60_v5  ;;  %78 = vst.msk [vmem:[#allocation2 + $0x48] sm:$0xff] %vm68_vm0, %v61_v6  ;;  %v63_v8 = vld [vmem:[%s11291_s0 + $0x58] sm:$0xff] }
   0x5   :  { %79 = vst.msk [vmem:[#allocation2 + $0x50] sm:$0xff] %vm68_vm0, %v62_v7  ;;  %v56_v9 = vld [vmem:[%s11291_s0 + $0x20] sm:$0xff]  ;;  %v57_v10 = vld [vmem:[%s11291_s0 + $0x28] sm:$0xff]  ;;  %80 = vst.msk [vmem:[#allocation2 + $0x58] sm:$0xff] %vm68_vm0, %v63_v8 }
   0x6   :  { %v8717_v11 = vld [vmem:[%s11292_s1] ss:$0 sm:$0xff]  ;;  %73 = vst.msk [vmem:[#allocation2 + $0x20] sm:$0xff] %vm68_vm0, %v56_v9  ;;  %74 = vst.msk [vmem:[#allocation2 + $0x28] sm:$0xff] %vm68_vm0, %v57_v10  ;;  %v58_v12 = vld [vmem:[%s11291_s0 + $0x30] sm:$0xff] }
   0x7   :  { %v59_v13 = vld [vmem:[%s11291_s0 + $0x38] sm:$0xff]  ;;  %v64_v14 = vld [vmem:[%s11291_s0 + $0x60] sm:$0xff]  ;;  %75 = vst.msk [vmem:[#allocation2 + $0x30] sm:$0xff] %vm68_vm0, %v58_v12  ;;  %v65_v15 = vld [vmem:[%s11291_s0 + $0x68] sm:$0xff] }
   0x8   :  { %76 = vst.msk [vmem:[#allocation2 + $0x38] sm:$0xff] %vm68_vm0, %v59_v13  ;;  %81 = vst.msk [vmem:[#allocation2 + $0x60] sm:$0xff] %vm68_vm0, %v64_v14  ;;  %v66_v16 = vld [vmem:[%s11291_s0 + $0x70] sm:$0xff]  ;;  %v67_v17 = vld [vmem:[%s11291_s0 + $0x78] sm:$0xff] }
   0x9   :  { %v8746_v18 = vld [vmem:[%s11293_s2] ss:$0 sm:$0xff]  ;;  %82 = vst.msk [vmem:[#allocation2 + $0x68] sm:$0xff] %vm68_vm0, %v65_v15  ;;  %83 = vst.msk [vmem:[#allocation2 + $0x70] sm:$0xff] %vm68_vm0, %v66_v16  ;;  %v108_v20 = vld [vmem:[#allocation3 + $0x18] sm:$0x1] }
   0xa   :  { %84 = vst.msk [vmem:[#allocation2 + $0x78] sm:$0xff] %vm68_vm0, %v67_v17  ;;  %vm8753_vm4 = vmand %vm87_vm1, %vm97_vm2  ;;  %v170_v21 = vld [vmem:[#allocation3 + $0x1c] sm:$0x1]  ;;  %v221_v24 = vld [vmem:[#allocation2] sm:$0xff] }
   0xb   :  { %v11316_v19 = vsel %vm8753_vm4, 4294967295, %v11315_v19  ;;  %v109_v22 = vsel %vm8753_vm4, 0, %v108_v20  ;;  %vm8761_vm5 = vmand %vm87_vm1, %vm159_vm3  ;;  %v222_v25 = vld [vmem:[#allocation2 + $0x8] sm:$0xff]  ;;  %v244_v27 = vmul.f32 %v8717_v11, %v221_v24  ;;  %v223_v29 = vld [vmem:[#allocation2 + $0x10] sm:$0xff] }
   0xc   :  { %11317 = vst [vmem:[#allocation7_spill] sm:$0xff] %v11316_v19  ;;  %110 = vst [vmem:[#allocation3 + $0x18] sm:$0x1] %v109_v22  ;;  %v171_v26 = vsel %vm8761_vm5, 0, %v170_v21  ;;  %v245_v28 = vmul.f32 %v8717_v11, %v222_v25  ;;  %v224_v30 = vld [vmem:[#allocation2 + $0x18] sm:$0xff]  ;;  %v246_v31 = vmul.f32 %v8717_v11, %v223_v29  ;;  %v229_v33 = vld [vmem:[#allocation2 + $0x40] sm:$0xff] }
   0xd   :  { %172 = vst [vmem:[#allocation3 + $0x1c] sm:$0x1] %v171_v26  ;;  %v247_v32 = vmul.f32 %v8717_v11, %v224_v30  ;;  %v230_v34 = vld [vmem:[#allocation2 + $0x48] sm:$0xff]  ;;  %v231_v35 = vld [vmem:[#allocation2 + $0x50] sm:$0xff]  ;;  %v267_v36 = vadd.f32 %v8746_v18, %v244_v27  ;;  %v252_v38 = vmul.f32 %v8717_v11, %v229_v33  ;;  %v232_v40 = vld [vmem:[#allocation2 + $0x58] sm:$0xff] }
   0xe   :  { %v268_v37 = vadd.f32 %v8746_v18, %v245_v28  ;;  %v253_v39 = vmul.f32 %v8717_v11, %v230_v34  ;;  %v269_v41 = vadd.f32 %v8746_v18, %v246_v31  ;;  %v254_v43 = vmul.f32 %v8717_v11, %v231_v35  ;;  %v225_v45 = vld [vmem:[#allocation2 + $0x20] sm:$0xff]  ;;  %v226_v46 = vld [vmem:[#allocation2 + $0x28] sm:$0xff]  ;;  %v227_v47 = vld [vmem:[#allocation2 + $0x30] sm:$0xff] }
   0xf   :  { %v270_v42 = vadd.f32 %v8746_v18, %v247_v32  ;;  %v255_v44 = vmul.f32 %v8717_v11, %v232_v40  ;;  %v283_v48 = vmax.f32 %v267_v36, 0.0  ;;  %v275_v50 = vadd.f32 %v8746_v18, %v252_v38  ;;  %v228_v52 = vld [vmem:[#allocation2 + $0x38] sm:$0xff]  ;;  %v233_v53 = vld [vmem:[#allocation2 + $0x60] sm:$0xff] }
  0x10   :  { %v284_v49 = vmax.f32 %v268_v37, 0.0  ;;  %v276_v51 = vadd.f32 %v8746_v18, %v253_v39  ;;  %v234_v54 = vld [vmem:[#allocation2 + $0x68] sm:$0xff]  ;;  %v285_v55 = vmax.f32 %v269_v41, 0.0  ;;  %v277_v57 = vadd.f32 %v8746_v18, %v254_v43  ;;  %v235_v59 = vld [vmem:[#allocation2 + $0x70] sm:$0xff] }
  0x11   :  { %v286_v56 = vmax.f32 %v270_v42, 0.0  ;;  %v278_v58 = vadd.f32 %v8746_v18, %v255_v44  ;;  %v291_v61 = vmax.f32 %v275_v50, 0.0  ;;  %v248_v63 = vmul.f32 %v8717_v11, %v225_v45  ;;  %v236_v0 = vld [vmem:[#allocation2 + $0x78] sm:$0xff] }
  0x12   :  { %v299_v60 = vpack.c.bf16 %v284_v49, %v283_v48  ;;  %v292_v62 = vmax.f32 %v276_v51, 0.0  ;;  %v293_v2 = vmax.f32 %v277_v57, 0.0  ;;  %v249_v4 = vmul.f32 %v8717_v11, %v226_v46 }
  0x13   :  { %v300_v1 = vpack.c.bf16 %v286_v56, %v285_v55  ;;  %v294_v3 = vmax.f32 %v278_v58, 0.0  ;;  %v271_v6 = vadd.f32 %v8746_v18, %v248_v63  ;;  %v250_v7 = vmul.f32 %v8717_v11, %v227_v47 }
  0x14   :  { %8052 = vmatprep.mubr.msk.bf16.mxu0 %vm68_vm0, %v299_v60  ;;  %v303_v5 = vpack.c.bf16 %v292_v62, %v291_v61  ;;  %v251_v8 = vmul.f32 %v8717_v11, %v228_v52  ;;  %v272_v10 = vadd.f32 %v8746_v18, %v249_v4  ;;  %v256_v12 = vmul.f32 %v8717_v11, %v233_v53 }
  0x15   :  { %8053 = vmatmul.mubr.msk.bf16.vlgmr.msra.gmra.mxu0 %vm68_vm0, %v300_v1  ;;  %v304_v9 = vpack.c.bf16 %v294_v3, %v293_v2  ;;  %v257_v13 = vmul.f32 %v8717_v11, %v234_v54  ;;  %v287_v14 = vmax.f32 %v271_v6, 0.0  ;;  %v273_v15 = vadd.f32 %v8746_v18, %v250_v7 }
  0x16   :  { %8060 = vmatprep.mubr.msk.bf16.mxu1 %vm68_vm0, %v303_v5  ;;  %v274_v16 = vadd.f32 %v8746_v18, %v251_v8  ;;  %v258_v17 = vmul.f32 %v8717_v11, %v235_v59  ;;  %v288_v20 = vmax.f32 %v272_v10, 0.0  ;;  %v279_v21 = vadd.f32 %v8746_v18, %v256_v12 }
  0x17   :  { %8061 = vmatmul.mubr.msk.bf16.vlgmr.msra.gmra.mxu1 %vm68_vm0, %v304_v9  ;;  %v280_v22 = vadd.f32 %v8746_v18, %v257_v13  ;;  %v259_v24 = vmul.f32 %v8717_v11, %v236_v0  ;;  %v289_v25 = vmax.f32 %v273_v15, 0.0 }
  0x18   :  { %v290_v26 = vmax.f32 %v274_v16, 0.0  ;;  %v281_v27 = vadd.f32 %v8746_v18, %v258_v17  ;;  %v301_v28 = vpack.c.bf16 %v288_v20, %v287_v14  ;;  %v295_v29 = vmax.f32 %v279_v21, 0.0 }
  0x19   :  { %v296_v30 = vmax.f32 %v280_v22, 0.0  ;;  %v282_v31 = vadd.f32 %v8746_v18, %v259_v24 }
  0x1a   :  { %v302_v32 = vpack.c.bf16 %v290_v26, %v289_v25  ;;  %v297_v33 = vmax.f32 %v281_v27, 0.0  ;;  %8056 = vmatprep.mubr.msk.bf16.mxu0 %vm68_vm0, %v301_v28 }
  0x1b   :  { %v305_v34 = vpack.c.bf16 %v296_v30, %v295_v29  ;;  %v298_v35 = vmax.f32 %v282_v31, 0.0 }
  0x1d   :  { %8057 = vmatmul.mubr.msk.bf16.gmra.mxu0 %vm68_vm0, %v302_v32  ;;  %8064 = vmatprep.mubr.msk.bf16.mxu1 %vm68_vm0, %v305_v34  ;;  %v306_v11 = vpack.c.bf16 %v298_v35, %v297_v33 }
  0x1f   :  { %8065 = vmatmul.mubr.msk.bf16.gmra.mxu1 %vm68_vm0, %v306_v11 }
  0x20   :  { %20 = vsyncpa [#allocation5], 0  ;;  %v102_v36 = vld [vmem:[#allocation3 + $0x8] sm:$0x1]  ;;  %v164_v37 = vld [vmem:[#allocation3 + $0xc] sm:$0x1] }
  0x21   :  { %v103_v38 = vsel %vm8753_vm4, 0, %v102_v36  ;;  %v165_v18 = vsel %vm8761_vm5, 0, %v164_v37  ;;  %v111_v39 = vld [vmem:[#allocation3 + $0x20] sm:$0x1]  ;;  %v173_v40 = vld [vmem:[#allocation3 + $0x24] sm:$0x1] }
  0x22   :  { %104 = vst [vmem:[#allocation3 + $0x8] sm:$0x1] %v103_v38  ;;  %166 = vst [vmem:[#allocation3 + $0xc] sm:$0x1] %v165_v18  ;;  %v112_v41 = vsel %vm8753_vm4, 0, %v111_v39  ;;  %v174_v42 = vsel %vm8761_vm5, 0, %v173_v40 }
  0x23   :  { %113 = vst [vmem:[#allocation3 + $0x20] sm:$0x1] %v112_v41  ;;  %175 = vst [vmem:[#allocation3 + $0x24] sm:$0x1] %v174_v42  ;;  %v105_v43 = vld [vmem:[#allocation3 + $0x10] sm:$0x1] }
  0x24   :  { %v167_v44 = vld [vmem:[#allocation3 + $0x14] sm:$0x1]  ;;  %v106_v45 = vsel %vm8753_vm4, 0, %v105_v43  ;;  %v138_v47 = vld [vmem:[#allocation3 + $0x68] sm:$0x1]  ;;  %vm85_vm6 = vcmask 257024  }
  0x25   :  { %v168_v46 = vsel %vm8761_vm5, 0, %v167_v44  ;;  %107 = vst [vmem:[#allocation3 + $0x10] sm:$0x1] %v106_v45  ;;  %v120_v48 = vld [vmem:[#allocation3 + $0x38] sm:$0x1]  ;;  %v139_v50 = vsel %vm8753_vm4, 0, %v138_v47  ;;  %vm8965_vm13 = vmand %vm85_vm6, %vm159_vm3 }
  0x26   :  { %169 = vst [vmem:[#allocation3 + $0x14] sm:$0x1] %v168_v46  ;;  %v182_v49 = vld [vmem:[#allocation3 + $0x3c] sm:$0x1]  ;;  %v200_v51 = vld [vmem:[#allocation3 + $0x6c] sm:$0x1] }
  0x27   :  { %v132_v52 = vld [vmem:[#allocation3 + $0x58] sm:$0x1]  ;;  %v121_v53 = vsel %vm8753_vm4, 0, %v120_v48  ;;  %140 = vst [vmem:[#allocation3 + $0x68] sm:$0x1] %v139_v50  ;;  %v201_v54 = vsel %vm8761_vm5, 0, %v200_v51 }
  0x28   :  { %v133_v55 = vsel %vm8753_vm4, 0, %v132_v52  ;;  %122 = vst [vmem:[#allocation3 + $0x38] sm:$0x1] %v121_v53  ;;  %202 = vst [vmem:[#allocation3 + $0x6c] sm:$0x1] %v201_v54  ;;  %v183_v57 = vsel %vm8761_vm5, 0, %v182_v49 }
  0x29   :  { %134 = vst [vmem:[#allocation3 + $0x58] sm:$0x1] %v133_v55  ;;  %v194_v56 = vld [vmem:[#allocation3 + $0x5c] sm:$0x1]  ;;  %v141_v59 = vld [vmem:[#allocation3 + $0x70] sm:$0x1] }
  0x2a   :  { %v195_v58 = vsel %vm8761_vm5, 0, %v194_v56  ;;  %184 = vst [vmem:[#allocation3 + $0x3c] sm:$0x1] %v183_v57  ;;  %v142_v60 = vsel %vm8753_vm4, 0, %v141_v59  ;;  %v203_v61 = vld [vmem:[#allocation3 + $0x74] sm:$0x1] }
  0x2b   :  { %196 = vst [vmem:[#allocation3 + $0x5c] sm:$0x1] %v195_v58  ;;  %143 = vst [vmem:[#allocation3 + $0x70] sm:$0x1] %v142_v60  ;;  %v204_v62 = vsel %vm8761_vm5, 0, %v203_v61  ;;  %v8588_v13 = vmov 0  }
  0x2c   :  { %v114_v63 = vld [vmem:[#allocation3 + $0x28] sm:$0x1]  ;;  %205 = vst [vmem:[#allocation3 + $0x74] sm:$0x1] %v204_v62  ;;  %v176_v1 = vld [vmem:[#allocation3 + $0x2c] sm:$0x1] }
  0x2d   :  { %v115_v0 = vsel %vm8753_vm4, 0, %v114_v63  ;;  %v135_v2 = vld [vmem:[#allocation3 + $0x60] sm:$0x1]  ;;  %v177_v3 = vsel %vm8761_vm5, 0, %v176_v1  ;;  %v197_v5 = vld [vmem:[#allocation3 + $0x64] sm:$0x1] }
  0x2e   :  { %116 = vst [vmem:[#allocation3 + $0x28] sm:$0x1] %v115_v0  ;;  %v136_v4 = vsel %vm8753_vm4, 0, %v135_v2  ;;  %178 = vst [vmem:[#allocation3 + $0x2c] sm:$0x1] %v177_v3  ;;  %v198_v8 = vsel %vm8761_vm5, 0, %v197_v5 }
  0x2f   :  { %137 = vst [vmem:[#allocation3 + $0x60] sm:$0x1] %v136_v4  ;;  %v123_v6 = vld [vmem:[#allocation3 + $0x40] sm:$0x1]  ;;  %v185_v7 = vld [vmem:[#allocation3 + $0x44] sm:$0x1] }
  0x30   :  { %v124_v9 = vsel %vm8753_vm4, 0, %v123_v6  ;;  %v186_v10 = vsel %vm8761_vm5, 0, %v185_v7  ;;  %199 = vst [vmem:[#allocation3 + $0x64] sm:$0x1] %v198_v8  ;;  %v144_v12 = vld [vmem:[#allocation3 + $0x78] sm:$0x1] }
  0x31   :  { %125 = vst [vmem:[#allocation3 + $0x40] sm:$0x1] %v124_v9  ;;  %187 = vst [vmem:[#allocation3 + $0x44] sm:$0x1] %v186_v10  ;;  %v145_v14 = vsel %vm8753_vm4, 0, %v144_v12  ;;  %v8479_v32 = vld [vmem:[%s11296_s5 + $0x8] sm:$0xff]  }
  0x32   :  { %86 = vst.msk [vmem:[#allocation3] sm:$0xf] %vm85_vm6, %v8588_v13  ;;  %89 = vst.msk [vmem:[#allocation3 + $0x50] sm:$0xf] %vm85_vm6, %v8588_v13  ;;  %v206_v15 = vld [vmem:[#allocation3 + $0x7c] sm:$0x1]  ;;  %8088 = vmatprep.subr.bf16.mxu0 %v8479_v32 }
  0x33   :  { %88 = vst.msk [vmem:[#allocation3 + $0x4] sm:$0x1] %vm87_vm1, %v8588_v13  ;;  %90 = vst.msk [vmem:[#allocation3 + $0x54] sm:$0x1] %vm87_vm1, %v8588_v13  ;;  %v207_v16 = vsel %vm8761_vm5, 0, %v206_v15  ;;  %8089 = vmatpush3.bf16.msra.mxu0 %v8479_v32  ;;  %v8480_v11 = vld [vmem:[%s11296_s5] sm:$0xff]  }
  0x34   :  { %92 = vst.msk [vmem:[#allocation3 + $0x48] sm:$0xf] %vm85_vm6, %v8588_v13  ;;  %94 = vst.msk [vmem:[#allocation3 + $0x98] sm:$0xf] %vm85_vm6, %v8588_v13  ;;  %v150_v17 = vld [vmem:[#allocation3 + $0x88] sm:$0x1]  ;;  %8090 = vmatprep.subr.bf16.mxu0 %v8480_v11 }
  0x35   :  { %93 = vst.msk [vmem:[#allocation3 + $0x4c] sm:$0x1] %vm87_vm1, %v8588_v13  ;;  %95 = vst.msk [vmem:[#allocation3 + $0x9c] sm:$0x1] %vm87_vm1, %v8588_v13  ;;  %v151_v20 = vsel %vm8753_vm4, 0, %v150_v17  ;;  %v8478_v40 = vld [vmem:[%s11296_s5 + $0x18] sm:$0xff]  }
  0x36   :  { %146 = vst [vmem:[#allocation3 + $0x78] sm:$0x1] %v145_v14  ;;  %208 = vst [vmem:[#allocation3 + $0x7c] sm:$0x1] %v207_v16  ;;  %v212_v21 = vld [vmem:[#allocation3 + $0x8c] sm:$0x1]  ;;  %8068 = vmatprep.subr.bf16.mxu1 %v8478_v40 }
  0x37   :  { %152 = vst [vmem:[#allocation3 + $0x88] sm:$0x1] %v151_v20  ;;  %v213_v22 = vsel %vm8761_vm5, 0, %v212_v21  ;;  %v117_v26 = vld [vmem:[#allocation3 + $0x30] sm:$0x1]  ;;  %8091 = vmatpush3.bf16.msra.mxu0 %v8480_v11  ;;  %8069 = vmatpush3.bf16.msra.mxu1 %v8478_v40  ;;  %v8896_v44 = vld [vmem:[%s11296_s5 + $0x28] sm:$0xff]  }
  0x38   :  { %214 = vst [vmem:[#allocation3 + $0x8c] sm:$0x1] %v213_v22  ;;  %v179_v27 = vld [vmem:[#allocation3 + $0x34] sm:$0x1]  ;;  %v118_v30 = vsel %vm8753_vm4, 0, %v117_v26  ;;  %v8904_v47 = vld [vmem:[%s11296_s5 + $0x38] sm:$0xff]  }
  0x39   :  { %v99_v24 = vld [vmem:[#allocation3] sm:$0x1]  ;;  %v180_v31 = vsel %vm8761_vm5, 0, %v179_v27  ;;  %119 = vst [vmem:[#allocation3 + $0x30] sm:$0x1] %v118_v30  ;;  %v8482_v41 = vld [vmem:[%s11296_s5 + $0x10] sm:$0xff]   ;;  %8128 = vmatprep.subr.bf16.mxu0 %v8904_v47 }
  0x3a   :  { %v161_v25 = vld [vmem:[#allocation3 + $0x4] sm:$0x1]  ;;  %v100_v28 = vsel %vm8753_vm4, 0, %v99_v24  ;;  %181 = vst [vmem:[#allocation3 + $0x34] sm:$0x1] %v180_v31  ;;  %8070 = vmatprep.subr.bf16.mxu1 %v8482_v41  ;;  %vm1413_vm9 = vcmask 1042432  }
  0x3b   :  { %v162_v29 = vsel %vm8761_vm5, 0, %v161_v25  ;;  %101 = vst [vmem:[#allocation3] sm:$0x1] %v100_v28  ;;  %v153_v33 = vld [vmem:[#allocation3 + $0x90] sm:$0x1]  ;;  %8071 = vmatpush3.bf16.msra.mxu1 %v8482_v41  ;;  %vm1414_vm10 = vcmask 1046532  }
  0x3c   :  { %163 = vst [vmem:[#allocation3 + $0x4] sm:$0x1] %v162_v29  ;;  %v154_v34 = vsel %vm8753_vm4, 0, %v153_v33  ;;  %v147_v35 = vld [vmem:[#allocation3 + $0x80] sm:$0x1]  ;;  %8108 = vmatprep.subr.bf16.mxu1 %v8896_v44  ;;  %v11320_v21 = vmov 0  ;;  %vm8944_vm12 = vmor %vm1413_vm9, %vm1414_vm10 }
  0x3d   :  { %155 = vst [vmem:[#allocation3 + $0x90] sm:$0x1] %v154_v34  ;;  %v215_v36 = vld [vmem:[#allocation3 + $0x94] sm:$0x1]  ;;  %v148_v37 = vsel %vm8753_vm4, 0, %v147_v35  ;;  %v11323_v30 = vmov 0 }
  0x3e   :  { %v209_v38 = vld [vmem:[#allocation3 + $0x84] sm:$0x1]  ;;  %149 = vst [vmem:[#allocation3 + $0x80] sm:$0x1] %v148_v37  ;;  %v216_v18 = vsel %vm8761_vm5, 0, %v215_v36  ;;  %v11324_v30 = vsel %vm8944_vm12, 4294967295, %v11323_v30 }
  0x3f   :  { %v210_v39 = vsel %vm8761_vm5, 0, %v209_v38  ;;  %217 = vst [vmem:[#allocation3 + $0x94] sm:$0x1] %v216_v18  ;;  %v129_v42 = vld [vmem:[#allocation3 + $0x50] sm:$0x1]  ;;  %11325 = vst [vmem:[#allocation9_spill] sm:$0xff] %v11324_v30 }
  0x40   :  { %211 = vst [vmem:[#allocation3 + $0x84] sm:$0x1] %v210_v39  ;;  %v130_v43 = vsel %vm8753_vm4, 0, %v129_v42  ;;  %v191_v45 = vld [vmem:[#allocation3 + $0x54] sm:$0x1]  ;;  %vm1070_vm14 = vcmask 261120  }
  0x41   :  { %131 = vst [vmem:[#allocation3 + $0x50] sm:$0x1] %v130_v43  ;;  %v192_v46 = vsel %vm8761_vm5, 0, %v191_v45  ;;  %v8918_v62 = vld [vmem:[%s11295_s4] ss:$0 sm:$0xff]  ;;  %vm3761_vm15 = vcmask 1043456  }
  0x42   :  { %193 = vst [vmem:[#allocation3 + $0x54] sm:$0x1] %v192_v46  ;;  %v8907_v48 = vld [vmem:[#allocation3] sm:$0xf]  ;;  %vm802_vm7 = vsmask.f32 3328 }
  0x43   :  { %v806_v50 = vshrl.u32 %v8907_v48, 16  ;;  %v809_v51 = vshll.u32 %v8907_v48, 16  ;;  %v786_v58 = vld [vmem:[#allocation3 + $0x4] sm:$0x1]  ;;  %v1365_v1 = vld [vmem:[#allocation3] sm:$0xe] }
  0x44   :  { %v815_v60 = vshll.u32 %v786_v58, 16  ;;  %v1373_v2 = vld [vmem:[#allocation3 + $0x50] sm:$0xe]  ;;  %vm803_vm8 = vsmask.f32 7440  ;;  %v7323_v7 = vrot.slane %v1365_v1, 9 }
  0x45   :  { %v808_v54 = vrot.slane %v806_v50, 4  ;;  %v811_v55 = vrot.slane %v809_v51, 5  ;;  %v1418_v8 = vrot.slane %v786_v58, 5  ;;  %v7331_v14 = vrot.slane %v1373_v2, 9  ;;  %vm8933_vm11 = vmor %vm802_vm7, %vm803_vm8  ;;  %v673_v1 = vld [vmem:[#allocation3 + $0xc] sm:$0x1] }
  0x46   :  { %v8922_v5 = vrot.slane %v815_v60, 5  ;;  %v11321_v21 = vsel %vm8933_vm11, 4294967295, %v11320_v21  ;;  %v11326_v51 = vmov 0  ;;  %vm3614_vm0 = vcmask 195712  }
  0x47   :  { %v812_v59 = vor.u32 %v811_v55, %v808_v54  ;;  %11322 = vst [vmem:[#allocation8_spill] sm:$0xff] %v11321_v21  ;;  %v8955_v34 = vsel %vm8944_vm12, %v7323_v7, %v1418_v8  ;;  %v11327_v51 = vsel %vm8965_vm13, 4294967295, %v11326_v51  ;;  %vm3736_vm1 = vcmask 195584  }
  0x48   :  { %v8909_v49 = vld [vmem:[#allocation3 + $0x50] sm:$0xf]  ;;  %11328 = vst [vmem:[#allocation10_spill] sm:$0xff] %v11327_v51  ;;  %vm7022_vm2 = vcmask 261312  }
  0x49   :  { %v918_v52 = vshrl.u32 %v8909_v49, 16  ;;  %v921_v53 = vshll.u32 %v8909_v49, 16  ;;  %v794_v61 = vld [vmem:[#allocation3 + $0x54] sm:$0x1]  ;;  %v8920_v4 = vrot.slane %v812_v59, 4 }
  0x4a   :  { %v927_v0 = vshll.u32 %v794_v61, 16  ;;  %v1450_v15 = vrot.slane %v794_v61, 5  ;;  %v670_v61 = vld [vmem:[#allocation3 + $0x8] sm:$0xf] }
  0x4b   :  { %v920_v56 = vrot.slane %v918_v52, 4  ;;  %v923_v57 = vrot.slane %v921_v53, 5  ;;  %v818_v25 = vsel %vm8933_vm11, %v8920_v4, %v8922_v5  ;;  %v682_v52 = vld [vmem:[#allocation3 + $0x18] sm:$0xf]  ;;  %v685_v53 = vld [vmem:[#allocation3 + $0x1c] sm:$0x1] }
  0x4c   :  { %v8927_v13 = vrot.slane %v927_v0, 5  ;;  %v8959_v35 = vsel %vm8944_vm12, %v7331_v14, %v1450_v15  ;;  %v730_v15 = vld [vmem:[#allocation3 + $0x68] sm:$0xf] }
  0x4d   :  { %v924_v63 = vor.u32 %v923_v57, %v920_v56 }
  0x4f   :  { %v8925_v12 = vrot.slane %v924_v63, 4 }
  0x51   :  { %v930_v33 = vsel %vm8933_vm11, %v8925_v12, %v8927_v13 }
  0xd5   :  { %v8054_v3 = vpop.f32.mrf.mxu0 }
  0xd6   :  { %v389_v6 = vadd.f32 %v8054_v3, %v8918_v62 }
  0xd7   :  { %v380_v9 = vpop.f32.mrf.mxu0  ;;  %v8062_v10 = vpop.f32.mrf.mxu1 }
  0xd8   :  { %v445_v16 = vmax.f32 %v389_v6, 0.0  ;;  %v381_v17 = vadd.f32 %v8918_v62, %v380_v9  ;;  %v421_v20 = vadd.f32 %v8062_v10, %v8918_v62 }
  0xd9   :  { %v8055_v22 = vpop.f32.mrf.mxu0  ;;  %v412_v24 = vpop.f32.mrf.mxu1 }
  0xda   :  { %v7811_v26 = vpack.c.bf16 %v445_v16, %v445_v16  ;;  %v443_v27 = vmax.f32 %v381_v17, 0.0  ;;  %v453_v28 = vmax.f32 %v421_v20, 0.0  ;;  %v392_v29 = vadd.f32 %v8055_v22, %v8918_v62  ;;  %v733_v16 = vld [vmem:[#allocation3 + $0x6c] sm:$0x1] }
  0xdb   :  { %v413_v31 = vadd.f32 %v8918_v62, %v412_v24  ;;  %v383_v32 = vpop.f32.mrf.mxu0  ;;  %v8063_v18 = vpop.f32.mrf.mxu1 }
  0xdc   :  { %v524_v11 = vshrl.u32 %v7811_v26, 16  ;;  %v527_v36 = vshll.u32 %v7811_v26, 16  ;;  %v7809_v37 = vpack.c.bf16 %v443_v27, %v443_v27  ;;  %v7819_v38 = vpack.c.bf16 %v453_v28, %v453_v28  ;;  %v688_v28 = vld [vmem:[#allocation3 + $0x20] sm:$0xf] }
  0xdd   :  { %v446_v39 = vmax.f32 %v392_v29, 0.0  ;;  %v451_v40 = vmax.f32 %v413_v31, 0.0  ;;  %v384_v41 = vadd.f32 %v8918_v62, %v383_v32  ;;  %v424_v42 = vadd.f32 %v8063_v18, %v8918_v62  ;;  %v8058_v0 = vpop.f32.mrf.mxu0  ;;  %v691_v29 = vld [vmem:[#allocation3 + $0x24] sm:$0x1] }
  0xde   :  { %v526_v43 = vrot.slane %v524_v11, 7  ;;  %v508_v45 = vshrl.u32 %v7809_v37, 16  ;;  %v511_v46 = vshll.u32 %v7809_v37, 16  ;;  %v588_v50 = vshrl.u32 %v7819_v38, 16 }
  0xdf   :  { %v591_v54 = vshll.u32 %v7819_v38, 16  ;;  %v7812_v55 = vpack.c.bf16 %v446_v39, %v446_v39  ;;  %v7817_v56 = vpack.c.bf16 %v451_v40, %v451_v40  ;;  %v444_v57 = vmax.f32 %v384_v41, 0.0  ;;  %v396_v11 = vpop.f32.mrf.mxu0  ;;  %v718_v39 = vld [vmem:[#allocation3 + $0x58] sm:$0xf]  ;;  %v721_v40 = vld [vmem:[#allocation3 + $0x5c] sm:$0x1]  ;;  %v415_v41 = vpop.f32.mrf.mxu1 }
  0xe0   :  { %v529_v58 = vor.u32 %v527_v36, %v526_v43  ;;  %v530_v59 = vrot.slane %v526_v43, 4  ;;  %v510_v60 = vrot.slane %v508_v45, 7  ;;  %v590_v63 = vrot.slane %v588_v50, 7 }
  0xe1   :  { %v532_v2 = vshrl.u32 %v7812_v55, 16  ;;  %v535_v3 = vshll.u32 %v7812_v55, 16  ;;  %v572_v6 = vshrl.u32 %v7817_v56, 16  ;;  %v575_v7 = vshll.u32 %v7817_v56, 16 }
  0xe2   :  { %v683_v8 = vsel %vm8965_vm13, %v529_v58, %v682_v52  ;;  %v686_v9 = vsel %vm8753_vm4, %v530_v59, %v685_v53  ;;  %v513_v10 = vor.u32 %v511_v46, %v510_v60  ;;  %v514_v14 = vrot.slane %v510_v60, 4  ;;  %v676_v58 = vld [vmem:[#allocation3 + $0x10] sm:$0xf]  ;;  %v8059_v60 = vpop.f32.mrf.mxu0 }
  0xe3   :  { %684 = vst [vmem:[#allocation3 + $0x18] sm:$0xf] %v683_v8  ;;  %687 = vst [vmem:[#allocation3 + $0x1c] sm:$0x1] %v686_v9  ;;  %v593_v17 = vor.u32 %v591_v54, %v590_v63  ;;  %v594_v20 = vrot.slane %v590_v63, 4  ;;  %v534_v22 = vrot.slane %v532_v2, 7  ;;  %v7810_v31 = vpack.c.bf16 %v444_v57, %v444_v57 }
  0xe4   :  { %v574_v24 = vrot.slane %v572_v6, 7  ;;  %v671_v26 = vsel %vm8965_vm13, %v513_v10, %v670_v61  ;;  %v674_v27 = vsel %vm8753_vm4, %v514_v14, %v673_v1  ;;  %v454_v32 = vmax.f32 %v424_v42, 0.0  ;;  %v679_v61 = vld [vmem:[#allocation3 + $0x14] sm:$0x1] }
  0xe5   :  { %672 = vst [vmem:[#allocation3 + $0x8] sm:$0xf] %v671_v26  ;;  %675 = vst [vmem:[#allocation3 + $0xc] sm:$0x1] %v674_v27  ;;  %v731_v36 = vsel %vm8965_vm13, %v593_v17, %v730_v15  ;;  %v734_v37 = vsel %vm8753_vm4, %v594_v20, %v733_v16  ;;  %v537_v38 = vor.u32 %v535_v3, %v534_v22  ;;  %v538_v18 = vrot.slane %v534_v22, 4  ;;  %v8066_v3 = vpop.f32.mrf.mxu1 }
  0xe6   :  { %732 = vst [vmem:[#allocation3 + $0x68] sm:$0xf] %v731_v36  ;;  %735 = vst [vmem:[#allocation3 + $0x6c] sm:$0x1] %v734_v37  ;;  %v577_v43 = vor.u32 %v575_v7, %v574_v24  ;;  %v578_v45 = vrot.slane %v574_v24, 4  ;;  %v516_v46 = vshrl.u32 %v7810_v31, 16  ;;  %v7820_v53 = vpack.c.bf16 %v454_v32, %v454_v32 }
  0xe7   :  { %v519_v42 = vshll.u32 %v7810_v31, 16  ;;  %v689_v50 = vsel %vm8965_vm13, %v537_v38, %v688_v28  ;;  %v692_v52 = vsel %vm8753_vm4, %v538_v18, %v691_v29  ;;  %v405_v54 = vadd.f32 %v8058_v0, %v8918_v62  ;;  %v736_v22 = vld [vmem:[#allocation3 + $0x70] sm:$0xf]  ;;  %v739_v24 = vld [vmem:[#allocation3 + $0x74] sm:$0x1] }
  0xe8   :  { %690 = vst [vmem:[#allocation3 + $0x20] sm:$0xf] %v689_v50  ;;  %693 = vst [vmem:[#allocation3 + $0x24] sm:$0x1] %v692_v52  ;;  %v719_v55 = vsel %vm8965_vm13, %v577_v43, %v718_v39  ;;  %v722_v56 = vsel %vm8753_vm4, %v578_v45, %v721_v40  ;;  %v518_v57 = vrot.slane %v516_v46, 7  ;;  %v416_v59 = vadd.f32 %v8918_v62, %v415_v41  ;;  %v428_v46 = vpop.f32.mrf.mxu1 }
  0xe9   :  { %720 = vst [vmem:[#allocation3 + $0x58] sm:$0xf] %v719_v55  ;;  %723 = vst [vmem:[#allocation3 + $0x5c] sm:$0x1] %v722_v56  ;;  %v596_v63 = vshrl.u32 %v7820_v53, 16  ;;  %v599_v1 = vshll.u32 %v7820_v53, 16  ;;  %v397_v0 = vadd.f32 %v8918_v62, %v396_v11  ;;  %v437_v9 = vadd.f32 %v8066_v3, %v8918_v62 }
  0xea   :  { %v449_v2 = vmax.f32 %v405_v54, 0.0  ;;  %v521_v6 = vor.u32 %v519_v42, %v518_v57  ;;  %v522_v7 = vrot.slane %v518_v57, 4  ;;  %v452_v8 = vmax.f32 %v416_v59, 0.0  ;;  %v706_v41 = vld [vmem:[#allocation3 + $0x38] sm:$0xf] }
  0xeb   :  { %v598_v10 = vrot.slane %v596_v63, 7  ;;  %v447_v15 = vmax.f32 %v397_v0, 0.0  ;;  %v408_v16 = vadd.f32 %v8059_v60, %v8918_v62  ;;  %v457_v27 = vmax.f32 %v437_v9, 0.0  ;;  %v709_v43 = vld [vmem:[#allocation3 + $0x3c] sm:$0x1]  ;;  %v8067_v60 = vpop.f32.mrf.mxu1 }
  0xec   :  { %v7815_v14 = vpack.c.bf16 %v449_v2, %v449_v2  ;;  %v677_v17 = vsel %vm8965_vm13, %v521_v6, %v676_v58  ;;  %v680_v20 = vsel %vm8753_vm4, %v522_v7, %v679_v61  ;;  %v7818_v26 = vpack.c.bf16 %v452_v8, %v452_v8  ;;  %v724_v50 = vld [vmem:[#allocation3 + $0x60] sm:$0xf]  ;;  %v727_v57 = vld [vmem:[#allocation3 + $0x64] sm:$0x1]  ;;  %v694_v2 = vld [vmem:[#allocation3 + $0x28] sm:$0xf] }
  0xed   :  { %678 = vst [vmem:[#allocation3 + $0x10] sm:$0xf] %v677_v17  ;;  %681 = vst [vmem:[#allocation3 + $0x14] sm:$0x1] %v680_v20  ;;  %v601_v28 = vor.u32 %v599_v1, %v598_v10  ;;  %v602_v29 = vrot.slane %v598_v10, 4  ;;  %v7813_v37 = vpack.c.bf16 %v447_v15, %v447_v15  ;;  %v7823_v38 = vpack.c.bf16 %v457_v27, %v457_v27  ;;  %v399_v10 = vpop.f32.mrf.mxu0 }
  0xee   :  { %v556_v31 = vshrl.u32 %v7815_v14, 16  ;;  %v559_v32 = vshll.u32 %v7815_v14, 16  ;;  %v580_v11 = vshrl.u32 %v7818_v26, 16  ;;  %v583_v36 = vshll.u32 %v7818_v26, 16  ;;  %v697_v7 = vld [vmem:[#allocation3 + $0x2c] sm:$0x1] }
  0xef   :  { %v737_v18 = vsel %vm8965_vm13, %v601_v28, %v736_v22  ;;  %v740_v39 = vsel %vm8753_vm4, %v602_v29, %v739_v24  ;;  %v450_v45 = vmax.f32 %v408_v16, 0.0  ;;  %v540_v52 = vshrl.u32 %v7813_v37, 16  ;;  %v754_v20 = vld [vmem:[#allocation3 + $0x88] sm:$0xf]  ;;  %v757_v22 = vld [vmem:[#allocation3 + $0x8c] sm:$0x1] }
  0xf0   :  { %v558_v40 = vrot.slane %v556_v31, 7  ;;  %738 = vst [vmem:[#allocation3 + $0x70] sm:$0xf] %v737_v18  ;;  %741 = vst [vmem:[#allocation3 + $0x74] sm:$0x1] %v740_v39  ;;  %v582_v42 = vrot.slane %v580_v11, 7  ;;  %v429_v29 = vadd.f32 %v8918_v62, %v428_v46  ;;  %v431_v31 = vpop.f32.mrf.mxu1 }
  0xf1   :  { %v543_v53 = vshll.u32 %v7813_v37, 16  ;;  %v620_v54 = vshrl.u32 %v7823_v38, 16  ;;  %v623_v58 = vshll.u32 %v7823_v38, 16  ;;  %v7816_v59 = vpack.c.bf16 %v450_v45, %v450_v45  ;;  %v712_v28 = vld [vmem:[#allocation3 + $0x40] sm:$0xf] }
  0xf2   :  { %v561_v55 = vor.u32 %v559_v32, %v558_v40  ;;  %v562_v56 = vrot.slane %v558_v40, 4  ;;  %v585_v61 = vor.u32 %v583_v36, %v582_v42  ;;  %v586_v63 = vrot.slane %v582_v42, 4  ;;  %v715_v36 = vld [vmem:[#allocation3 + $0x44] sm:$0x1]  ;;  %v9017_v18 = vld [vmem:[#allocation3 + $0x8] sm:$0xf] }
  0xf3   :  { %v542_v1 = vrot.slane %v540_v52, 7  ;;  %v622_v0 = vrot.slane %v620_v54, 7  ;;  %v564_v8 = vshrl.u32 %v7816_v59, 16  ;;  %v567_v9 = vshll.u32 %v7816_v59, 16  ;;  %v9025_v46 = vld [vmem:[#allocation3 + $0x18] sm:$0xf] }
  0xf4   :  { %v707_v3 = vsel %vm8965_vm13, %v561_v55, %v706_v41  ;;  %v710_v6 = vsel %vm8753_vm4, %v562_v56, %v709_v43  ;;  %v725_v14 = vsel %vm8965_vm13, %v585_v61, %v724_v50  ;;  %v728_v15 = vsel %vm8753_vm4, %v586_v63, %v727_v57  ;;  %v9023_v45 = vld [vmem:[#allocation3 + $0x10] sm:$0xf] }
  0xf5   :  { %708 = vst [vmem:[#allocation3 + $0x38] sm:$0xf] %v707_v3  ;;  %711 = vst [vmem:[#allocation3 + $0x3c] sm:$0x1] %v710_v6  ;;  %v545_v16 = vor.u32 %v543_v53, %v542_v1  ;;  %v546_v17 = vrot.slane %v542_v1, 4  ;;  %v625_v24 = vor.u32 %v623_v58, %v622_v0  ;;  %v626_v26 = vrot.slane %v622_v0, 4 }
  0xf6   :  { %726 = vst [vmem:[#allocation3 + $0x60] sm:$0xf] %v725_v14  ;;  %729 = vst [vmem:[#allocation3 + $0x64] sm:$0x1] %v728_v15  ;;  %v566_v27 = vrot.slane %v564_v8, 7  ;;  %v400_v37 = vadd.f32 %v8918_v62, %v399_v10  ;;  %v440_v38 = vadd.f32 %v8067_v60, %v8918_v62  ;;  %v455_v42 = vmax.f32 %v429_v29, 0.0 }
  0xf7   :  { %v695_v32 = vsel %vm8965_vm13, %v545_v16, %v694_v2  ;;  %v698_v11 = vsel %vm8753_vm4, %v546_v17, %v697_v7  ;;  %v755_v39 = vsel %vm8965_vm13, %v625_v24, %v754_v20  ;;  %v758_v40 = vsel %vm8753_vm4, %v626_v26, %v757_v22  ;;  %v9039_v0 = vld [vmem:[#allocation3 + $0x20] sm:$0xf]  ;;  %v745_v10 = vld [vmem:[#allocation3 + $0x7c] sm:$0x1]  ;;  %v700_v14 = vld [vmem:[#allocation3 + $0x30] sm:$0xf] }
  0xf8   :  { %696 = vst [vmem:[#allocation3 + $0x28] sm:$0xf] %v695_v32  ;;  %699 = vst [vmem:[#allocation3 + $0x2c] sm:$0x1] %v698_v11  ;;  %v569_v41 = vor.u32 %v567_v9, %v566_v27  ;;  %v570_v43 = vrot.slane %v566_v27, 4  ;;  %v448_v50 = vmax.f32 %v400_v37, 0.0  ;;  %v432_v53 = vadd.f32 %v8918_v62, %v431_v31 }
  0xf9   :  { %756 = vst [vmem:[#allocation3 + $0x88] sm:$0xf] %v755_v39  ;;  %759 = vst [vmem:[#allocation3 + $0x8c] sm:$0x1] %v758_v40  ;;  %v458_v52 = vmax.f32 %v440_v38, 0.0  ;;  %v820_v56 = vshrl.u32 %v9017_v18, 16  ;;  %v7821_v58 = vpack.c.bf16 %v455_v42, %v455_v42  ;;  %v7305_v63 = vcombine.low %v8907_v48, %v9017_v18 }
  0xfa   :  { %v713_v54 = vsel %vm8965_vm13, %v569_v41, %v712_v28  ;;  %v716_v55 = vsel %vm8753_vm4, %v570_v43, %v715_v36  ;;  %v823_v57 = vshll.u32 %v9017_v18, 16  ;;  %v7814_v59 = vpack.c.bf16 %v448_v50, %v448_v50  ;;  %v742_v9 = vld [vmem:[#allocation3 + $0x78] sm:$0xf]  ;;  %v703_v15 = vld [vmem:[#allocation3 + $0x34] sm:$0x1] }
  0xfb   :  { %714 = vst [vmem:[#allocation3 + $0x40] sm:$0xf] %v713_v54  ;;  %717 = vst [vmem:[#allocation3 + $0x44] sm:$0x1] %v716_v55  ;;  %v7824_v60 = vpack.c.bf16 %v458_v52, %v458_v52  ;;  %v456_v61 = vmax.f32 %v432_v53, 0.0  ;;  %v834_v62 = vshrl.u32 %v9023_v45, 16  ;;  %8092 = vmatprep.mubr.msk.bf16.mxu0 %vm1070_vm14, %v7305_v63  ;;  %v7306_v27 = vcombine.low %v9023_v45, %v9025_v46 }
  0xfc   :  { %v837_v1 = vshll.u32 %v9023_v45, 16  ;;  %v848_v2 = vshrl.u32 %v9025_v46, 16  ;;  %v604_v3 = vshrl.u32 %v7821_v58, 16  ;;  %v607_v6 = vshll.u32 %v7821_v58, 16  ;;  %v760_v26 = vld [vmem:[#allocation3 + $0x90] sm:$0xf] }
  0xfd   :  { %v548_v7 = vshrl.u32 %v7814_v59, 16  ;;  %v551_v8 = vshll.u32 %v7814_v59, 16  ;;  %v628_v16 = vshrl.u32 %v7824_v60, 16  ;;  %v631_v17 = vshll.u32 %v7824_v60, 16  ;;  %v8494_v31 = vld [vmem:[%s11296_s5 + $0x30] sm:$0xff]   ;;  %8093 = vmatmul.mubr.msk.bf16.vlgmr.msra.gmra.mxu0 %vm1070_vm14, %v7306_v27  ;;  %v9062_v60 = vld [vmem:[%s11296_s5 + $0x58] sm:$0xff]  }
  0xfe   :  { %v7822_v20 = vpack.c.bf16 %v456_v61, %v456_v61  ;;  %v851_v48 = vshll.u32 %v9025_v46, 16  ;;  %v606_v22 = vrot.slane %v604_v3, 7  ;;  %v862_v29 = vshrl.u32 %v9039_v0, 16  ;;  %v763_v11 = vld [vmem:[#allocation3 + $0x94] sm:$0x1]  ;;  %8129 = vmatpush3.bf16.msra.mxu0 %v8904_v47 }
  0xff   :  { %v550_v24 = vrot.slane %v548_v7, 7  ;;  %v9045_v28 = vld [vmem:[#allocation3 + $0x28] sm:$0xf]  ;;  %v630_v32 = vrot.slane %v628_v16, 7  ;;  %v865_v38 = vshll.u32 %v9039_v0, 16  ;;  %8130 = vmatprep.subr.bf16.mxu0 %v8494_v31  ;;  %v825_v16 = vrot.slane %v823_v57, 5 }
 0x100   :  { %v612_v36 = vshrl.u32 %v7822_v20, 16  ;;  %v615_v37 = vshll.u32 %v7822_v20, 16  ;;  %v609_v39 = vor.u32 %v607_v6, %v606_v22  ;;  %v610_v40 = vrot.slane %v606_v22, 4  ;;  %v748_v42 = vld [vmem:[#allocation3 + $0x80] sm:$0xf] }
 0x101   :  { %v553_v41 = vor.u32 %v551_v8, %v550_v24  ;;  %v554_v43 = vrot.slane %v550_v24, 4  ;;  %v751_v50 = vld [vmem:[#allocation3 + $0x84] sm:$0x1]  ;;  %v9053_v52 = vld [vmem:[#allocation3 + $0xc] sm:$0x1]  ;;  %v633_v53 = vor.u32 %v631_v17, %v630_v32  ;;  %v634_v54 = vrot.slane %v630_v32, 4 }
 0x102   :  { %v614_v55 = vrot.slane %v612_v36, 7  ;;  %v876_v58 = vshrl.u32 %v9045_v28, 16  ;;  %v9056_v59 = vld [vmem:[#allocation3 + $0x38] sm:$0xf]  ;;  %v743_v61 = vsel %vm8965_vm13, %v609_v39, %v742_v9  ;;  %v746_v63 = vsel %vm8753_vm4, %v610_v40, %v745_v10  ;;  %v9083_v17 = vld [vmem:[#allocation3 + $0x14] sm:$0x1]  ;;  %8131 = vmatpush3.bf16.msra.mxu0 %v8494_v31 }
 0x103   :  { %v701_v3 = vsel %vm8965_vm13, %v553_v41, %v700_v14  ;;  %v704_v6 = vsel %vm8753_vm4, %v554_v43, %v703_v15  ;;  %744 = vst [vmem:[#allocation3 + $0x78] sm:$0xf] %v743_v61  ;;  %747 = vst [vmem:[#allocation3 + $0x7c] sm:$0x1] %v746_v63  ;;  %v761_v47 = vsel %vm8965_vm13, %v633_v53, %v760_v26  ;;  %v879_v10 = vshll.u32 %v9045_v28, 16 }
 0x104   :  { %702 = vst [vmem:[#allocation3 + $0x30] sm:$0xf] %v701_v3  ;;  %705 = vst [vmem:[#allocation3 + $0x34] sm:$0x1] %v704_v6  ;;  %v764_v7 = vsel %vm8753_vm4, %v634_v54, %v763_v11  ;;  %v617_v8 = vor.u32 %v615_v37, %v614_v55  ;;  %v618_v9 = vrot.slane %v614_v55, 4  ;;  %v7307_v14 = vcombine.low %v9039_v0, %v9045_v28  ;;  %v8491_v0 = vld [vmem:[%s11296_s5 + $0x20] sm:$0xff]  }
 0x105   :  { %762 = vst [vmem:[#allocation3 + $0x90] sm:$0xf] %v761_v47  ;;  %765 = vst [vmem:[#allocation3 + $0x94] sm:$0x1] %v764_v7  ;;  %v822_v15 = vrot.slane %v820_v56, 4  ;;  %v829_v24 = vshll.u32 %v9053_v52, 16  ;;  %8168 = vmatprep.subr.bf16.mxu0 %v9062_v60 }
 0x106   :  { %v749_v20 = vsel %vm8965_vm13, %v617_v8, %v748_v42  ;;  %v752_v22 = vsel %vm8753_vm4, %v618_v9, %v751_v50  ;;  %v904_v26 = vshrl.u32 %v9056_v59, 16  ;;  %v9091_v27 = vld [vmem:[#allocation3 + $0x1c] sm:$0x1]  ;;  %v9093_v32 = vld [vmem:[#allocation3 + $0x58] sm:$0xf]  ;;  %8096 = vmatprep.mubr.msk.bf16.mxu0 %vm1070_vm14, %v7307_v14  ;;  %v907_v56 = vshll.u32 %v9056_v59, 16 }
 0x107   :  { %750 = vst [vmem:[#allocation3 + $0x80] sm:$0xf] %v749_v20  ;;  %753 = vst [vmem:[#allocation3 + $0x84] sm:$0x1] %v752_v22  ;;  %v826_v18 = vor.u32 %v825_v16, %v822_v15  ;;  %v836_v57 = vrot.slane %v834_v62, 4  ;;  %v839_v11 = vrot.slane %v837_v1, 5  ;;  %v7309_v53 = vcombine.low %v8909_v49, %v9093_v32 }
 0x108   :  { %v831_v36 = vrot.slane %v829_v24, 5  ;;  %v843_v37 = vshll.u32 %v9083_v17, 16  ;;  %v850_v31 = vrot.slane %v848_v2, 4  ;;  %v853_v39 = vrot.slane %v851_v48, 5  ;;  %v9109_v42 = vld [vmem:[#allocation3 + $0x24] sm:$0x1] }
 0x109   :  { %v827_v40 = vrot.slane %v826_v18, 4  ;;  %v840_v41 = vor.u32 %v839_v11, %v836_v57  ;;  %v857_v43 = vshll.u32 %v9091_v27, 16  ;;  %v932_v62 = vshrl.u32 %v9093_v32, 16  ;;  %v9114_v54 = vld [vmem:[#allocation3 + $0x2c] sm:$0x1] }
 0x10a   :  { %v845_v45 = vrot.slane %v843_v37, 5  ;;  %v854_v1 = vor.u32 %v853_v39, %v850_v31  ;;  %v935_v50 = vshll.u32 %v9093_v32, 16  ;;  %v9116_v2 = vld [vmem:[#allocation3 + $0x60] sm:$0xf]  ;;  %v864_v63 = vrot.slane %v862_v29, 4 }
 0x10b   :  { %v832_v46 = vsel %vm8933_vm11, %v827_v40, %v831_v36  ;;  %v772_v48 = vld [vmem:[#allocation3 + $0x30] sm:$0xf]  ;;  %v841_v55 = vrot.slane %v840_v41, 4  ;;  %v859_v61 = vrot.slane %v857_v43, 5  ;;  %v867_v9 = vrot.slane %v865_v38, 5 }
 0x10c   :  { %v7287_v3 = vcombine.low %v818_v25, %v832_v46  ;;  %v890_v49 = vshrl.u32 %v772_v48, 16  ;;  %v893_v6 = vshll.u32 %v772_v48, 16  ;;  %v7308_v47 = vcombine.low %v772_v48, %v9056_v59  ;;  %v9133_v29 = vld [vmem:[#allocation3 + $0x68] sm:$0xf]  ;;  %v9141_v16 = vld [vmem:[#allocation3 + $0x70] sm:$0xf] }
 0x10d   :  { %v846_v7 = vsel %vm8933_vm11, %v841_v55, %v845_v45  ;;  %v855_v8 = vrot.slane %v854_v1, 4  ;;  %v871_v14 = vshll.u32 %v9109_v42, 16  ;;  %v878_v4 = vrot.slane %v876_v58, 4  ;;  %v9150_v58 = vld [vmem:[#allocation3 + $0x34] sm:$0x1] }
 0x10e   :  { %8072 = vmatprep.mubr.msk.bf16.mxu1 %vm1070_vm14, %v7287_v3  ;;  %8097 = vmatmul.mubr.msk.bf16.gmra.mxu0 %vm1070_vm14, %v7308_v47  ;;  %v881_v5 = vrot.slane %v879_v10, 5  ;;  %v885_v25 = vshll.u32 %v9114_v54, 16  ;;  %v946_v15 = vshrl.u32 %v9116_v2, 16  ;;  %v868_v20 = vor.u32 %v867_v9, %v864_v63  ;;  %v9153_v11 = vld [vmem:[#allocation3 + $0x3c] sm:$0x1] }
 0x10f   :  { %v860_v38 = vsel %vm8933_vm11, %v855_v8, %v859_v61  ;;  %8100 = vmatprep.mubr.msk.bf16.mxu0 %vm1070_vm14, %v7309_v53  ;;  %v873_v22 = vrot.slane %v871_v14, 5  ;;  %v949_v28 = vshll.u32 %v9116_v2, 16  ;;  %v960_v57 = vshrl.u32 %v9133_v29, 16  ;;  %v9155_v36 = vld [vmem:[#allocation3 + $0x78] sm:$0xf]  ;;  %v9174_v61 = vld [vmem:[%s11296_s5 + $0x48] sm:$0xff]  }
 0x110   :  { %v7288_v10 = vcombine.low %v846_v7, %v860_v38  ;;  %v882_v24 = vor.u32 %v881_v5, %v878_v4  ;;  %v887_v18 = vrot.slane %v885_v25, 5  ;;  %v869_v37 = vrot.slane %v868_v20, 4  ;;  %v9182_v7 = vld [vmem:[#allocation3 + $0x88] sm:$0xf] }
 0x111   :  { %v963_v31 = vshll.u32 %v9133_v29, 16  ;;  %v7310_v39 = vcombine.low %v9116_v2, %v9133_v29  ;;  %v892_v40 = vrot.slane %v890_v49, 4  ;;  %v895_v43 = vrot.slane %v893_v6, 5  ;;  %v9179_v49 = vld [vmem:[#allocation3 + $0x80] sm:$0xf] }
 0x112   :  { %8073 = vmatmul.mubr.msk.bf16.vlgmr.msra.gmra.mxu1 %vm1070_vm14, %v7288_v10  ;;  %v883_v41 = vrot.slane %v882_v24, 4  ;;  %v899_v45 = vshll.u32 %v9150_v58, 16  ;;  %v906_v1 = vrot.slane %v904_v26, 4  ;;  %v874_v53 = vsel %vm8933_vm11, %v869_v37, %v873_v22  ;;  %v9188_v29 = vld [vmem:[#allocation3 + $0x5c] sm:$0x1] }
 0x113   :  { %8109 = vmatpush3.bf16.msra.mxu1 %v8896_v44  ;;  %v909_v46 = vrot.slane %v907_v56, 5  ;;  %v913_v48 = vshll.u32 %v9153_v11, 16  ;;  %v974_v55 = vshrl.u32 %v9141_v16, 16  ;;  %v896_v63 = vor.u32 %v895_v43, %v892_v40  ;;  %v9210_v37 = vld [vmem:[#allocation3 + $0x6c] sm:$0x1] }
 0x114   :  { %v888_v26 = vsel %vm8933_vm11, %v883_v41, %v887_v18  ;;  %v901_v44 = vrot.slane %v899_v45, 5  ;;  %v977_v3 = vshll.u32 %v9141_v16, 16  ;;  %8110 = vmatprep.subr.bf16.mxu1 %v8491_v0  ;;  %v988_v47 = vshrl.u32 %v9155_v36, 16  ;;  %v9208_v18 = vld [vmem:[#allocation3 + $0x64] sm:$0x1] }
 0x115   :  { %v7289_v59 = vcombine.low %v874_v53, %v888_v26  ;;  %v910_v56 = vor.u32 %v909_v46, %v906_v1  ;;  %v915_v6 = vrot.slane %v913_v48, 5  ;;  %v897_v8 = vrot.slane %v896_v63, 4  ;;  %v9217_v26 = vld [vmem:[#allocation3 + $0x74] sm:$0x1] }
 0x116   :  { %8101 = vmatmul.mubr.msk.bf16.gmra.mxu0 %vm1070_vm14, %v7310_v39  ;;  %v991_v9 = vshll.u32 %v9155_v36, 16  ;;  %v7311_v14 = vcombine.low %v9141_v16, %v9155_v36  ;;  %v934_v4 = vrot.slane %v932_v62, 4  ;;  %v937_v25 = vrot.slane %v935_v50, 5 }
 0x117   :  { %8076 = vmatprep.mubr.msk.bf16.mxu1 %vm1070_vm14, %v7289_v59  ;;  %v911_v5 = vrot.slane %v910_v56, 4  ;;  %v941_v38 = vshll.u32 %v9188_v29, 16  ;;  %v1002_v20 = vshrl.u32 %v9179_v49, 16  ;;  %8111 = vmatpush3.bf16.msra.mxu1 %v8491_v0  ;;  %v902_v22 = vsel %vm8933_vm11, %v897_v8, %v901_v44  ;;  %v9228_v56 = vld [vmem:[#allocation3 + $0x7c] sm:$0x1] }
 0x118   :  { %8104 = vmatprep.mubr.msk.bf16.mxu0 %vm1070_vm14, %v7311_v14  ;;  %v1005_v16 = vshll.u32 %v9179_v49, 16  ;;  %v1016_v62 = vshrl.u32 %v9182_v7, 16  ;;  %v1019_v10 = vshll.u32 %v9182_v7, 16  ;;  %8148 = vmatprep.subr.bf16.mxu1 %v9174_v61  ;;  %v938_v50 = vor.u32 %v937_v25, %v934_v4 }
 0x119   :  { %v916_v32 = vsel %vm8933_vm11, %v911_v5, %v915_v6  ;;  %v943_v24 = vrot.slane %v941_v38, 5  ;;  %v7312_v0 = vcombine.low %v9179_v49, %v9182_v7  ;;  %v948_v39 = vrot.slane %v946_v15, 4  ;;  %v8493_v49 = vld [vmem:[#allocation3 + $0x8] ss:$8 sps:$4 sm:$0xff]  }
 0x11a   :  { %v7290_v36 = vcombine.low %v902_v22, %v916_v32  ;;  %v951_v40 = vrot.slane %v949_v28, 5  ;;  %v955_v41 = vshll.u32 %v9208_v18, 16  ;;  %v939_v43 = vrot.slane %v938_v50, 4  ;;  %v1367_v32 = vld [vmem:[#allocation3 + $0x10] sm:$0xe] }
 0x11b   :  { %v962_v45 = vrot.slane %v960_v57, 4  ;;  %v965_v1 = vrot.slane %v963_v31, 5  ;;  %v969_v53 = vshll.u32 %v9210_v37, 16  ;;  %v976_v63 = vrot.slane %v974_v55, 4 }
 0x11c   :  { %8077 = vmatmul.mubr.msk.bf16.gmra.mxu1 %vm1070_vm14, %v7290_v36  ;;  %v952_v46 = vor.u32 %v951_v40, %v948_v39  ;;  %v957_v48 = vrot.slane %v955_v41, 5  ;;  %v979_v44 = vrot.slane %v977_v3, 5  ;;  %v944_v2 = vsel %vm8933_vm11, %v939_v43, %v943_v24  ;;  %v1368_v40 = vld [vmem:[#allocation3 + $0x18] sm:$0xe] }
 0x11d   :  { %v966_v15 = vor.u32 %v965_v1, %v962_v45  ;;  %v971_v28 = vrot.slane %v969_v53, 5  ;;  %v983_v59 = vshll.u32 %v9217_v26, 16  ;;  %v7291_v57 = vcombine.low %v930_v33, %v944_v2  ;;  %v9235_v33 = vld [vmem:[#allocation3 + $0x84] sm:$0x1]  ;;  %v8495_v41 = vld [vmem:[#allocation3 + $0x18] ss:$8 sps:$4 sm:$0xff]  }
 0x11e   :  { %8105 = vmatmul.mubr.msk.bf16.gmra.mxu0 %vm1070_vm14, %v7312_v0  ;;  %v953_v31 = vrot.slane %v952_v46, 4  ;;  %v980_v55 = vor.u32 %v979_v44, %v976_v63  ;;  %v990_v3 = vrot.slane %v988_v47, 4  ;;  %v993_v8 = vrot.slane %v991_v9, 5  ;;  %v1366_v9 = vld [vmem:[#allocation3 + $0x8] sm:$0xe] }
 0x11f   :  { %v967_v6 = vrot.slane %v966_v15, 4  ;;  %8132 = vmatprep.mubr.msk.bf16.mxu0 %vm1070_vm14, %v8493_v49  ;;  %v985_v7 = vrot.slane %v983_v59, 5  ;;  %v997_v14 = vshll.u32 %v9228_v56, 16  ;;  %8080 = vmatprep.mubr.msk.bf16.mxu1 %vm1070_vm14, %v7291_v57  ;;  %v1004_v4 = vrot.slane %v1002_v20, 4  ;;  %v9242_v0 = vld [vmem:[#allocation3 + $0x8c] sm:$0x1] }
 0x120   :  { %v958_v12 = vsel %vm8933_vm11, %v953_v31, %v957_v48  ;;  %v981_v13 = vrot.slane %v980_v55, 4  ;;  %v1007_v5 = vrot.slane %v1005_v16, 5  ;;  %v994_v25 = vor.u32 %v993_v8, %v990_v3  ;;  %v8505_v20 = vld [vmem:[%s11296_s5 + $0x50] sm:$0xff]   ;;  %v1369_v44 = vld [vmem:[#allocation3 + $0x20] sm:$0xe] }
 0x121   :  { %v972_v47 = vsel %vm8933_vm11, %v967_v6, %v971_v28  ;;  %v999_v38 = vrot.slane %v997_v14, 5  ;;  %v1011_v22 = vshll.u32 %v9235_v33, 16  ;;  %v1018_v39 = vrot.slane %v1016_v62, 4  ;;  %v8496_v28 = vld [vmem:[#allocation3 + $0x28] ss:$8 sps:$4 sm:$0xff]   ;;  %v9269_v14 = vld [vmem:[%s11296_s5 + $0x78] sm:$0xff]  }
 0x122   :  { %v7292_v50 = vcombine.low %v958_v12, %v972_v47  ;;  %v986_v24 = vsel %vm8933_vm11, %v981_v13, %v985_v7  ;;  %v1008_v36 = vor.u32 %v1007_v5, %v1004_v4  ;;  %v995_v16 = vrot.slane %v994_v25, 4  ;;  %v1370_v59 = vld [vmem:[#allocation3 + $0x28] sm:$0xe]  ;;  %v1371_v55 = vld [vmem:[#allocation3 + $0x30] sm:$0xe] }
 0x123   :  { %v1013_v43 = vrot.slane %v1011_v22, 5  ;;  %v1021_v45 = vrot.slane %v1019_v10, 5  ;;  %v1025_v1 = vshll.u32 %v9242_v0, 16  ;;  %v7324_v46 = vrot.slane %v1366_v9, 9  ;;  %v1374_v8 = vld [vmem:[#allocation3 + $0x58] sm:$0xe] }
 0x124   :  { %8081 = vmatmul.mubr.msk.bf16.gmra.mxu1 %vm1070_vm14, %v7292_v50  ;;  %v1009_v53 = vrot.slane %v1008_v36, 4  ;;  %v1422_v48 = vrot.slane %v9053_v52, 5  ;;  %v7325_v63 = vrot.slane %v1367_v32, 9  ;;  %v1000_v62 = vsel %vm8933_vm11, %v995_v16, %v999_v38  ;;  %v1372_v5 = vld [vmem:[#allocation3 + $0x38] sm:$0xe] }
 0x125   :  { %v1022_v2 = vor.u32 %v1021_v45, %v1018_v39  ;;  %v1027_v15 = vrot.slane %v1025_v1, 5  ;;  %v1426_v49 = vrot.slane %v9083_v17, 5  ;;  %v7293_v10 = vcombine.low %v986_v24, %v1000_v62  ;;  %v1375_v38 = vld [vmem:[#allocation3 + $0x60] sm:$0xe]  ;;  %v1376_v22 = vld [vmem:[#allocation3 + $0x68] sm:$0xe] }
 0x126   :  { %8133 = vmatmul.mubr.msk.bf16.vlgmr.msra.gmra.mxu0 %vm1070_vm14, %v8495_v41  ;;  %v1014_v57 = vsel %vm8933_vm11, %v1009_v53, %v1013_v43  ;;  %v1423_v52 = vsel %vm8944_vm12, %v7324_v46, %v1422_v48  ;;  %v7326_v31 = vrot.slane %v1368_v40, 9  ;;  %v1430_v7 = vrot.slane %v9091_v27, 5  ;;  %v8497_v32 = vld [vmem:[#allocation3 + $0x38] ss:$8 sps:$4 sm:$0xff]   ;;  %v9291_v24 = vld [vmem:[#allocation3 + $0xc] sm:$0x1] }
 0x127   :  { %v1023_v3 = vrot.slane %v1022_v2, 4  ;;  %8136 = vmatprep.mubr.msk.bf16.mxu0 %vm1070_vm14, %v8496_v28  ;;  %v7343_v6 = vcombine.low %v8955_v34, %v1423_v52  ;;  %v9262_v17 = vsel %vm8944_vm12, %v7325_v63, %v1426_v49  ;;  %8169 = vmatpush3.bf16.msra.mxu0 %v9062_v60  ;;  %v7327_v12 = vrot.slane %v1369_v44, 9  ;;  %v2302_v36 = vld [vmem:[#allocation3 + $0x8] sm:$0xe]  ;;  %v8499_v39 = vld [vmem:[#allocation3 + $0x58] ss:$8 sps:$4 sm:$0xff]  }
 0x128   :  { %8084 = vmatprep.mubr.msk.bf16.mxu1 %vm1070_vm14, %v7293_v10  ;;  %v1434_v13 = vrot.slane %v9109_v42, 5  ;;  %v7328_v34 = vrot.slane %v1370_v59, 9  ;;  %v1438_v4 = vrot.slane %v9114_v54, 5  ;;  %8170 = vmatprep.subr.bf16.mxu0 %v8505_v20  ;;  %v9278_v60 = vsel %vm8944_vm12, %v7326_v31, %v1430_v7  ;;  %v9300_v43 = vld [vmem:[#allocation3 + $0x14] sm:$0x1] }
 0x129   :  { %v1028_v27 = vsel %vm8933_vm11, %v1023_v3, %v1027_v15  ;;  %v7329_v47 = vrot.slane %v1371_v55, 9  ;;  %v1442_v25 = vrot.slane %v9150_v58, 5  ;;  %v7344_v42 = vcombine.low %v9262_v17, %v9278_v60  ;;  %v2303_v45 = vld [vmem:[#allocation3 + $0x10] sm:$0xe]  ;;  %v1378_v2 = vld [vmem:[#allocation3 + $0x78] sm:$0xe] }
 0x12a   :  { %v7294_v9 = vcombine.low %v1014_v57, %v1028_v27  ;;  %v9285_v54 = vsel %vm8944_vm12, %v7327_v12, %v1434_v13  ;;  %v9289_v50 = vsel %vm8944_vm12, %v7328_v34, %v1438_v4  ;;  %v7330_v16 = vrot.slane %v1372_v5, 9  ;;  %v1377_v63 = vld [vmem:[#allocation3 + $0x70] sm:$0xe]  ;;  %v9324_v49 = vld [vmem:[#allocation3 + $0x1c] sm:$0x1]  ;;  %v8503_v34 = vld [vmem:[%s11296_s5 + $0x40] sm:$0xff]  }
 0x12b   :  { %v7345_v58 = vcombine.low %v9285_v54, %v9289_v50  ;;  %v9297_v40 = vsel %vm8944_vm12, %v7329_v47, %v1442_v25  ;;  %v1446_v41 = vrot.slane %v9153_v11, 5  ;;  %8171 = vmatpush3.bf16.msra.mxu0 %v8505_v20  ;;  %v7332_v1 = vrot.slane %v1374_v8, 9  ;;  %v9334_v31 = vld [vmem:[#allocation3 + $0x24] sm:$0x1]  ;;  %v2305_v55 = vld [vmem:[#allocation3 + $0x20] sm:$0xe] }
 0x12c   :  { %8085 = vmatmul.mubr.msk.bf16.gmra.mxu1 %vm1070_vm14, %v7294_v9  ;;  %v1454_v53 = vrot.slane %v9188_v29, 5  ;;  %v7333_v46 = vrot.slane %v1375_v38, 9  ;;  %v1458_v48 = vrot.slane %v9208_v18, 5  ;;  %8208 = vmatprep.subr.bf16.mxu0 %v9269_v14  ;;  %v7334_v44 = vrot.slane %v1376_v22, 9  ;;  %v1379_v12 = vld [vmem:[#allocation3 + $0x80] sm:$0xe] }
 0x12d   :  { %8112 = vmatprep.mubr.msk.bf16.mxu1 %vm1070_vm14, %v7343_v6  ;;  %v9309_v11 = vsel %vm8944_vm12, %v7330_v16, %v1446_v41  ;;  %v1462_v20 = vrot.slane %v9210_v37, 5  ;;  %v7405_v62 = vrot.slane %v2302_v36, 9  ;;  %v2352_v28 = vrot.slane %v9291_v24, 5  ;;  %v2304_v37 = vld [vmem:[#allocation3 + $0x18] sm:$0xe] }
 0x12e   :  { %8137 = vmatmul.mubr.msk.bf16.gmra.mxu0 %vm1070_vm14, %v8497_v32  ;;  %v7346_v29 = vcombine.low %v9297_v40, %v9309_v11  ;;  %v9317_v18 = vsel %vm8944_vm12, %v7332_v1, %v1454_v53  ;;  %v9321_v15 = vsel %vm8944_vm12, %v7333_v46, %v1458_v48  ;;  %v7406_v57 = vrot.slane %v2303_v45, 9  ;;  %v1380_v13 = vld [vmem:[#allocation3 + $0x88] sm:$0xe]  ;;  %v9351_v25 = vld [vmem:[#allocation3 + $0x2c] sm:$0x1] }
 0x12f   :  { %8140 = vmatprep.mubr.msk.bf16.mxu0 %vm1070_vm14, %v8499_v39  ;;  %v7347_v59 = vcombine.low %v8959_v35, %v9317_v18  ;;  %v9331_v10 = vsel %vm8944_vm12, %v7334_v44, %v1462_v20  ;;  %v2356_v52 = vrot.slane %v9300_v43, 5  ;;  %v9340_v6 = vsel %vm8944_vm12, %v7405_v62, %v2352_v28  ;;  %v9360_v32 = vld [vmem:[#allocation3 + $0x34] sm:$0x1]  ;;  %v2306_v36 = vld [vmem:[#allocation3 + $0x28] sm:$0xe] }
 0x130   :  { %v7348_v3 = vcombine.low %v9321_v15, %v9331_v10  ;;  %v7335_v7 = vrot.slane %v1377_v63, 9  ;;  %v1466_v8 = vrot.slane %v9217_v26, 5  ;;  %v7336_v5 = vrot.slane %v1378_v2, 9  ;;  %v2307_v45 = vld [vmem:[#allocation3 + $0x30] sm:$0xe]  ;;  %v9406_v2 = vld [vmem:[%s11296_s5 + $0x68] sm:$0xff]  }
 0x131   :  { %v9348_v4 = vsel %vm8944_vm12, %v7406_v57, %v2356_v52  ;;  %v1470_v27 = vrot.slane %v9228_v56, 5  ;;  %v7407_v47 = vrot.slane %v2304_v37, 9  ;;  %v2360_v22 = vrot.slane %v9324_v49, 5  ;;  %v8500_v1 = vld [vmem:[#allocation3 + $0x68] ss:$8 sps:$4 sm:$0xff]  }
 0x132   :  { %v7425_v38 = vcombine.low %v9340_v6, %v9348_v4  ;;  %v9357_v26 = vsel %vm8944_vm12, %v7335_v7, %v1466_v8  ;;  %v7408_v9 = vrot.slane %v2305_v55, 9  ;;  %v2364_v56 = vrot.slane %v9334_v31, 5  ;;  %v1868_v44 = vld [vmem:[#allocation3 + $0x8] sm:$0xf]  ;;  %v1870_v20 = vld [vmem:[#allocation3 + $0x10] sm:$0xf] }
 0x133   :  { %v9364_v39 = vsel %vm8944_vm12, %v7336_v5, %v1470_v27  ;;  %v7337_v16 = vrot.slane %v1379_v12, 9  ;;  %v1474_v41 = vrot.slane %v9235_v33, 5  ;;  %v9376_v46 = vsel %vm8944_vm12, %v7407_v47, %v2360_v22  ;;  %v8501_v33 = vld [vmem:[#allocation3 + $0x78] ss:$8 sps:$4 sm:$0xff]   ;;  %v9401_v62 = vld [vmem:[#allocation3 + $0x3c] sm:$0x1] }
 0x134   :  { %8113 = vmatmul.mubr.msk.bf16.vlgmr.msra.gmra.mxu1 %vm1070_vm14, %v7344_v42  ;;  %v7349_v53 = vcombine.low %v9357_v26, %v9364_v39  ;;  %v7338_v48 = vrot.slane %v1380_v13, 9  ;;  %v1478_v63 = vrot.slane %v9242_v0, 5  ;;  %v9386_v17 = vsel %vm8944_vm12, %v7408_v9, %v2364_v56  ;;  %v9415_v55 = vld [vmem:[#allocation3 + $0x44] sm:$0x1]  ;;  %v2308_v7 = vld [vmem:[#allocation3 + $0x38] sm:$0xe] }
 0x135   :  { %8149 = vmatpush3.bf16.msra.mxu1 %v9174_v61  ;;  %8116 = vmatprep.mubr.msk.bf16.mxu1 %vm1070_vm14, %v7345_v58  ;;  %v9390_v60 = vsel %vm8944_vm12, %v7337_v16, %v1474_v41  ;;  %v7409_v42 = vrot.slane %v2306_v36, 9  ;;  %v2368_v0 = vrot.slane %v9351_v25, 5  ;;  %v7426_v61 = vcombine.low %v9376_v46, %v9386_v17  ;;  %v2309_v27 = vld [vmem:[#allocation3 + $0x40] sm:$0xe]  ;;  %v1872_v56 = vld [vmem:[#allocation3 + $0x18] sm:$0xf] }
 0x136   :  { %8141 = vmatmul.mubr.msk.bf16.gmra.mxu0 %vm1070_vm14, %v8500_v1  ;;  %8150 = vmatprep.subr.bf16.mxu1 %v8503_v34  ;;  %v9398_v54 = vsel %vm8944_vm12, %v7338_v48, %v1478_v63  ;;  %v7410_v50 = vrot.slane %v2307_v45, 9  ;;  %v2372_v58 = vrot.slane %v9360_v32, 5  ;;  %v1901_v57 = vshrl.u32 %v1868_v44, 16  ;;  %v1874_v48 = vld [vmem:[#allocation3 + $0x20] sm:$0xf] }
 0x137   :  { %8144 = vmatprep.mubr.msk.bf16.mxu0 %vm1070_vm14, %v8501_v33  ;;  %v7350_v28 = vcombine.low %v9390_v60, %v9398_v54  ;;  %v9413_v37 = vsel %vm8944_vm12, %v7409_v42, %v2368_v0  ;;  %v1904_v52 = vshll.u32 %v1868_v44, 16  ;;  %v1910_v12 = vshll.u32 %v9291_v24, 16  ;;  %v8502_v24 = vld [vmem:[#allocation3 + $0x88] ss:$8 sps:$4 sm:$0xff]   ;;  %v2311_v35 = vld [vmem:[#allocation3 + $0x60] sm:$0xe] }
 0x138   :  { %v9419_v8 = vsel %vm8944_vm12, %v7410_v50, %v2372_v58  ;;  %v1915_v13 = vshrl.u32 %v1870_v20, 16  ;;  %v1918_v5 = vshll.u32 %v1870_v20, 16  ;;  %v1903_v22 = vrot.slane %v1901_v57, 4  ;;  %v9432_v50 = vld [vmem:[#allocation3 + $0x5c] sm:$0x1] }
 0x139   :  { %8151 = vmatpush3.bf16.msra.mxu1 %v8503_v34  ;;  %v7427_v47 = vcombine.low %v9413_v37, %v9419_v8  ;;  %v1906_v9 = vrot.slane %v1904_v52, 5  ;;  %v1924_v36 = vshll.u32 %v9300_v43, 16  ;;  %v1912_v16 = vrot.slane %v1910_v12, 5  ;;  %v2310_v58 = vld [vmem:[#allocation3 + $0x58] sm:$0xe] }
 0x13a   :  { %v1917_v41 = vrot.slane %v1915_v13, 4  ;;  %v1920_v45 = vrot.slane %v1918_v5, 5  ;;  %v7411_v1 = vrot.slane %v2308_v7, 9  ;;  %8188 = vmatprep.subr.bf16.mxu1 %v9406_v2  ;;  %v2376_v34 = vrot.slane %v9401_v62, 5  ;;  %v1876_v6 = vld [vmem:[#allocation3 + $0x28] sm:$0xf] }
 0x13b   :  { %v1907_v63 = vor.u32 %v1906_v9, %v1903_v22  ;;  %v1926_v44 = vrot.slane %v1924_v36, 5  ;;  %v7412_v33 = vrot.slane %v2309_v27, 9  ;;  %v2380_v42 = vrot.slane %v9415_v55, 5  ;;  %v9456_v27 = vld [vmem:[#allocation3 + $0x64] sm:$0x1] }
 0x13c   :  { %8117 = vmatmul.mubr.msk.bf16.gmra.mxu1 %vm1070_vm14, %v7346_v29  ;;  %v1921_v43 = vor.u32 %v1920_v45, %v1917_v41  ;;  %v1929_v0 = vshrl.u32 %v1872_v56, 16  ;;  %v1932_v20 = vshll.u32 %v1872_v56, 16  ;;  %v9440_v52 = vsel %vm8944_vm12, %v7411_v1, %v2376_v34  ;;  %v1878_v4 = vld [vmem:[#allocation3 + $0x30] sm:$0xf]  ;;  %v1882_v26 = vld [vmem:[#allocation3 + $0x40] sm:$0xf] }
 0x13d   :  { %8120 = vmatprep.mubr.msk.bf16.mxu1 %vm1070_vm14, %v7347_v59  ;;  %v1908_v57 = vrot.slane %v1907_v63, 4  ;;  %v1938_v40 = vshll.u32 %v9324_v49, 16  ;;  %v1943_v11 = vshrl.u32 %v1874_v48, 16  ;;  %v9446_v7 = vsel %vm8944_vm12, %v7412_v33, %v2380_v42  ;;  %v9465_v33 = vld [vmem:[#allocation3 + $0x6c] sm:$0x1] }
 0x13e   :  { %8145 = vmatmul.mubr.msk.bf16.gmra.mxu0 %vm1070_vm14, %v8502_v24  ;;  %v1922_v29 = vrot.slane %v1921_v43, 4  ;;  %v1931_v12 = vrot.slane %v1929_v0, 4  ;;  %v1934_v13 = vrot.slane %v1932_v20, 5  ;;  %v7428_v49 = vcombine.low %v9440_v52, %v9446_v7  ;;  %v9472_v42 = vld [vmem:[#allocation3 + $0x74] sm:$0x1] }
 0x13f   :  { %8172 = vmatprep.mubr.msk.bf16.mxu0 %vm1070_vm14, %v7425_v38  ;;  %v1913_v18 = vsel %vm8933_vm11, %v1908_v57, %v1912_v16  ;;  %v1940_v59 = vrot.slane %v1938_v40, 5  ;;  %v1945_v5 = vrot.slane %v1943_v11, 4  ;;  %v1946_v36 = vshll.u32 %v1874_v48, 16  ;;  %v2312_v40 = vld [vmem:[#allocation3 + $0x68] sm:$0xe] }
 0x140   :  { %v1927_v22 = vsel %vm8933_vm11, %v1922_v29, %v1926_v44  ;;  %v1935_v9 = vor.u32 %v1934_v13, %v1931_v12  ;;  %v1952_v56 = vshll.u32 %v9334_v31, 16  ;;  %v7413_v41 = vrot.slane %v2310_v58, 9  ;;  %v2313_v11 = vld [vmem:[#allocation3 + $0x70] sm:$0xe]  ;;  %v1880_v12 = vld [vmem:[#allocation3 + $0x38] sm:$0xf] }
 0x141   :  { %v9461_v38 = vcombine.low %v1913_v18, %v1927_v22  ;;  %v2384_v16 = vrot.slane %v9432_v50, 5  ;;  %v7414_v45 = vrot.slane %v2311_v35, 9  ;;  %v1948_v24 = vrot.slane %v1946_v36, 5 }
 0x142   :  { %v1936_v1 = vrot.slane %v1935_v9, 4  ;;  %v1954_v63 = vrot.slane %v1952_v56, 5  ;;  %v2388_v34 = vrot.slane %v9456_v27, 5  ;;  %v1957_v31 = vshrl.u32 %v1876_v6, 16 }
 0x143   :  { %v9469_v48 = vsel %vm8944_vm12, %v7413_v41, %v2384_v16  ;;  %v1960_v44 = vshll.u32 %v1876_v6, 16  ;;  %v1966_v43 = vshll.u32 %v9351_v25, 16  ;;  %v1949_v20 = vor.u32 %v1948_v24, %v1945_v5  ;;  %v8509_v25 = vld [vmem:[%s11296_s5 + $0x70] sm:$0xff]   ;;  %v2314_v41 = vld [vmem:[#allocation3 + $0x78] sm:$0xe] }
 0x144   :  { %8121 = vmatmul.mubr.msk.bf16.gmra.mxu1 %vm1070_vm14, %v7348_v3  ;;  %v1941_v0 = vsel %vm8933_vm11, %v1936_v1, %v1940_v59  ;;  %v9482_v58 = vsel %vm8944_vm12, %v7414_v45, %v2388_v34  ;;  %v1971_v57 = vshrl.u32 %v1878_v4, 16  ;;  %v1959_v10 = vrot.slane %v1957_v31, 4 }
 0x145   :  { %8124 = vmatprep.mubr.msk.bf16.mxu1 %vm1070_vm14, %v7349_v53  ;;  %v7429_v15 = vcombine.low %v9469_v48, %v9482_v58  ;;  %v1962_v3 = vrot.slane %v1960_v44, 5  ;;  %v1968_v29 = vrot.slane %v1966_v43, 5  ;;  %v1950_v13 = vrot.slane %v1949_v20, 4  ;;  %v9526_v44 = vld [vmem:[#allocation3 + $0x84] sm:$0x1] }
 0x146   :  { %8173 = vmatmul.mubr.msk.bf16.vlgmr.msra.gmra.mxu0 %vm1070_vm14, %v7426_v61  ;;  %v1973_v35 = vrot.slane %v1971_v57, 4  ;;  %v1974_v18 = vshll.u32 %v1878_v4, 16  ;;  %v1980_v59 = vshll.u32 %v9360_v32, 16  ;;  %v7415_v53 = vrot.slane %v2312_v40, 9  ;;  %v9516_v4 = vld [vmem:[#allocation3 + $0x7c] sm:$0x1] }
 0x147   :  { %8176 = vmatprep.mubr.msk.bf16.mxu0 %vm1070_vm14, %v7427_v47  ;;  %v1963_v39 = vor.u32 %v1962_v3, %v1959_v10  ;;  %v2392_v5 = vrot.slane %v9465_v33, 5  ;;  %v7416_v22 = vrot.slane %v2313_v11, 9  ;;  %8209 = vmatpush3.bf16.msra.mxu0 %v9269_v14  ;;  %v1955_v46 = vsel %vm8933_vm11, %v1950_v13, %v1954_v63  ;;  %v2315_v63 = vld [vmem:[#allocation3 + $0x80] sm:$0xe]  ;;  %v1884_v57 = vld [vmem:[#allocation3 + $0x58] sm:$0xf] }
 0x148   :  { %v1976_v17 = vrot.slane %v1974_v18, 5  ;;  %v1982_v61 = vrot.slane %v1980_v59, 5  ;;  %v2396_v32 = vrot.slane %v9472_v42, 5  ;;  %8210 = vmatprep.subr.bf16.mxu0 %v8509_v25  ;;  %v7388_v9 = vcombine.low %v1941_v0, %v1955_v46  ;;  %v1886_v11 = vld [vmem:[#allocation3 + $0x60] sm:$0xf] }
 0x149   :  { %v1964_v36 = vrot.slane %v1963_v39, 4  ;;  %v9509_v37 = vsel %vm8944_vm12, %v7415_v53, %v2392_v5  ;;  %v1985_v8 = vshrl.u32 %v1880_v12, 16  ;;  %v1988_v14 = vshll.u32 %v1880_v12, 16  ;;  %v2316_v18 = vld [vmem:[#allocation3 + $0x88] sm:$0xe]  ;;  %v8507_v59 = vld [vmem:[%s11296_s5 + $0x60] sm:$0xff]  }
 0x14a   :  { %v1977_v47 = vor.u32 %v1976_v17, %v1973_v35  ;;  %v9513_v56 = vsel %vm8944_vm12, %v7416_v22, %v2396_v32  ;;  %v1994_v6 = vshll.u32 %v9401_v62, 16  ;;  %v1999_v24 = vshrl.u32 %v1882_v26, 16  ;;  %v9552_v22 = vld [vmem:[#allocation3 + $0x94] sm:$0x1]  ;;  %v2317_v46 = vld [vmem:[#allocation3 + $0x90] sm:$0xe] }
 0x14b   :  { %v1969_v16 = vsel %vm8933_vm11, %v1964_v36, %v1968_v29  ;;  %v7430_v45 = vcombine.low %v9509_v37, %v9513_v56  ;;  %v1987_v1 = vrot.slane %v1985_v8, 4  ;;  %8211 = vmatpush3.bf16.msra.mxu0 %v8509_v25  ;;  %v1990_v62 = vrot.slane %v1988_v14, 5  ;;  %v9542_v29 = vld [vmem:[#allocation3 + $0x8c] sm:$0x1]  ;;  %v1888_v36 = vld [vmem:[#allocation3 + $0x68] sm:$0xf] }
 0x14c   :  { %8125 = vmatmul.mubr.msk.bf16.gmra.mxu1 %vm1070_vm14, %v7350_v28  ;;  %v1978_v34 = vrot.slane %v1977_v47, 4  ;;  %v1996_v48 = vrot.slane %v1994_v6, 5  ;;  %v2002_v31 = vshll.u32 %v1882_v26, 16  ;;  %v2001_v43 = vrot.slane %v1999_v24, 4 }
 0x14d   :  { %8152 = vmatprep.mubr.msk.bf16.mxu1 %vm1070_vm14, %v9461_v38  ;;  %v2008_v0 = vshll.u32 %v9415_v55, 16  ;;  %v7417_v20 = vrot.slane %v2314_v41, 9  ;;  %v2400_v58 = vrot.slane %v9516_v4, 5  ;;  %v1991_v54 = vor.u32 %v1990_v62, %v1987_v1  ;;  %v1890_v1 = vld [vmem:[#allocation3 + $0x70] sm:$0xf] }
 0x14e   :  { %8177 = vmatmul.mubr.msk.bf16.gmra.mxu0 %vm1070_vm14, %v7428_v49  ;;  %v1983_v60 = vsel %vm8933_vm11, %v1978_v34, %v1982_v61  ;;  %v2004_v28 = vrot.slane %v2002_v31, 5  ;;  %v7418_v40 = vrot.slane %v2315_v63, 9  ;;  %v2404_v10 = vrot.slane %v9526_v44, 5  ;;  %v2803_v34 = vld [vmem:[#allocation3 + $0x10] sm:$0xf] }
 0x14f   :  { %8180 = vmatprep.mubr.msk.bf16.mxu0 %vm1070_vm14, %v7429_v15  ;;  %v7389_v38 = vcombine.low %v1969_v16, %v1983_v60  ;;  %v2010_v55 = vrot.slane %v2008_v0, 5  ;;  %v2401_v25 = vsel %vm8944_vm12, %v7417_v20, %v2400_v58  ;;  %v1992_v3 = vrot.slane %v1991_v54, 4 }
 0x150   :  { %v2005_v52 = vor.u32 %v2004_v28, %v2001_v43  ;;  %v2013_v7 = vshrl.u32 %v1884_v57, 16  ;;  %v2016_v49 = vshll.u32 %v1884_v57, 16  ;;  %v2405_v12 = vsel %vm8944_vm12, %v7418_v40, %v2404_v10  ;;  %v9574_v57 = vld [vmem:[#allocation3 + $0x14] sm:$0x1] }
 0x151   :  { %v2022_v13 = vshll.u32 %v9432_v50, 16  ;;  %v2027_v35 = vshrl.u32 %v1886_v11, 16  ;;  %v2030_v15 = vshll.u32 %v1886_v11, 16  ;;  %v1997_v26 = vsel %vm8933_vm11, %v1992_v3, %v1996_v48  ;;  %v2805_v11 = vld [vmem:[#allocation3 + $0x18] sm:$0xf] }
 0x152   :  { %v2006_v39 = vrot.slane %v2005_v52, 4  ;;  %v7431_v53 = vcombine.low %v2401_v25, %v2405_v12  ;;  %v2015_v5 = vrot.slane %v2013_v7, 4  ;;  %v2018_v17 = vrot.slane %v2016_v49, 5  ;;  %v9582_v52 = vld [vmem:[#allocation3 + $0x1c] sm:$0x1] }
 0x153   :  { %v2024_v61 = vrot.slane %v2022_v13, 5  ;;  %v2029_v32 = vrot.slane %v2027_v35, 4  ;;  %v2032_v50 = vrot.slane %v2030_v15, 5  ;;  %v2036_v8 = vshll.u32 %v9456_v27, 16 }
 0x154   :  { %8153 = vmatmul.mubr.msk.bf16.vlgmr.msra.gmra.mxu1 %vm1070_vm14, %v7388_v9  ;;  %v2011_v37 = vsel %vm8933_vm11, %v2006_v39, %v2010_v55  ;;  %v7419_v47 = vrot.slane %v2316_v18, 9  ;;  %v2408_v56 = vrot.slane %v9542_v29, 5  ;;  %v2019_v6 = vor.u32 %v2018_v17, %v2015_v5  ;;  %v1892_v18 = vld [vmem:[#allocation3 + $0x78] sm:$0xf] }
 0x155   :  { %8189 = vmatpush3.bf16.msra.mxu1 %v9406_v2  ;;  %8156 = vmatprep.mubr.msk.bf16.mxu1 %vm1070_vm14, %v7389_v38  ;;  %v7390_v14 = vcombine.low %v1997_v26, %v2011_v37  ;;  %v2033_v41 = vor.u32 %v2032_v50, %v2029_v32  ;;  %v7420_v16 = vrot.slane %v2317_v46, 9  ;;  %v2038_v9 = vrot.slane %v2036_v8, 5  ;;  %v9568_v2 = vld [vmem:[%s11296_s5 + $0x88] sm:$0xff]  }
 0x156   :  { %8181 = vmatmul.mubr.msk.bf16.gmra.mxu0 %vm1070_vm14, %v7430_v45  ;;  %v2409_v24 = vsel %vm8944_vm12, %v7419_v47, %v2408_v56  ;;  %v2412_v27 = vrot.slane %v9552_v22, 5  ;;  %8190 = vmatprep.subr.bf16.mxu1 %v8507_v59  ;;  %v2041_v63 = vshrl.u32 %v1888_v36, 16  ;;  %v2020_v62 = vrot.slane %v2019_v6, 4  ;;  %v2807_v6 = vld [vmem:[#allocation3 + $0x20] sm:$0xf] }
 0x157   :  { %8184 = vmatprep.mubr.msk.bf16.mxu0 %vm1070_vm14, %v7431_v53  ;;  %v2034_v48 = vrot.slane %v2033_v41, 4  ;;  %v2044_v31 = vshll.u32 %v1888_v36, 16  ;;  %v2050_v45 = vshll.u32 %v9465_v33, 16  ;;  %v2055_v20 = vshrl.u32 %v1890_v1, 16  ;;  %v1894_v36 = vld [vmem:[#allocation3 + $0x80] sm:$0xf] }
 0x158   :  { %v2413_v43 = vsel %vm8944_vm12, %v7420_v16, %v2412_v27  ;;  %v2043_v0 = vrot.slane %v2041_v63, 4  ;;  %v2058_v58 = vshll.u32 %v1890_v1, 16  ;;  %v2025_v60 = vsel %vm8933_vm11, %v2020_v62, %v2024_v61  ;;  %v9594_v62 = vld [vmem:[#allocation3 + $0x24] sm:$0x1] }
 0x159   :  { %v2039_v54 = vsel %vm8933_vm11, %v2034_v48, %v2038_v9  ;;  %v7432_v28 = vcombine.low %v2409_v24, %v2413_v43  ;;  %v2046_v40 = vrot.slane %v2044_v31, 5  ;;  %8191 = vmatpush3.bf16.msra.mxu1 %v8507_v59  ;;  %v2052_v33 = vrot.slane %v2050_v45, 5  ;;  %v2809_v43 = vld [vmem:[#allocation3 + $0x28] sm:$0xf] }
 0x15a   :  { %v7391_v38 = vcombine.low %v2025_v60, %v2039_v54  ;;  %v2057_v55 = vrot.slane %v2055_v20, 4  ;;  %v2060_v25 = vrot.slane %v2058_v58, 5  ;;  %8228 = vmatprep.subr.bf16.mxu1 %v9568_v2  ;;  %v2064_v3 = vshll.u32 %v9472_v42, 16  ;;  %v9602_v60 = vld [vmem:[#allocation3 + $0x2c] sm:$0x1] }
 0x15b   :  { %v2047_v10 = vor.u32 %v2046_v40, %v2043_v0  ;;  %v2836_v7 = vshrl.u32 %v2803_v34, 16  ;;  %v2839_v49 = vshll.u32 %v2803_v34, 16  ;;  %v2845_v13 = vshll.u32 %v9574_v57, 16 }
 0x15c   :  { %8157 = vmatmul.mubr.msk.bf16.gmra.mxu1 %vm1070_vm14, %v7390_v14  ;;  %v2061_v12 = vor.u32 %v2060_v25, %v2057_v55  ;;  %v2850_v35 = vshrl.u32 %v2805_v11, 16  ;;  %v2853_v15 = vshll.u32 %v2805_v11, 16  ;;  %v2066_v26 = vrot.slane %v2064_v3, 5 }
 0x15d   :  { %8160 = vmatprep.mubr.msk.bf16.mxu1 %vm1070_vm14, %v7391_v38  ;;  %v2048_v59 = vrot.slane %v2047_v10, 4  ;;  %v2838_v39 = vrot.slane %v2836_v7, 4  ;;  %v2841_v53 = vrot.slane %v2839_v49, 5  ;;  %v2847_v5 = vrot.slane %v2845_v13, 5 }
 0x15e   :  { %8185 = vmatmul.mubr.msk.bf16.gmra.mxu0 %vm1070_vm14, %v7432_v28  ;;  %v2062_v42 = vrot.slane %v2061_v12, 4  ;;  %v2852_v46 = vrot.slane %v2850_v35, 4  ;;  %v2855_v17 = vrot.slane %v2853_v15, 5  ;;  %v2859_v50 = vshll.u32 %v9582_v52, 16  ;;  %v1896_v28 = vld [vmem:[#allocation3 + $0x88] sm:$0xf] }
 0x15f   :  { %v2053_v61 = vsel %vm8933_vm11, %v2048_v59, %v2052_v33  ;;  %v2842_v32 = vor.u32 %v2841_v53, %v2838_v39  ;;  %v2069_v37 = vshrl.u32 %v1892_v18, 16  ;;  %v2072_v56 = vshll.u32 %v1892_v18, 16  ;;  %v1898_v12 = vld [vmem:[#allocation3 + $0x90] sm:$0xf] }
 0x160   :  { %v2067_v8 = vsel %vm8933_vm11, %v2062_v42, %v2066_v26  ;;  %v2856_v47 = vor.u32 %v2855_v17, %v2852_v46  ;;  %v2078_v14 = vshll.u32 %v9516_v4, 16  ;;  %v2861_v1 = vrot.slane %v2859_v50, 5 }
 0x161   :  { %v7392_v41 = vcombine.low %v2053_v61, %v2067_v8  ;;  %v2843_v16 = vrot.slane %v2842_v32, 4  ;;  %v2071_v9 = vrot.slane %v2069_v37, 4  ;;  %v2074_v27 = vrot.slane %v2072_v56, 5  ;;  %v2811_v8 = vld [vmem:[#allocation3 + $0x30] sm:$0xf] }
 0x162   :  { %v2857_v24 = vrot.slane %v2856_v47, 4  ;;  %v2080_v63 = vrot.slane %v2078_v14, 5  ;;  %v2083_v34 = vshrl.u32 %v1894_v36, 16  ;;  %v2086_v31 = vshll.u32 %v1894_v36, 16  ;;  %v9613_v47 = vld [vmem:[#allocation3 + $0x34] sm:$0x1] }
 0x163   :  { %v2848_v48 = vsel %vm8933_vm11, %v2843_v16, %v2847_v5  ;;  %v2092_v45 = vshll.u32 %v9526_v44, 16  ;;  %v2864_v0 = vshrl.u32 %v2807_v6, 16  ;;  %v2075_v20 = vor.u32 %v2074_v27, %v2071_v9  ;;  %v2813_v16 = vld [vmem:[#allocation3 + $0x38] sm:$0xf] }
 0x164   :  { %8161 = vmatmul.mubr.msk.bf16.gmra.mxu1 %vm1070_vm14, %v7392_v41  ;;  %v2862_v4 = vsel %vm8933_vm11, %v2857_v24, %v2861_v1  ;;  %v2085_v58 = vrot.slane %v2083_v34, 4  ;;  %v2867_v54 = vshll.u32 %v2807_v6, 16  ;;  %v2088_v11 = vrot.slane %v2086_v31, 5 }
 0x165   :  { %v7469_v40 = vcombine.low %v2848_v48, %v2862_v4  ;;  %v2094_v38 = vrot.slane %v2092_v45, 5  ;;  %v2866_v33 = vrot.slane %v2864_v0, 4  ;;  %v2076_v55 = vrot.slane %v2075_v20, 4  ;;  %v126_v4 = vld [vmem:[#allocation3 + $0x48] sm:$0x1] }
 0x166   :  { %v2869_v25 = vrot.slane %v2867_v54, 5  ;;  %v2873_v44 = vshll.u32 %v9594_v62, 16  ;;  %v2878_v10 = vshrl.u32 %v2809_v43, 16  ;;  %v2089_v3 = vor.u32 %v2088_v11, %v2085_v58  ;;  %v188_v20 = vld [vmem:[#allocation3 + $0x4c] sm:$0x1] }
 0x167   :  { %8212 = vmatprep.mubr.msk.bf16.mxu0 %vm1070_vm14, %v7469_v40  ;;  %v2881_v7 = vshll.u32 %v2809_v43, 16  ;;  %v2887_v49 = vshll.u32 %v9602_v60, 16  ;;  %v2097_v13 = vshrl.u32 %v1896_v28, 16  ;;  %v2081_v35 = vsel %vm8933_vm11, %v2076_v55, %v2080_v63  ;;  %v9618_v63 = vld [vmem:[#allocation3 + $0x3c] sm:$0x1] }
 0x168   :  { %v2870_v15 = vor.u32 %v2869_v25, %v2866_v33  ;;  %v2875_v18 = vrot.slane %v2873_v44, 5  ;;  %v2880_v59 = vrot.slane %v2878_v10, 4  ;;  %v2090_v26 = vrot.slane %v2089_v3, 4  ;;  %v2815_v11 = vld [vmem:[#allocation3 + $0x40] sm:$0xf] }
 0x169   :  { %v2883_v39 = vrot.slane %v2881_v7, 5  ;;  %v2889_v53 = vrot.slane %v2887_v49, 5  ;;  %v2099_v42 = vrot.slane %v2097_v13, 4  ;;  %v2100_v46 = vshll.u32 %v1896_v28, 16  ;;  %v9629_v49 = vld [vmem:[#allocation3 + $0x44] sm:$0x1] }
 0x16a   :  { %v2871_v5 = vrot.slane %v2870_v15, 4  ;;  %v2106_v17 = vshll.u32 %v9542_v29, 16  ;;  %v2111_v61 = vshrl.u32 %v1898_v12, 16  ;;  %v2095_v32 = vsel %vm8933_vm11, %v2090_v26, %v2094_v38  ;;  %v8510_v15 = vld [vmem:[#allocation3 + $0x10] ss:$8 sps:$4 sm:$0xff]  }
 0x16b   :  { %v2884_v50 = vor.u32 %v2883_v39, %v2880_v59  ;;  %v2114_v36 = vshll.u32 %v1898_v12, 16  ;;  %v2120_v37 = vshll.u32 %v9552_v22, 16  ;;  %v7393_v56 = vcombine.low %v2081_v35, %v2095_v32  ;;  %v2819_v12 = vld [vmem:[#allocation3 + $0x60] sm:$0xf]  ;;  %v9636_v32 = vld [vmem:[#allocation3 + $0x64] sm:$0x1] }
 0x16c   :  { %v2876_v14 = vsel %vm8933_vm11, %v2871_v5, %v2875_v18  ;;  %v2102_v6 = vrot.slane %v2100_v46, 5  ;;  %v2108_v41 = vrot.slane %v2106_v17, 5  ;;  %v2113_v29 = vrot.slane %v2111_v61, 4  ;;  %v2821_v5 = vld [vmem:[#allocation3 + $0x68] sm:$0xf] }
 0x16d   :  { %v2885_v1 = vrot.slane %v2884_v50, 4  ;;  %v2116_v9 = vrot.slane %v2114_v36, 5  ;;  %v2122_v24 = vrot.slane %v2120_v37, 5  ;;  %8164 = vmatprep.mubr.msk.bf16.mxu1 %vm1070_vm14, %v7393_v56  ;;  %v2892_v22 = vshrl.u32 %v2811_v8, 16 }
 0x16e   :  { %v2103_v27 = vor.u32 %v2102_v6, %v2099_v42  ;;  %v2895_v34 = vshll.u32 %v2811_v8, 16  ;;  %v2901_v48 = vshll.u32 %v9613_v47, 16  ;;  %v2906_v43 = vshrl.u32 %v2813_v16, 16 }
 0x16f   :  { %v2890_v31 = vsel %vm8933_vm11, %v2885_v1, %v2889_v53  ;;  %v2117_v45 = vor.u32 %v2116_v9, %v2113_v29  ;;  %v2909_v0 = vshll.u32 %v2813_v16, 16  ;;  %v2894_v28 = vrot.slane %v2892_v22, 4  ;;  %v9649_v22 = vld [vmem:[#allocation3 + $0x74] sm:$0x1] }
 0x170   :  { %v7470_v58 = vcombine.low %v2876_v14, %v2890_v31  ;;  %v2104_v54 = vrot.slane %v2103_v27, 4  ;;  %v2897_v40 = vrot.slane %v2895_v34, 5  ;;  %v2903_v33 = vrot.slane %v2901_v48, 5  ;;  %v2823_v14 = vld [vmem:[#allocation3 + $0x70] sm:$0xf] }
 0x171   :  { %v2118_v38 = vrot.slane %v2117_v45, 4  ;;  %v2908_v55 = vrot.slane %v2906_v43, 4  ;;  %v2911_v25 = vrot.slane %v2909_v0, 5  ;;  %v2915_v3 = vshll.u32 %v9618_v63, 16  ;;  %v2825_v45 = vld [vmem:[#allocation3 + $0x78] sm:$0xf] }
 0x172   :  { %8213 = vmatmul.mubr.msk.bf16.vlgmr.msra.gmra.mxu0 %vm1070_vm14, %v7470_v58  ;;  %v2109_v44 = vsel %vm8933_vm11, %v2104_v54, %v2108_v41  ;;  %v2898_v10 = vor.u32 %v2897_v40, %v2894_v28  ;;  %v127_v7 = vsel %vm8753_vm4, 0, %v126_v4  ;;  %v189_v18 = vsel %vm8761_vm5, 0, %v188_v20  ;;  %v8512_v20 = vld [vmem:[#allocation3 + $0x20] ss:$8 sps:$4 sm:$0xff]  }
 0x173   :  { %v2123_v13 = vsel %vm8933_vm11, %v2118_v38, %v2122_v24  ;;  %v2912_v35 = vor.u32 %v2911_v25, %v2908_v55  ;;  %128 = vst [vmem:[#allocation3 + $0x48] sm:$0x1] %v127_v7  ;;  %v2920_v59 = vshrl.u32 %v2815_v11, 16  ;;  %v2917_v53 = vrot.slane %v2915_v3, 5  ;;  %190 = vst [vmem:[#allocation3 + $0x4c] sm:$0x1] %v189_v18 }
 0x174   :  { %v7394_v26 = vcombine.low %v2109_v44, %v2123_v13  ;;  %v2899_v39 = vrot.slane %v2898_v10, 4  ;;  %v2923_v42 = vshll.u32 %v2815_v11, 16  ;;  %v2929_v61 = vshll.u32 %v9629_v49, 16  ;;  %v9647_v24 = vld [vmem:[#allocation3 + $0x6c] sm:$0x1]  ;;  %v8516_v40 = vld [vmem:[%s11296_s5 + $0x80] sm:$0xff]  }
 0x175   :  { %v2913_v46 = vrot.slane %v2912_v35, 4  ;;  %v2922_v17 = vrot.slane %v2920_v59, 4  ;;  %v2948_v50 = vshrl.u32 %v2819_v12, 16  ;;  %v2951_v8 = vshll.u32 %v2819_v12, 16  ;;  %v8513_v25 = vld [vmem:[#allocation3 + $0x30] ss:$8 sps:$4 sm:$0xff]  }
 0x176   :  { %8165 = vmatmul.mubr.msk.bf16.gmra.mxu1 %vm1070_vm14, %v7394_v26  ;;  %v2904_v36 = vsel %vm8933_vm11, %v2899_v39, %v2903_v33  ;;  %v2925_v37 = vrot.slane %v2923_v42, 5  ;;  %v2957_v56 = vshll.u32 %v9636_v32, 16  ;;  %v2962_v16 = vshrl.u32 %v2821_v5, 16  ;;  %v2827_v59 = vld [vmem:[#allocation3 + $0x80] sm:$0xf] }
 0x177   :  { %v2918_v6 = vsel %vm8933_vm11, %v2913_v46, %v2917_v53  ;;  %8192 = vmatprep.mubr.msk.bf16.mxu1 %vm1070_vm14, %v8510_v15  ;;  %v2950_v41 = vrot.slane %v2948_v50, 4  ;;  %v9645_v9 = vrot.slane %v2929_v61, 5  ;;  %v2953_v27 = vrot.slane %v2951_v8, 5  ;;  %v9671_v8 = vld [vmem:[#allocation3 + $0x84] sm:$0x1] }
 0x178   :  { %v7471_v1 = vcombine.low %v2904_v36, %v2918_v6  ;;  %v2926_v29 = vor.u32 %v2925_v37, %v2922_v17  ;;  %v2964_v34 = vrot.slane %v2962_v16, 4  ;;  %v2965_v48 = vshll.u32 %v2821_v5, 16  ;;  %v9668_v17 = vld [vmem:[#allocation3 + $0x7c] sm:$0x1] }
 0x179   :  { %v2971_v31 = vshll.u32 %v9647_v24, 16  ;;  %v2976_v43 = vshrl.u32 %v2823_v14, 16  ;;  %v2954_v58 = vor.u32 %v2953_v27, %v2950_v41  ;;  %v2959_v54 = vrot.slane %v2957_v56, 5  ;;  %v2829_v56 = vld [vmem:[#allocation3 + $0x88] sm:$0xf] }
 0x17a   :  { %8216 = vmatprep.mubr.msk.bf16.mxu0 %vm1070_vm14, %v7471_v1  ;;  %v2817_v0 = vld [vmem:[#allocation3 + $0x48] sm:$0xf]  ;;  %v2927_v4 = vrot.slane %v2926_v29, 4  ;;  %v2979_v28 = vshll.u32 %v2823_v14, 16  ;;  %v9656_v11 = vld [vmem:[#allocation3 + $0x4c] sm:$0x1] }
 0x17b   :  { %v2934_v38 = vshrl.u32 %v2817_v0, 16  ;;  %v2937_v33 = vshll.u32 %v2817_v0, 16  ;;  %v2967_v55 = vrot.slane %v2965_v48, 5  ;;  %v2985_v44 = vshll.u32 %v9649_v22, 16  ;;  %v156_v29 = vld [vmem:[#allocation3 + $0x98] sm:$0x1] }
 0x17c   :  { %v2943_v10 = vshll.u32 %v9656_v11, 16  ;;  %v2955_v3 = vrot.slane %v2954_v58, 4  ;;  %v2973_v7 = vrot.slane %v2971_v31, 5  ;;  %v2978_v12 = vrot.slane %v2976_v43, 4  ;;  %v9677_v0 = vld [vmem:[#allocation3 + $0x8c] sm:$0x1] }
 0x17d   :  { %v2936_v13 = vrot.slane %v2934_v38, 4  ;;  %v2939_v35 = vrot.slane %v2937_v33, 5  ;;  %v2968_v15 = vor.u32 %v2967_v55, %v2964_v34  ;;  %v2981_v18 = vrot.slane %v2979_v28, 5  ;;  %v2831_v55 = vld [vmem:[#allocation3 + $0x90] sm:$0xf] }
 0x17e   :  { %v2932_v26 = vsel %vm8933_vm11, %v2927_v4, %v9645_v9  ;;  %v2945_v39 = vrot.slane %v2943_v10, 5  ;;  %8193 = vmatmul.mubr.msk.bf16.vlgmr.msra.gmra.mxu1 %vm1070_vm14, %v8512_v20  ;;  %v2960_v53 = vsel %vm8933_vm11, %v2955_v3, %v2959_v54  ;;  %v2990_v42 = vshrl.u32 %v2825_v45, 16  ;;  %v218_v20 = vld [vmem:[#allocation3 + $0x9c] sm:$0x1]  ;;  %v8514_v54 = vld [vmem:[#allocation3 + $0x40] ss:$8 sps:$4 sm:$0xff]  }
 0x17f   :  { %v2940_v5 = vor.u32 %v2939_v35, %v2936_v13  ;;  %v2969_v46 = vrot.slane %v2968_v15, 4  ;;  %8229 = vmatpush3.bf16.msra.mxu1 %v9568_v2  ;;  %8196 = vmatprep.mubr.msk.bf16.mxu1 %vm1070_vm14, %v8513_v25  ;;  %v2982_v61 = vor.u32 %v2981_v18, %v2978_v12  ;;  %v2993_v50 = vshll.u32 %v2825_v45, 16  ;;  %v8515_v3 = vld [vmem:[#allocation3 + $0x60] ss:$8 sps:$4 sm:$0xff]  }
 0x180   :  { %v2992_v36 = vrot.slane %v2990_v42, 4  ;;  %v2999_v37 = vshll.u32 %v9668_v17, 16  ;;  %v3004_v14 = vshrl.u32 %v2827_v59, 16  ;;  %v3007_v6 = vshll.u32 %v2827_v59, 16  ;;  %8230 = vmatprep.subr.bf16.mxu1 %v8516_v40 }
 0x181   :  { %v2941_v41 = vrot.slane %v2940_v5, 4  ;;  %v2974_v16 = vsel %vm8933_vm11, %v2969_v46, %v2973_v7  ;;  %v2987_v2 = vrot.slane %v2985_v44, 5  ;;  %v2995_v1 = vrot.slane %v2993_v50, 5 }
 0x182   :  { %v7473_v9 = vcombine.low %v2960_v53, %v2974_v16  ;;  %v2983_v27 = vrot.slane %v2982_v61, 4  ;;  %v3006_v34 = vrot.slane %v3004_v14, 4  ;;  %v3009_v48 = vrot.slane %v3007_v6, 5  ;;  %v9695_v61 = vld [vmem:[#allocation3 + $0x94] sm:$0x1] }
 0x183   :  { %v2946_v31 = vsel %vm8933_vm11, %v2941_v41, %v2945_v39  ;;  %v2996_v45 = vor.u32 %v2995_v1, %v2992_v36  ;;  %v3001_v43 = vrot.slane %v2999_v37, 5  ;;  %v3013_v4 = vshll.u32 %v9671_v8, 16  ;;  %8231 = vmatpush3.bf16.msra.mxu1 %v8516_v40  ;;  %v3237_v36 = vld [vmem:[#allocation3 + $0x10] sm:$0xe]  ;;  %v3238_v41 = vld [vmem:[#allocation3 + $0x18] sm:$0xe] }
 0x184   :  { %v7472_v58 = vcombine.low %v2932_v26, %v2946_v31  ;;  %v3010_v28 = vor.u32 %v3009_v48, %v3006_v34  ;;  %v3018_v38 = vshrl.u32 %v2829_v56, 16  ;;  %v3021_v33 = vshll.u32 %v2829_v56, 16  ;;  %v8517_v6 = vld [vmem:[#allocation3 + $0x70] ss:$8 sps:$4 sm:$0xff]   ;;  %v8518_v1 = vld [vmem:[#allocation3 + $0x80] ss:$8 sps:$4 sm:$0xff]  }
 0x185   :  { %v2997_v25 = vrot.slane %v2996_v45, 4  ;;  %v3015_v44 = vrot.slane %v3013_v4, 5  ;;  %v3027_v10 = vshll.u32 %v9677_v0, 16  ;;  %v157_v7 = vsel %vm8753_vm4, 0, %v156_v29 }
 0x186   :  { %8217 = vmatmul.mubr.msk.bf16.gmra.mxu0 %vm1070_vm14, %v7472_v58  ;;  %8197 = vmatmul.mubr.msk.bf16.gmra.mxu1 %vm1070_vm14, %v8514_v54  ;;  %v3011_v12 = vrot.slane %v3010_v28, 4  ;;  %v3020_v40 = vrot.slane %v3018_v38, 4  ;;  %v3023_v13 = vrot.slane %v3021_v33, 5  ;;  %158 = vst [vmem:[#allocation3 + $0x98] sm:$0x1] %v157_v7  ;;  %v219_v35 = vsel %vm8761_vm5, 0, %v218_v20 }
 0x187   :  { %8220 = vmatprep.mubr.msk.bf16.mxu0 %vm1070_vm14, %v7473_v9  ;;  %8200 = vmatprep.mubr.msk.bf16.mxu1 %vm1070_vm14, %v8515_v3  ;;  %220 = vst [vmem:[#allocation3 + $0x9c] sm:$0x1] %v219_v35  ;;  %v3032_v15 = vshrl.u32 %v2831_v55, 16  ;;  %v3035_v18 = vshll.u32 %v2831_v55, 16  ;;  %v3029_v26 = vrot.slane %v3027_v10, 5  ;;  %v2988_v39 = vsel %vm8933_vm11, %v2983_v27, %v2987_v2 }
 0x188   :  { %v3024_v59 = vor.u32 %v3023_v13, %v3020_v40  ;;  %v3002_v53 = vsel %vm8933_vm11, %v2997_v25, %v3001_v43  ;;  %v3016_v23 = vsel %vm8933_vm11, %v3011_v12, %v3015_v44  ;;  %v3041_v50 = vshll.u32 %v9695_v61, 16  ;;  %v3240_v55 = vld [vmem:[#allocation3 + $0x28] sm:$0xe]  ;;  %v3239_v7 = vld [vmem:[#allocation3 + $0x20] sm:$0xe] }
 0x189   :  { %v3034_v42 = vrot.slane %v3032_v15, 4  ;;  %v3037_v5 = vrot.slane %v3035_v18, 5  ;;  %v7474_v37 = vcombine.low %v2988_v39, %v3002_v53  ;;  %v7487_v34 = vrot.slane %v3237_v36, 9  ;;  %v3242_v13 = vld [vmem:[#allocation3 + $0x38] sm:$0xe] }
 0x18a   :  { %v3025_v46 = vrot.slane %v3024_v59, 4  ;;  %v3287_v48 = vrot.slane %v9574_v57, 5  ;;  %v3043_v31 = vrot.slane %v3041_v50, 5  ;;  %v7488_v43 = vrot.slane %v3238_v41, 9  ;;  %v3241_v57 = vld [vmem:[#allocation3 + $0x30] sm:$0xe] }
 0x18b   :  { %v3038_v14 = vor.u32 %v3037_v5, %v3034_v42  ;;  %v3291_v54 = vrot.slane %v9582_v52, 5  ;;  %v7490_v40 = vrot.slane %v3240_v55, 9  ;;  %v3299_v52 = vrot.slane %v9602_v60, 5  ;;  %v3243_v5 = vld [vmem:[#allocation3 + $0x40] sm:$0xe] }
 0x18c   :  { %v3030_v56 = vsel %vm8933_vm11, %v3025_v46, %v3029_v26  ;;  %v3288_v33 = vsel %vm8944_vm12, %v7487_v34, %v3287_v48  ;;  %v7491_v15 = vrot.slane %v3241_v57, 9  ;;  %v3303_v18 = vrot.slane %v9613_v47, 5  ;;  %v3244_v46 = vld [vmem:[#allocation3 + $0x48] sm:$0xe]  ;;  %v3245_v50 = vld [vmem:[#allocation3 + $0x60] sm:$0xe] }
 0x18d   :  { %v7475_v16 = vcombine.low %v3016_v23, %v3030_v56  ;;  %v2833_v2 = vld [vmem:[#allocation3 + $0x98] sm:$0xf]  ;;  %v3039_v4 = vrot.slane %v3038_v14, 4  ;;  %v3292_v3 = vsel %vm8944_vm12, %v7488_v43, %v3291_v54  ;;  %v7489_v26 = vrot.slane %v3239_v7, 9  ;;  %v3246_v36 = vld [vmem:[#allocation3 + $0x68] sm:$0xe] }
 0x18e   :  { %8221 = vmatmul.mubr.msk.bf16.gmra.mxu0 %vm1070_vm14, %v7474_v37  ;;  %v9701_v29 = vld [vmem:[#allocation3 + $0x9c] sm:$0x1]  ;;  %v3046_v9 = vshrl.u32 %v2833_v2, 16  ;;  %v3049_v27 = vshll.u32 %v2833_v2, 16  ;;  %8201 = vmatmul.mubr.msk.bf16.gmra.mxu1 %vm1070_vm14, %v8517_v6  ;;  %v8519_v10 = vld [vmem:[#allocation3 + $0x90] ss:$8 sps:$4 sm:$0xff]   ;;  %v7507_v12 = vcombine.low %v3288_v33, %v3292_v3  ;;  %v3300_v60 = vsel %vm8944_vm12, %v7490_v40, %v3299_v52 }
 0x18f   :  { %8224 = vmatprep.mubr.msk.bf16.mxu0 %vm1070_vm14, %v7475_v16  ;;  %v3055_v45 = vshll.u32 %v9701_v29, 16  ;;  %8204 = vmatprep.mubr.msk.bf16.mxu1 %vm1070_vm14, %v8518_v1  ;;  %v3044_v25 = vsel %vm8933_vm11, %v3039_v4, %v3043_v31  ;;  %v3295_v39 = vrot.slane %v9594_v62, 5  ;;  %v7492_v53 = vrot.slane %v3242_v13, 9  ;;  %v3248_v31 = vld [vmem:[#allocation3 + $0x78] sm:$0xe] }
 0x190   :  { %v3048_v20 = vrot.slane %v3046_v9, 4  ;;  %v3051_v58 = vrot.slane %v3049_v27, 5  ;;  %v3307_v42 = vrot.slane %v9618_v63, 5  ;;  %v3304_v23 = vsel %vm8944_vm12, %v7491_v15, %v3303_v18 }
 0x191   :  { %v3057_v38 = vrot.slane %v3055_v45, 5  ;;  %v3296_v47 = vsel %vm8944_vm12, %v7489_v26, %v3295_v39  ;;  %v7493_v63 = vrot.slane %v3243_v5, 9  ;;  %v3311_v14 = vrot.slane %v9629_v49, 5  ;;  %v3247_v49 = vld [vmem:[#allocation3 + $0x70] sm:$0xe] }
 0x192   :  { %v3052_v28 = vor.u32 %v3051_v58, %v3048_v20  ;;  %v7508_v37 = vcombine.low %v3296_v47, %v3300_v60  ;;  %v3308_v62 = vsel %vm8944_vm12, %v7492_v53, %v3307_v42  ;;  %v7494_v6 = vrot.slane %v3244_v46, 9  ;;  %v3250_v45 = vld [vmem:[#allocation3 + $0x88] sm:$0xe] }
 0x193   :  { %v7509_v56 = vcombine.low %v3304_v23, %v3308_v62  ;;  %v3315_v41 = vrot.slane %v9656_v11, 5  ;;  %v7495_v16 = vrot.slane %v3245_v50, 9  ;;  %v3319_v2 = vrot.slane %v9636_v32, 5  ;;  %v3249_v32 = vld [vmem:[#allocation3 + $0x80] sm:$0xe] }
 0x194   :  { %v3053_v44 = vrot.slane %v3052_v28, 4  ;;  %v7496_v1 = vrot.slane %v3246_v36, 9  ;;  %v3323_v9 = vrot.slane %v9647_v24, 5  ;;  %v3312_v27 = vsel %vm8944_vm12, %v7493_v63, %v3311_v14 }
 0x195   :  { %v3316_v34 = vsel %vm8944_vm12, %v7494_v6, %v3315_v41  ;;  %v3320_v11 = vsel %vm8944_vm12, %v7495_v16, %v3319_v2  ;;  %v7497_v24 = vrot.slane %v3247_v49, 9  ;;  %v3327_v20 = vrot.slane %v9649_v22, 5  ;;  %v3251_v22 = vld [vmem:[#allocation3 + $0x90] sm:$0xe] }
 0x196   :  { %v3058_v35 = vsel %vm8933_vm11, %v3053_v44, %v3057_v38  ;;  %8205 = vmatmul.mubr.msk.bf16.gmra.mxu1 %vm1070_vm14, %v8519_v10  ;;  %v3324_v48 = vsel %vm8944_vm12, %v7496_v1, %v3323_v9  ;;  %v7510_v43 = vcombine.low %v3312_v27, %v3316_v34  ;;  %v7498_v58 = vrot.slane %v3248_v31, 9  ;;  %v3252_v10 = vld [vmem:[#allocation3 + $0x98] sm:$0xe] }
 0x197   :  { %v7476_v59 = vcombine.low %v3044_v25, %v3058_v35  ;;  %8232 = vmatprep.mubr.msk.bf16.mxu1 %vm1070_vm14, %v7507_v12  ;;  %v7511_v4 = vcombine.low %v3320_v11, %v3324_v48  ;;  %v3331_v54 = vrot.slane %v9668_v17, 5  ;;  %v7499_v28 = vrot.slane %v3249_v32, 9 }
 0x198   :  { %v3335_v38 = vrot.slane %v9671_v8, 5  ;;  %v7500_v33 = vrot.slane %v3250_v45, 9  ;;  %v3339_v55 = vrot.slane %v9677_v0, 5  ;;  %v3328_v57 = vsel %vm8944_vm12, %v7497_v24, %v3327_v20 }
 0x199   :  { %8225 = vmatmul.mubr.msk.bf16.gmra.mxu0 %vm1070_vm14, %v7476_v59  ;;  %v3332_v25 = vsel %vm8944_vm12, %v7498_v58, %v3331_v54  ;;  %v7501_v3 = vrot.slane %v3251_v22, 9  ;;  %v3343_v0 = vrot.slane %v9695_v61, 5  ;;  %v7502_v12 = vrot.slane %v3252_v10, 9 }
 0x19a   :  { %v3336_v17 = vsel %vm8944_vm12, %v7499_v28, %v3335_v38  ;;  %v3340_v44 = vsel %vm8944_vm12, %v7500_v33, %v3339_v55  ;;  %v7512_v8 = vcombine.low %v3328_v57, %v3332_v25  ;;  %v3347_v40 = vrot.slane %v9701_v29, 5 }
 0x19b   :  { %v7513_v7 = vcombine.low %v3336_v17, %v3340_v44  ;;  %v3344_v52 = vsel %vm8944_vm12, %v7501_v3, %v3343_v0 }
 0x19c   :  { %v3348_v13 = vsel %vm8944_vm12, %v7502_v12, %v3347_v40 }
 0x19d   :  { %v7514_v35 = vcombine.low %v3344_v52, %v3348_v13 }
 0x19e   :  { %8233 = vmatmul.mubr.msk.bf16.vlgmr.msra.gmra.mxu1 %vm1070_vm14, %v7508_v37 }
 0x19f   :  { %8236 = vmatprep.mubr.msk.bf16.mxu1 %vm1070_vm14, %v7509_v56 }
 0x1a6   :  { %8237 = vmatmul.mubr.msk.bf16.gmra.mxu1 %vm1070_vm14, %v7510_v43 }
 0x1a7   :  { %8240 = vmatprep.mubr.msk.bf16.mxu1 %vm1070_vm14, %v7511_v4 }
 0x1ae   :  { %8241 = vmatmul.mubr.msk.bf16.gmra.mxu1 %vm1070_vm14, %v7512_v8 }
 0x1af   :  { %8244 = vmatprep.mubr.msk.bf16.mxu1 %vm1070_vm14, %v7513_v7 }
 0x1b6   :  { %8245 = vmatmul.mubr.msk.bf16.gmra.mxu1 %vm1070_vm14, %v7514_v35 }
 0x1bd   :  { %v8094_v15 = vpop.f32.mrf.mxu0 }
 0x1bf   :  { %v1302_v18 = vpop.f32.mrf.mxu0 }
 0x1c1   :  { %v8095_v59 = vpop.f32.mrf.mxu0 }
 0x1c3   :  { %v9769_v61 = vpop.f32.mrf.mxu0 }
 0x1ce   :  { %v8098_v26 = vpop.f32.mrf.mxu0 }
 0x1d0   :  { %v1318_v29 = vpop.f32.mrf.mxu0 }
 0x1d2   :  { %v8074_v39 = vpop.f32.mrf.mxu1  ;;  %v8099_v53 = vpop.f32.mrf.mxu0 }
 0x1d3   :  { %v1311_v42 = vadd.f32 %v8094_v15, %v8074_v39 }
 0x1d4   :  { %v1129_v60 = vpop.f32.mrf.mxu1  ;;  %v9771_v5 = vpop.f32.mrf.mxu0 }
 0x1d5   :  { %v1303_v23 = vadd.f32 %v1302_v18, %v1129_v60 }
 0x1d6   :  { %v8075_v46 = vpop.f32.mrf.mxu1  ;;  %v8102_v47 = vpop.f32.mrf.mxu0 }
 0x1d7   :  { %v1314_v50 = vadd.f32 %v8095_v59, %v8075_v46 }
 0x1d8   :  { %v9773_v36 = vpop.f32.mrf.mxu1  ;;  %v1334_v37 = vpop.f32.mrf.mxu0 }
 0x1da   :  { %v8103_v62 = vpop.f32.mrf.mxu0 }
 0x1dc   :  { %v8078_v63 = vpop.f32.mrf.mxu1  ;;  %v9775_v56 = vpop.f32.mrf.mxu0 }
 0x1dd   :  { %v1327_v14 = vadd.f32 %v8098_v26, %v8078_v63 }
 0x1de   :  { %v1145_v6 = vpop.f32.mrf.mxu1  ;;  %v8106_v41 = vpop.f32.mrf.mxu0 }
 0x1df   :  { %v1319_v16 = vadd.f32 %v1318_v29, %v1145_v6 }
 0x1e0   :  { %v8079_v2 = vpop.f32.mrf.mxu1  ;;  %v1350_v1 = vpop.f32.mrf.mxu0 }
 0x1e1   :  { %v1330_v9 = vadd.f32 %v8099_v53, %v8079_v2 }
 0x1e2   :  { %v9777_v27 = vpop.f32.mrf.mxu1  ;;  %v8107_v34 = vpop.f32.mrf.mxu0 }
 0x1e4   :  { %v8082_v49 = vpop.f32.mrf.mxu1  ;;  %v9779_v11 = vpop.f32.mrf.mxu0 }
 0x1e5   :  { %11329 = vst [vmem:[#allocation11_spill] sm:$0xff] %v9779_v11  ;;  %v1343_v48 = vadd.f32 %v8102_v47, %v8082_v49 }
 0x1e6   :  { %v1161_v31 = vpop.f32.mrf.mxu1  ;;  %v9781_v32 = vpop.f32.mrf.mxu0 }
 0x1e7   :  { %v1335_v45 = vadd.f32 %v1334_v37, %v1161_v31 }
 0x1e8   :  { %v8083_v43 = vpop.f32.mrf.mxu1  ;;  %v9783_v24 = vpop.f32.mrf.mxu0 }
 0x1e9   :  { %v1346_v4 = vadd.f32 %v8103_v62, %v8083_v43 }
 0x1ea   :  { %v9785_v20 = vpop.f32.mrf.mxu1  ;;  %v9787_v58 = vpop.f32.mrf.mxu0 }
 0x1ec   :  { %v8086_v54 = vpop.f32.mrf.mxu1  ;;  %v9789_v28 = vpop.f32.mrf.mxu0 }
 0x1ed   :  { %v1359_v38 = vadd.f32 %v8106_v41, %v8086_v54 }
 0x1ee   :  { %v1177_v33 = vpop.f32.mrf.mxu1  ;;  %v9791_v55 = vpop.f32.mrf.mxu0 }
 0x1ef   :  { %v1351_v57 = vadd.f32 %v1350_v1, %v1177_v33 }
 0x1f0   :  { %v8087_v25 = vpop.f32.mrf.mxu1  ;;  %v9793_v22 = vpop.f32.mrf.mxu0 }
 0x1f1   :  { %v1362_v17 = vadd.f32 %v8107_v34, %v8087_v25 }
 0x1f2   :  { %v9795_v44 = vpop.f32.mrf.mxu1  ;;  %v9797_v10 = vpop.f32.mrf.mxu0 }
 0x1f3   :  { %11330 = vst [vmem:[#allocation12_spill] sm:$0xff] %v9795_v44 }
 0x1f4   :  { %v8114_v8 = vpop.f32.mrf.mxu1  ;;  %v9799_v3 = vpop.f32.mrf.mxu0 }
 0x1f5   :  { %v9801_v7 = vadd.f32 %v8114_v8, %v1311_v42 }
 0x1f6   :  { %v1579_v0 = vpop.f32.mrf.mxu1  ;;  %v9803_v12 = vpop.f32.mrf.mxu0 }
 0x1f7   :  { %v9805_v40 = vadd.f32 %v1579_v0, %v1303_v23  ;;  %v1854_v11 = vadd.f32 %v9781_v32, %v9801_v7 }
 0x1f8   :  { %v8115_v52 = vpop.f32.mrf.mxu1  ;;  %v9807_v13 = vpop.f32.mrf.mxu0 }
 0x1f9   :  { %v9809_v35 = vadd.f32 %v8115_v52, %v1314_v50 }
 0x1fa   :  { %v9811_v15 = vpop.f32.mrf.mxu1  ;;  %v9813_v18 = vpop.f32.mrf.mxu0 }
 0x1fb   :  { %11331 = vst [vmem:[#allocation13_spill] sm:$0xff] %v9813_v18 }
 0x1fc   :  { %v8118_v59 = vpop.f32.mrf.mxu1  ;;  %v9815_v26 = vpop.f32.mrf.mxu0 }
 0x1fd   :  { %v9817_v29 = vadd.f32 %v8118_v59, %v1327_v14  ;;  %v8520_v14 = vld [vmem:[%s11300_s9 + $0x8] ss:$0 sps:$4 sm:$0xff]  }
 0x1fe   :  { %v1595_v39 = vpop.f32.mrf.mxu1  ;;  %v9819_v53 = vpop.f32.mrf.mxu0  ;;  %8470 = vmatprep.subr.msk.bf16.mxu0 %vm3761_vm15, %v8520_v14  ;;  %v3763_v2 = vsel %vm3761_vm15, %v8520_v14, 0 }
 0x1ff   :  { %11332 = vst [vmem:[#allocation14_spill] sm:$0xff] %v9819_v53  ;;  %v9821_v42 = vadd.f32 %v1595_v39, %v1319_v16  ;;  %8249 = vmatpush3.bf16.msra.mxu0 %v3763_v2 }
 0x200   :  { %v8119_v60 = vpop.f32.mrf.mxu1  ;;  %v9823_v23 = vpop.f32.mrf.mxu0 }
 0x201   :  { %11333 = vst [vmem:[#allocation15_spill] sm:$0xff] %v9823_v23  ;;  %v9825_v46 = vadd.f32 %v8119_v60, %v1330_v9 }
 0x202   :  { %v9827_v47 = vpop.f32.mrf.mxu1  ;;  %v9829_v50 = vpop.f32.mrf.mxu0 }
 0x203   :  { %11334 = vst [vmem:[#allocation16_spill] sm:$0xff] %v9829_v50 }
 0x204   :  { %v8122_v37 = vpop.f32.mrf.mxu1  ;;  %v9831_v62 = vpop.f32.mrf.mxu0 }
 0x205   :  { %11335 = vst [vmem:[#allocation17_spill] sm:$0xff] %v9831_v62  ;;  %v9833_v63 = vadd.f32 %v8122_v37, %v1343_v48 }
 0x206   :  { %v1611_v6 = vpop.f32.mrf.mxu1  ;;  %v9838_v41 = vpop.f32.mrf.mxu0 }
 0x207   :  { %v9840_v16 = vadd.f32 %v1611_v6, %v1335_v45 }
 0x208   :  { %v8123_v1 = vpop.f32.mrf.mxu1  ;;  %v9842_v9 = vpop.f32.mrf.mxu0 }
 0x209   :  { %v9844_v34 = vadd.f32 %v8123_v1, %v1346_v4 }
 0x20a   :  { %v9846_v49 = vpop.f32.mrf.mxu1  ;;  %v9848_v48 = vpop.f32.mrf.mxu0 }
 0x20b   :  { %11336 = vst [vmem:[#allocation18_spill] sm:$0xff] %v9844_v34  ;;  %v1306_v34 = vadd.f32 %v9769_v61, %v9773_v36 }
 0x20c   :  { %v8126_v31 = vpop.f32.mrf.mxu1  ;;  %v9850_v43 = vpop.f32.mrf.mxu0 }
 0x20d   :  { %v9852_v54 = vadd.f32 %v8126_v31, %v1359_v38 }
 0x20e   :  { %v1627_v33 = vpop.f32.mrf.mxu1  ;;  %v9854_v45 = vpop.f32.mrf.mxu0 }
 0x20f   :  { %11337 = vst [vmem:[#allocation19_spill] sm:$0xff] %v9852_v54  ;;  %v9856_v25 = vadd.f32 %v1627_v33, %v1351_v57 }
 0x210   :  { %v8127_v8 = vpop.f32.mrf.mxu1  ;;  %v9862_v4 = vpop.f32.mrf.mxu0 }
 0x211   :  { %11338 = vst [vmem:[#allocation20_spill] sm:$0xff] %v9856_v25  ;;  %v9858_v0 = vadd.f32 %v8127_v8, %v1362_v17 }
 0x212   :  { %v9860_v52 = vpop.f32.mrf.mxu1  ;;  %v9864_v60 = vpop.f32.mrf.mxu0 }
 0x213   :  { %11339 = vst [vmem:[#allocation21_spill] sm:$0xff] %v9858_v0  ;;  %11340 = vst [vmem:[#allocation22_spill] sm:$0xff] %v9860_v52 }
 0x214   :  { %v8154_v59 = vpop.f32.mrf.mxu1  ;;  %11341 = vst [vmem:[#allocation23_spill] sm:$0xff] %v9864_v60  ;;  %v9866_v14 = vpop.f32.mrf.mxu0 }
 0x215   :  { %v2288_v60 = vadd.f32 %v8154_v59, %v1854_v11  ;;  %v1322_v11 = vadd.f32 %v9771_v5, %v9777_v27 }
 0x216   :  { %v2223_v39 = vpop.f32.mrf.mxu1  ;;  %v9870_v2 = vpop.f32.mrf.mxu0 }
 0x217   :  { %11342 = vst [vmem:[#allocation24_spill] sm:$0xff] %v9870_v2 }
 0x218   :  { %v8155_v37 = vpop.f32.mrf.mxu1  ;;  %v9874_v17 = vpop.f32.mrf.mxu0 }
 0x219   :  { %11343 = vst [vmem:[#allocation25_spill] sm:$0xff] %v9874_v17 }
 0x21a   :  { %v2226_v38 = vpop.f32.mrf.mxu1  ;;  %v9878_v33 = vpop.f32.mrf.mxu0 }
 0x21b   :  { %11344 = vst [vmem:[#allocation26_spill] sm:$0xff] %v9878_v33 }
 0x21c   :  { %v9868_v6 = vpop.f32.mrf.mxu1  ;;  %v9882_v19 = vpop.f32.mrf.mxu0 }
 0x21d   :  { %11346 = vst [vmem:[#allocation28_spill] sm:$0xff] %v9882_v19 }
 0x21e   :  { %v2239_v57 = vpop.f32.mrf.mxu1  ;;  %v9886_v30 = vpop.f32.mrf.mxu0 }
 0x21f   :  { %11347 = vst [vmem:[#allocation29_spill] sm:$0xff] %v9886_v30 }
 0x220   :  { %v9872_v1 = vpop.f32.mrf.mxu1  ;;  %v9890_v50 = vpop.f32.mrf.mxu0 }
 0x221   :  { %11349 = vst [vmem:[#allocation31_spill] sm:$0xff] %v9890_v50 }
 0x222   :  { %v9876_v31 = vpop.f32.mrf.mxu1  ;;  %v9894_v62 = vpop.f32.mrf.mxu0 }
 0x223   :  { %11351 = vst [vmem:[#allocation33_spill] sm:$0xff] %v9894_v62 }
 0x224   :  { %v9880_v8 = vpop.f32.mrf.mxu1  ;;  %v9900_v33 = vpop.f32.mrf.mxu0 }
 0x225   :  { %11345 = vst [vmem:[#allocation27_spill] sm:$0xff] %v9880_v8  ;;  %11354 = vst [vmem:[#allocation36_spill] sm:$0xff] %v9900_v33 }
 0x226   :  { %v9884_v51 = vpop.f32.mrf.mxu1 }
 0x228   :  { %v9888_v21 = vpop.f32.mrf.mxu1 }
 0x229   :  { %11348 = vst [vmem:[#allocation30_spill] sm:$0xff] %v9888_v21 }
 0x22a   :  { %v9892_v0 = vpop.f32.mrf.mxu1 }
 0x22b   :  { %11350 = vst [vmem:[#allocation32_spill] sm:$0xff] %v9892_v0 }
 0x232   :  { %v8214_v23 = vpop.f32.mrf.mxu0 }
 0x234   :  { %v3158_v21 = vpop.f32.mrf.mxu0 }
 0x236   :  { %v9896_v53 = vpop.f32.mrf.mxu1  ;;  %v8215_v17 = vpop.f32.mrf.mxu0 }
 0x237   :  { %11352 = vst [vmem:[#allocation34_spill] sm:$0xff] %v9896_v53 }
 0x238   :  { %v9898_v54 = vpop.f32.mrf.mxu1  ;;  %v9910_v53 = vpop.f32.mrf.mxu0 }
 0x239   :  { %11353 = vst [vmem:[#allocation35_spill] sm:$0xff] %v9898_v54 }
 0x23a   :  { %v9902_v2 = vpop.f32.mrf.mxu1 }
 0x23b   :  { %11355 = vst [vmem:[#allocation37_spill] sm:$0xff] %v9902_v2 }
 0x23c   :  { %v9904_v19 = vpop.f32.mrf.mxu1 }
 0x23d   :  { %11356 = vst [vmem:[#allocation38_spill] sm:$0xff] %v9904_v19 }
 0x23e   :  { %v8194_v30 = vpop.f32.mrf.mxu1 }
 0x240   :  { %v2724_v25 = vpop.f32.mrf.mxu1 }
 0x242   :  { %v8195_v52 = vpop.f32.mrf.mxu1 }
 0x244   :  { %v2727_v50 = vpop.f32.mrf.mxu1 }
 0x246   :  { %v9906_v0 = vpop.f32.mrf.mxu1  ;;  %v9916_v2 = vpop.f32.mrf.mxu0 }
 0x247   :  { %11359 = vst [vmem:[#allocation41_spill] sm:$0xff] %v9916_v2  ;;  %v1852_v2 = vadd.f32 %v9783_v24, %v9805_v40 }
 0x248   :  { %v9908_v62 = vpop.f32.mrf.mxu1  ;;  %v9926_v44 = vpop.f32.mrf.mxu0 }
 0x24a   :  { %v9912_v54 = vpop.f32.mrf.mxu1  ;;  %v9937_v61 = vpop.f32.mrf.mxu0 }
 0x24b   :  { %11357 = vst [vmem:[#allocation39_spill] sm:$0xff] %v9912_v54  ;;  %v1643_v54 = vadd.f32 %v9811_v15, %v1306_v34 }
 0x24c   :  { %v9914_v33 = vpop.f32.mrf.mxu1 }
 0x24d   :  { %11358 = vst [vmem:[#allocation40_spill] sm:$0xff] %v9914_v33  ;;  %v1853_v7 = vadd.f32 %v9789_v28, %v1643_v54  ;;  %v1647_v28 = vadd.f32 %v9827_v47, %v1322_v11  ;;  %v1858_v54 = vadd.f32 %v9791_v55, %v9817_v29  ;;  %v9970_v55 = vld [vmem:[%s11297_s6] ss:$0 sm:$0xff]  ;;  %s8589_s6 = smov 16  }
 0x24e   :  { %v9918_v19 = vpop.f32.mrf.mxu1 }
 0x24f   :  { %11360 = vst [vmem:[#allocation42_spill] sm:$0xff] %v9918_v19  ;;  %v2286_v19 = vadd.f32 %v2223_v39, %v1852_v2  ;;  %v2287_v24 = vadd.f32 %v2226_v38, %v1853_v7  ;;  %v1857_v29 = vadd.f32 %v9799_v3, %v1647_v28  ;;  %v11363_v7 = vld [vmem:[#allocation23_spill] sm:$0xff] }
 0x250   :  { %v9920_v18 = vpop.f32.mrf.mxu1 }
 0x251   :  { %11361 = vst [vmem:[#allocation43_spill] sm:$0xff] %v9920_v18  ;;  %v1855_v18 = vadd.f32 %v9787_v58, %v9809_v35  ;;  %v2576_v34 = vadd.f32 %v9842_v9, %v2286_v19  ;;  %v1856_v58 = vadd.f32 %v9793_v22, %v9821_v42  ;;  %v9950_v35 = vpop.f32.mrf.mxu0  ;;  %v8521_v19 = vld [vmem:[%s11300_s9] sm:$0xff]   ;;  %v2577_v22 = vadd.f32 %v9850_v43, %v2287_v24 }
 0x252   :  { %v9928_v8 = vpop.f32.mrf.mxu1  ;;  %v2292_v9 = vadd.f32 %v9868_v6, %v1858_v54  ;;  %8250 = vmatprep.subr.bf16.mxu0 %v8521_v19  ;;  %v1859_v43 = vadd.f32 %v9797_v10, %v9825_v46  ;;  %v2291_v38 = vadd.f32 %v9876_v31, %v1857_v29  ;;  %v11370_v54 = vld [vmem:[#allocation25_spill] sm:$0xff] }
 0x253   :  { %11362 = vst [vmem:[#allocation44_spill] sm:$0xff] %v9928_v8  ;;  %v2289_v32 = vadd.f32 %v8155_v37, %v1855_v18  ;;  %v2578_v8 = vadd.f32 %v9838_v41, %v2288_v60  ;;  %v2787_v18 = vadd.f32 %v2724_v25, %v2576_v34  ;;  %v2290_v5 = vadd.f32 %v2239_v57, %v1856_v58  ;;  %v9965_v47 = vpop.f32.mrf.mxu0  ;;  %v11366_v34 = vld [vmem:[#allocation12_spill] sm:$0xff]  ;;  %v11367_v58 = vld [vmem:[#allocation11_spill] sm:$0xff] }
 0x254   :  { %v9933_v33 = vpop.f32.mrf.mxu1  ;;  %8251 = vmatpush3.bf16.msra.mxu0 %v8521_v19  ;;  %v1354_v28 = vadd.f32 %v11367_v58, %v11366_v34 }
 0x255   :  { %v2789_v40 = vadd.f32 %v8194_v30, %v2578_v8  ;;  %v2579_v41 = vadd.f32 %v9848_v48, %v2289_v32  ;;  %v2788_v48 = vadd.f32 %v2727_v50, %v2577_v22  ;;  %v3221_v60 = vadd.f32 %v3158_v21, %v2787_v18  ;;  %v11368_v18 = vld [vmem:[#allocation18_spill] sm:$0xff] }
 0x256   :  { %v9939_v36 = vpop.f32.mrf.mxu1  ;;  %v2293_v21 = vadd.f32 %v9872_v1, %v1859_v43  ;;  %v1860_v50 = vadd.f32 %v9807_v13, %v9840_v16  ;;  %v11376_v43 = vld [vmem:[#allocation20_spill] sm:$0xff] }
 0x257   :  { %v2790_v30 = vadd.f32 %v8195_v52, %v2579_v41  ;;  %v3223_v42 = vadd.f32 %v8214_v23, %v2789_v40  ;;  %v1338_v23 = vadd.f32 %v9775_v56, %v9785_v20  ;;  %v2580_v52 = vadd.f32 %v9862_v4, %v2290_v5  ;;  %v3190_v20 = vpop.f32.mrf.mxu0 }
 0x258   :  { %v9943_v15 = vpop.f32.mrf.mxu1  ;;  %v2582_v56 = vadd.f32 %v9854_v45, %v2292_v9  ;;  %v2294_v1 = vadd.f32 %v9884_v51, %v1860_v50  ;;  %v2581_v45 = vadd.f32 %v9866_v14, %v2291_v38  ;;  %v2583_v11 = vadd.f32 %v11363_v7, %v2293_v21  ;;  %v11365_v51 = vld [vmem:[#allocation40_spill] sm:$0xff]  ;;  %v11385_v7 = vld [vmem:[#allocation34_spill] sm:$0xff] }
 0x259   :  { %v3224_v2 = vadd.f32 %v8215_v17, %v2790_v30  ;;  %v1651_v3 = vadd.f32 %v9846_v49, %v1338_v23  ;;  %v2791_v46 = vadd.f32 %v9908_v62, %v2580_v52  ;;  %v3222_v17 = vadd.f32 %v9910_v53, %v2788_v48  ;;  %v9997_v53 = vpop.f32.mrf.mxu0  ;;  %v11371_v30 = vld [vmem:[#allocation32_spill] sm:$0xff]  ;;  %v11377_v52 = vld [vmem:[#allocation15_spill] sm:$0xff] }
 0x25a   :  { %v9952_v59 = vpop.f32.mrf.mxu1  ;;  %v1862_v49 = vadd.f32 %v9803_v12, %v9833_v63  ;;  %v2793_v16 = vadd.f32 %v9906_v0, %v2582_v56  ;;  %v11364_v12 = vld [vmem:[#allocation27_spill] sm:$0xff]  ;;  %v2792_v40 = vadd.f32 %v11365_v51, %v2581_v45  ;;  %v2584_v5 = vadd.f32 %v11370_v54, %v2294_v1  ;;  %v11384_v45 = vld [vmem:[#allocation28_spill] sm:$0xff] }
 0x25b   :  { %v1861_v32 = vadd.f32 %v9815_v26, %v1651_v3  ;;  %v3225_v14 = vadd.f32 %v9926_v44, %v2791_v46  ;;  %v11369_v26 = vld [vmem:[#allocation13_spill] sm:$0xff]  ;;  %v3193_v38 = vpop.f32.mrf.mxu0  ;;  %v11379_v3 = vld [vmem:[#allocation24_spill] sm:$0xff]  ;;  %v11380_v46 = vld [vmem:[#allocation19_spill] sm:$0xff] }
 0x25c   :  { %v9958_v27 = vpop.f32.mrf.mxu1  ;;  %v2296_v63 = vadd.f32 %v11364_v12, %v1862_v49  ;;  %v1863_v41 = vadd.f32 %v11369_v26, %v11368_v18  ;;  %v11389_v18 = vld [vmem:[#allocation16_spill] sm:$0xff] }
 0x25d   :  { %v2295_v22 = vadd.f32 %v11371_v30, %v1861_v32 }
 0x25e   :  { %v8234_v25 = vpop.f32.mrf.mxu1  ;;  %v2586_v21 = vadd.f32 %v11379_v3, %v2296_v63  ;;  %v11387_v63 = vld [vmem:[#allocation26_spill] sm:$0xff] }
 0x25f   :  { %v3513_v39 = vadd.f32 %v8234_v25, %v3223_v42  ;;  %v11372_v42 = vld [vmem:[#allocation39_spill] sm:$0xff]  ;;  %v11373_v25 = vld [vmem:[#allocation41_spill] sm:$0xff] }
 0x260   :  { %v3448_v37 = vpop.f32.mrf.mxu1  ;;  %v2794_v9 = vadd.f32 %v11372_v42, %v2583_v11  ;;  %v3227_v29 = vadd.f32 %v11373_v25, %v2793_v16 }
 0x261   :  { %v3511_v6 = vadd.f32 %v3448_v37, %v3221_v60  ;;  %v3536_v57 = vadd.f32 %v9970_v55, %v3513_v39  ;;  %v11374_v39 = vld [vmem:[#allocation22_spill] sm:$0xff]  ;;  %v1864_v37 = vadd.f32 %v11377_v52, %v11376_v43 }
 0x262   :  { %v8235_v10 = vpop.f32.mrf.mxu1  ;;  %v1655_v44 = vadd.f32 %v11374_v39, %v1354_v28  ;;  %v11375_v60 = vld [vmem:[#allocation30_spill] sm:$0xff] }
 0x263   :  { %v3514_v4 = vadd.f32 %v8235_v10, %v3224_v2  ;;  %3570 = vrot.lane.b32.xlu1 %v3536_v57, %s8589_s6  ;;  %v3534_v31 = vadd.f32 %v9970_v55, %v3511_v6  ;;  %v2297_v23 = vadd.f32 %v11375_v60, %v1863_v41  ;;  %v11378_v6 = vld [vmem:[#allocation43_spill] sm:$0xff]  ;;  %v3226_v10 = vadd.f32 %v9950_v35, %v2792_v40  ;;  %v8226_v35 = vpop.f32.mrf.mxu0  ;;  %v11390_v41 = vld [vmem:[#allocation38_spill] sm:$0xff] }
 0x264   :  { %v3451_v13 = vpop.f32.mrf.mxu1  ;;  %v2795_v2 = vadd.f32 %v11378_v6, %v2584_v5  ;;  %v11391_v5 = vld [vmem:[#allocation31_spill] sm:$0xff] }
 0x265   :  { %v3537_v62 = vadd.f32 %v9970_v55, %v3514_v4  ;;  %v3512_v8 = vadd.f32 %v3451_v13, %v3222_v17  ;;  %3566 = vrot.lane.b32.xlu0 %v3534_v31, %s8589_s6  ;;  %v11381_v4 = vld [vmem:[#allocation14_spill] sm:$0xff]  ;;  %v11382_v31 = vld [vmem:[#allocation35_spill] sm:$0xff]  ;;  %v2587_v51 = vadd.f32 %v11387_v63, %v2297_v23 }
 0x266   :  { %v8238_v24 = vpop.f32.mrf.mxu1  ;;  %v1866_v17 = vadd.f32 %v11381_v4, %v11380_v46  ;;  %v2298_v49 = vadd.f32 %v11382_v31, %v1864_v37  ;;  %v11383_v13 = vld [vmem:[#allocation42_spill] sm:$0xff] }
 0x267   :  { %v3535_v0 = vadd.f32 %v9970_v55, %v3512_v8  ;;  %3572 = vrot.lane.b32.xlu1 %v3537_v62, %s8589_s6  ;;  %v3517_v50 = vadd.f32 %v8238_v24, %v3227_v29  ;;  %v2797_v16 = vadd.f32 %v11383_v13, %v2586_v21  ;;  %v2585_v62 = vadd.f32 %v11384_v45, %v2295_v22  ;;  %v11386_v24 = vld [vmem:[#allocation17_spill] sm:$0xff]  ;;  %v11392_v22 = vld [vmem:[#allocation44_spill] sm:$0xff]  ;;  %v3206_v29 = vpop.f32.mrf.mxu0 }
 0x268   :  { %v3464_v19 = vpop.f32.mrf.mxu1  ;;  %v3228_v8 = vadd.f32 %v9937_v61, %v2794_v9  ;;  %v2300_v11 = vadd.f32 %v11385_v7, %v1866_v17  ;;  %v1865_v12 = vadd.f32 %v11386_v24, %v1655_v44  ;;  %v11388_v61 = vld [vmem:[#allocation21_spill] sm:$0xff]  ;;  %v2798_v42 = vadd.f32 %v11392_v22, %v2587_v51 }
 0x269   :  { %v3515_v48 = vadd.f32 %v3464_v19, %v3225_v14  ;;  %3568 = vrot.lane.b32.xlu0 %v3535_v0, %s8589_s6  ;;  %v3229_v0 = vadd.f32 %v3190_v20, %v2795_v2  ;;  %v2796_v14 = vadd.f32 %v9933_v33, %v2585_v62  ;;  %v3540_v34 = vadd.f32 %v9970_v55, %v3517_v50  ;;  %v11393_v33 = vld [vmem:[#allocation37_spill] sm:$0xff] }
 0x26a   :  { %v8239_v57 = vpop.f32.mrf.mxu1  ;;  %v1867_v26 = vadd.f32 %v11389_v18, %v11388_v61  ;;  %v2299_v54 = vadd.f32 %v11390_v41, %v1865_v12  ;;  %v2588_v19 = vadd.f32 %v11391_v5, %v2298_v49  ;;  %v3231_v9 = vadd.f32 %v9965_v47, %v2797_v16  ;;  %v11395_v47 = vld [vmem:[#allocation36_spill] sm:$0xff]  ;;  %v11396_v50 = vld [vmem:[#allocation33_spill] sm:$0xff] }
 0x26b   :  { %v3538_v56 = vadd.f32 %v9970_v55, %v3515_v48  ;;  %v3518_v58 = vadd.f32 %v8239_v57, %v3228_v8  ;;  %v11394_v48 = vld [vmem:[#allocation29_spill] sm:$0xff]  ;;  %v3230_v37 = vadd.f32 %v3193_v38, %v2796_v14  ;;  %v3232_v3 = vadd.f32 %v9997_v53, %v2798_v42  ;;  %v10077_v14 = vld [vmem:[%s11298_s7] ss:$0 sm:$0xff] }
 0x26c   :  { %v3467_v1 = vpop.f32.mrf.mxu1  ;;  %v2301_v25 = vadd.f32 %v11393_v33, %v1867_v26  ;;  %v2590_v39 = vadd.f32 %v11394_v48, %v2300_v11  ;;  %v2799_v44 = vadd.f32 %v9943_v15, %v2588_v19  ;;  %v2589_v6 = vadd.f32 %v11395_v47, %v2299_v54  ;;  %v8227_v15 = vpop.f32.mrf.mxu0  ;;  %v10085_v26 = vld [vmem:[%s11299_s8] ss:$0 sm:$0xff] }
 0x26d   :  { %v3516_v32 = vadd.f32 %v3467_v1, %v3226_v10  ;;  %3574 = vrot.lane.b32.xlu0 %v3538_v56, %s8589_s6  ;;  %v3541_v23 = vadd.f32 %v9970_v55, %v3518_v58 }
 0x26e   :  { %v8242_v40 = vpop.f32.mrf.mxu1  ;;  %v2801_v57 = vadd.f32 %v9939_v36, %v2590_v39  ;;  %v2591_v56 = vadd.f32 %v11396_v50, %v2301_v25  ;;  %v3233_v46 = vadd.f32 %v3206_v29, %v2799_v44  ;;  %v2800_v4 = vadd.f32 %v9958_v27, %v2589_v6  ;;  %v3209_v13 = vpop.f32.mrf.mxu0 }
 0x26f   :  { %v3539_v28 = vadd.f32 %v9970_v55, %v3516_v32  ;;  %v3521_v43 = vadd.f32 %v8242_v40, %v3231_v9 }
 0x270   :  { %v3480_v30 = vpop.f32.mrf.mxu1  ;;  %v2802_v53 = vadd.f32 %v9952_v59, %v2591_v56  ;;  %v3235_v49 = vadd.f32 %v8226_v35, %v2801_v57  ;;  %v3234_v8 = vadd.f32 %v3209_v13, %v2800_v4 }
 0x271   :  { %v3519_v20 = vadd.f32 %v3480_v30, %v3229_v0  ;;  %3578 = vrot.lane.b32.xlu0 %v3540_v34, %s8589_s6  ;;  %3576 = vrot.lane.b32.xlu1 %v3539_v28, %s8589_s6  ;;  %v3544_v38 = vadd.f32 %v9970_v55, %v3521_v43 }
 0x272   :  { %v8243_v60 = vpop.f32.mrf.mxu1  ;;  %v3236_v7 = vadd.f32 %v8227_v15, %v2802_v53 }
 0x273   :  { %v3542_v52 = vadd.f32 %v9970_v55, %v3519_v20  ;;  %v3522_v17 = vadd.f32 %v8243_v60, %v3232_v3 }
 0x274   :  { %v3483_v2 = vpop.f32.mrf.mxu1 }
 0x275   :  { %v3520_v21 = vadd.f32 %v3483_v2, %v3230_v37  ;;  %3580 = vrot.lane.b32.xlu1 %v3541_v23, %s8589_s6  ;;  %3582 = vrot.lane.b32.xlu0 %v3542_v52, %s8589_s6  ;;  %v3545_v45 = vadd.f32 %v9970_v55, %v3522_v17 }
 0x276   :  { %v8246_v10 = vpop.f32.mrf.mxu1 }
 0x277   :  { %v3543_v31 = vadd.f32 %v9970_v55, %v3520_v21  ;;  %v3525_v62 = vadd.f32 %v8246_v10, %v3235_v49 }
 0x278   :  { %v3496_v36 = vpop.f32.mrf.mxu1 }
 0x279   :  { %v3523_v1 = vadd.f32 %v3496_v36, %v3233_v46  ;;  %3586 = vrot.lane.b32.xlu0 %v3544_v38, %s8589_s6  ;;  %3584 = vrot.lane.b32.xlu1 %v3543_v31, %s8589_s6  ;;  %v3548_v59 = vadd.f32 %v9970_v55, %v3525_v62 }
 0x27a   :  { %v8247_v16 = vpop.f32.mrf.mxu1 }
 0x27b   :  { %v3546_v27 = vadd.f32 %v9970_v55, %v3523_v1  ;;  %v3526_v24 = vadd.f32 %v8247_v16, %v3236_v7 }
 0x27c   :  { %v3499_v32 = vpop.f32.mrf.mxu1 }
 0x27d   :  { %v3524_v11 = vadd.f32 %v3499_v32, %v3234_v8  ;;  %3588 = vrot.lane.b32.xlu1 %v3545_v45, %s8589_s6  ;;  %3590 = vrot.lane.b32.xlu0 %v3546_v27, %s8589_s6  ;;  %v3549_v35 = vadd.f32 %v9970_v55, %v3526_v24 }
 0x27f   :  { %v3547_v12 = vadd.f32 %v9970_v55, %v3524_v11 }
 0x281   :  { %3594 = vrot.lane.b32.xlu0 %v3548_v59, %s8589_s6  ;;  %3592 = vrot.lane.b32.xlu1 %v3547_v12, %s8589_s6 }
 0x285   :  { %3596 = vrot.lane.b32.xlu1 %v3549_v35, %s8589_s6 }
 0x2d5   :  { %v3571_v63 = vpop.permute.xlu1 %3570 }
 0x2d6   :  { %3617 = vst.msk [vmem:[#allocation2 + $0x10] sm:$0xff] %vm3614_vm0, %v3571_v63 }
 0x2d7   :  { %v3567_v51 = vpop.permute.xlu0 %3566 }
 0x2d8   :  { %3615 = vst.msk [vmem:[#allocation2] sm:$0xff] %vm3614_vm0, %v3567_v51 }
 0x2d9   :  { %v3573_v40 = vpop.permute.xlu1 %3572 }
 0x2da   :  { %3618 = vst.msk [vmem:[#allocation2 + $0x18] sm:$0xff] %vm3614_vm0, %v3573_v40 }
 0x2db   :  { %v3569_v0 = vpop.permute.xlu0 %3568 }
 0x2dc   :  { %3616 = vst.msk [vmem:[#allocation2 + $0x8] sm:$0xff] %vm3614_vm0, %v3569_v0 }
 0x2dd   :  { %v3633_v55 = vld [vmem:[#allocation2 + $0x10] sm:$0xff] }
 0x2de   :  { %v3656_v18 = vmul.f32 %v10077_v14, %v3633_v55 }
 0x2df   :  { %v3575_v34 = vpop.permute.xlu0 %3574  ;;  %v3631_v58 = vld [vmem:[#allocation2] sm:$0xff] }
 0x2e0   :  { %3619 = vst.msk [vmem:[#allocation2 + $0x20] sm:$0xff] %vm3614_vm0, %v3575_v34  ;;  %v3654_v28 = vmul.f32 %v10077_v14, %v3631_v58  ;;  %v3679_v9 = vadd.f32 %v10085_v26, %v3656_v18 }
 0x2e1   :  { %v3634_v61 = vld [vmem:[#allocation2 + $0x18] sm:$0xff] }
 0x2e2   :  { %v3657_v41 = vmul.f32 %v10077_v14, %v3634_v61  ;;  %v3677_v22 = vadd.f32 %v10085_v26, %v3654_v28  ;;  %v3695_v23 = vmax.f32 %v3679_v9, 0.0 }
 0x2e3   :  { %v3579_v54 = vpop.permute.xlu0 %3578  ;;  %v3577_v5 = vpop.permute.xlu1 %3576  ;;  %v3632_v19 = vld [vmem:[#allocation2 + $0x8] sm:$0xff] }
 0x2e4   :  { %3621 = vst.msk [vmem:[#allocation2 + $0x30] sm:$0xff] %vm3614_vm0, %v3579_v54  ;;  %3620 = vst.msk [vmem:[#allocation2 + $0x28] sm:$0xff] %vm3614_vm0, %v3577_v5  ;;  %v3655_v30 = vmul.f32 %v10077_v14, %v3632_v19  ;;  %v3680_v42 = vadd.f32 %v10085_v26, %v3657_v41  ;;  %v3693_v39 = vmax.f32 %v3677_v22, 0.0 }
 0x2e6   :  { %v3678_v20 = vadd.f32 %v10085_v26, %v3655_v30  ;;  %v3696_v29 = vmax.f32 %v3680_v42, 0.0 }
 0x2e7   :  { %v3581_v33 = vpop.permute.xlu1 %3580  ;;  %v3583_v25 = vpop.permute.xlu0 %3582  ;;  %v3635_v48 = vld [vmem:[#allocation2 + $0x20] sm:$0xff] }
 0x2e8   :  { %3622 = vst.msk [vmem:[#allocation2 + $0x38] sm:$0xff] %vm3614_vm0, %v3581_v33  ;;  %3623 = vst.msk [vmem:[#allocation2 + $0x40] sm:$0xff] %vm3614_vm0, %v3583_v25  ;;  %v3694_v44 = vmax.f32 %v3678_v20, 0.0  ;;  %v3658_v60 = vmul.f32 %v10077_v14, %v3635_v48  ;;  %v3710_v47 = vpack.c.bf16 %v3696_v29, %v3695_v23  ;;  %v8522_v23 = vld [vmem:[%s11302_s11 + $0x18] sm:$0xff]  }
 0x2e9   :  { %8268 = vmatprep.subr.bf16.mxu1 %v8522_v23 }
 0x2ea   :  { %v3709_v43 = vpack.c.bf16 %v3694_v44, %v3693_v39  ;;  %v3681_v3 = vadd.f32 %v10085_v26, %v3658_v60  ;;  %8269 = vmatpush3.bf16.msra.mxu1 %v8522_v23 }
 0x2eb   :  { %v3587_v52 = vpop.permute.xlu0 %3586  ;;  %v3585_v37 = vpop.permute.xlu1 %3584  ;;  %v3636_v6 = vld [vmem:[#allocation2 + $0x28] sm:$0xff]  ;;  %v3637_v2 = vld [vmem:[#allocation2 + $0x30] sm:$0xff] }
 0x2ec   :  { %3625 = vst.msk [vmem:[#allocation2 + $0x50] sm:$0xff] %vm3614_vm0, %v3587_v52  ;;  %3624 = vst.msk [vmem:[#allocation2 + $0x48] sm:$0xff] %vm3614_vm0, %v3585_v37  ;;  %8252 = vmatprep.mubr.msk.bf16.mxu0 %vm3736_vm1, %v3709_v43  ;;  %v3659_v57 = vmul.f32 %v10077_v14, %v3636_v6  ;;  %v3660_v21 = vmul.f32 %v10077_v14, %v3637_v2  ;;  %v3697_v38 = vmax.f32 %v3681_v3, 0.0  ;;  %v8525_v43 = vld [vmem:[%s11302_s11] sm:$0xff]   ;;  %v10151_v52 = vld [vmem:[%s11302_s11 + $0x28] sm:$0xff]  }
 0x2ed   :  { %8253 = vmatmul.mubr.msk.bf16.vlgmr.msra.gmra.mxu0 %vm3736_vm1, %v3710_v47  ;;  %v10157_v37 = vld [vmem:[%s11302_s11 + $0x38] sm:$0xff]   ;;  %v10160_v47 = vld [vmem:[#allocation3] sm:$0xf]  ;;  %v10162_v6 = vld [vmem:[#allocation3 + $0x50] sm:$0xf] }
 0x2ee   :  { %v3682_v15 = vadd.f32 %v10085_v26, %v3659_v57  ;;  %v3683_v46 = vadd.f32 %v10085_v26, %v3660_v21  ;;  %v4219_v2 = vshrl.u32 %v10160_v47, 16  ;;  %v4222_v57 = vshll.u32 %v10160_v47, 16 }
 0x2ef   :  { %v3589_v50 = vpop.permute.xlu1 %3588  ;;  %v3591_v56 = vpop.permute.xlu0 %3590  ;;  %v3638_v10 = vld [vmem:[#allocation2 + $0x38] sm:$0xff]  ;;  %v3639_v4 = vld [vmem:[#allocation2 + $0x40] sm:$0xff]  ;;  %v4331_v3 = vshrl.u32 %v10162_v6, 16  ;;  %v4334_v21 = vshll.u32 %v10162_v6, 16 }
 0x2f0   :  { %3626 = vst.msk [vmem:[#allocation2 + $0x58] sm:$0xff] %vm3614_vm0, %v3589_v50  ;;  %3627 = vst.msk [vmem:[#allocation2 + $0x60] sm:$0xff] %vm3614_vm0, %v3591_v56  ;;  %v3698_v17 = vmax.f32 %v3682_v15, 0.0  ;;  %v3661_v31 = vmul.f32 %v10077_v14, %v3638_v10  ;;  %v3662_v36 = vmul.f32 %v10077_v14, %v3639_v4  ;;  %v3699_v16 = vmax.f32 %v3683_v46, 0.0  ;;  %v10171_v15 = vld [vmem:[%s11301_s10] ss:$0 sm:$0xff] }
 0x2f1   :  { %v4221_v50 = vrot.slane %v4219_v2, 4  ;;  %v4224_v56 = vrot.slane %v4222_v57, 5  ;;  %v4333_v10 = vrot.slane %v4331_v3, 4  ;;  %v4336_v46 = vrot.slane %v4334_v21, 5  ;;  %v4086_v3 = vld [vmem:[#allocation3 + $0x8] sm:$0xf] }
 0x2f2   :  { %v3711_v53 = vpack.c.bf16 %v3698_v17, %v3697_v38  ;;  %v3684_v49 = vadd.f32 %v10085_v26, %v3661_v31  ;;  %v3685_v32 = vadd.f32 %v10085_v26, %v3662_v36  ;;  %v4202_v17 = vld [vmem:[#allocation3 + $0x4] sm:$0x1]  ;;  %v4089_v21 = vld [vmem:[#allocation3 + $0xc] sm:$0x1] }
 0x2f3   :  { %v3595_v1 = vpop.permute.xlu0 %3594  ;;  %v3593_v13 = vpop.permute.xlu1 %3592  ;;  %v3640_v45 = vld [vmem:[#allocation2 + $0x48] sm:$0xff]  ;;  %v3641_v62 = vld [vmem:[#allocation2 + $0x50] sm:$0xff]  ;;  %v4225_v36 = vor.u32 %v4224_v56, %v4221_v50 }
 0x2f4   :  { %3629 = vst.msk [vmem:[#allocation2 + $0x70] sm:$0xff] %vm3614_vm0, %v3595_v1  ;;  %3628 = vst.msk [vmem:[#allocation2 + $0x68] sm:$0xff] %vm3614_vm0, %v3593_v13  ;;  %8256 = vmatprep.mubr.msk.bf16.mxu0 %vm3736_vm1, %v3711_v53  ;;  %v3700_v27 = vmax.f32 %v3684_v49, 0.0  ;;  %v3663_v8 = vmul.f32 %v10077_v14, %v3640_v45  ;;  %v3664_v7 = vmul.f32 %v10077_v14, %v3641_v62  ;;  %v3701_v51 = vmax.f32 %v3685_v32, 0.0  ;;  %v10175_v13 = vld [vmem:[#allocation3 + $0x54] sm:$0x1] }
 0x2f5   :  { %v4228_v53 = vshll.u32 %v4202_v17, 16  ;;  %v4340_v62 = vshll.u32 %v10175_v13, 16 }
 0x2f6   :  { %v3712_v11 = vpack.c.bf16 %v3700_v27, %v3699_v16  ;;  %v3686_v59 = vadd.f32 %v10085_v26, %v3663_v8  ;;  %v3687_v35 = vadd.f32 %v10085_v26, %v3664_v7  ;;  %v4337_v16 = vor.u32 %v4336_v46, %v4333_v10  ;;  %v4777_v7 = vld [vmem:[#allocation3] sm:$0xe] }
 0x2f7   :  { %v3597_v24 = vpop.permute.xlu1 %3596  ;;  %v3642_v12 = vld [vmem:[#allocation2 + $0x58] sm:$0xff]  ;;  %v3643_v63 = vld [vmem:[#allocation2 + $0x60] sm:$0xff] }
 0x2f8   :  { %3630 = vst.msk [vmem:[#allocation2 + $0x78] sm:$0xff] %vm3614_vm0, %v3597_v24  ;;  %8257 = vmatmul.mubr.msk.bf16.gmra.mxu0 %vm3736_vm1, %v3712_v11  ;;  %v3702_v40 = vmax.f32 %v3686_v59, 0.0  ;;  %v3665_v0 = vmul.f32 %v10077_v14, %v3642_v12  ;;  %v3666_v55 = vmul.f32 %v10077_v14, %v3643_v63  ;;  %v3703_v28 = vmax.f32 %v3687_v35, 0.0 }
 0x2f9   :  { %v10179_v59 = vrot.slane %v4225_v36, 4  ;;  %v10181_v24 = vrot.slane %v4228_v53, 5 }
 0x2fa   :  { %v3713_v34 = vpack.c.bf16 %v3702_v40, %v3701_v51  ;;  %v3688_v58 = vadd.f32 %v10085_v26, %v3665_v0  ;;  %v3689_v5 = vadd.f32 %v10085_v26, %v3666_v55  ;;  %v10183_v51 = vrot.slane %v4337_v16, 4 }
 0x2fb   :  { %v3644_v61 = vld [vmem:[#allocation2 + $0x68] sm:$0xff]  ;;  %v3645_v18 = vld [vmem:[#allocation2 + $0x70] sm:$0xff]  ;;  %v10186_v0 = vrot.slane %v4340_v62, 5  ;;  %v7595_v55 = vrot.slane %v4777_v7, 9 }
 0x2fc   :  { %8260 = vmatprep.mubr.msk.bf16.mxu0 %vm3736_vm1, %v3713_v34  ;;  %v3704_v41 = vmax.f32 %v3688_v58, 0.0  ;;  %v3667_v54 = vmul.f32 %v10077_v14, %v3644_v61  ;;  %v3668_v19 = vmul.f32 %v10077_v14, %v3645_v18  ;;  %v3705_v9 = vmax.f32 %v3689_v5, 0.0 }
 0x2fd   :  { %v4827_v34 = vrot.slane %v4202_v17, 5 }
 0x2fe   :  { %v3714_v30 = vpack.c.bf16 %v3704_v41, %v3703_v28  ;;  %v3690_v22 = vadd.f32 %v10085_v26, %v3667_v54  ;;  %v3691_v25 = vadd.f32 %v10085_v26, %v3668_v19  ;;  %v4231_v19 = vsel %vm8933_vm11, %v10179_v59, %v10181_v24 }
 0x2ff   :  { %v3646_v42 = vld [vmem:[#allocation2 + $0x78] sm:$0xff] }
 0x300   :  { %8261 = vmatmul.mubr.msk.bf16.gmra.mxu0 %vm3736_vm1, %v3714_v30  ;;  %v3706_v20 = vmax.f32 %v3690_v22, 0.0  ;;  %v3669_v33 = vmul.f32 %v10077_v14, %v3646_v42  ;;  %v3707_v39 = vmax.f32 %v3691_v25, 0.0  ;;  %v8523_v14 = vld [vmem:[%s11302_s11 + $0x8] sm:$0xff]   ;;  %v4101_v25 = vld [vmem:[#allocation3 + $0x1c] sm:$0x1] }
 0x301   :  { %8288 = vmatprep.subr.bf16.mxu0 %v8523_v14 }
 0x302   :  { %v3715_v29 = vpack.c.bf16 %v3706_v20, %v3705_v9  ;;  %v3692_v48 = vadd.f32 %v10085_v26, %v3669_v33  ;;  %8289 = vmatpush3.bf16.msra.mxu0 %v8523_v14  ;;  %v8524_v26 = vld [vmem:[%s11302_s11 + $0x10] sm:$0xff]   ;;  %v4098_v33 = vld [vmem:[#allocation3 + $0x18] sm:$0xf] }
 0x303   :  { %8270 = vmatprep.subr.bf16.mxu1 %v8524_v26  ;;  %8290 = vmatprep.subr.bf16.mxu0 %v8525_v43 }
 0x304   :  { %8264 = vmatprep.mubr.msk.bf16.mxu0 %vm3736_vm1, %v3715_v29  ;;  %v3708_v44 = vmax.f32 %v3692_v48, 0.0  ;;  %8271 = vmatpush3.bf16.msra.mxu1 %v8524_v26 }
 0x305   :  { %8308 = vmatprep.subr.bf16.mxu1 %v10151_v52 }
 0x306   :  { %v3716_v60 = vpack.c.bf16 %v3708_v44, %v3707_v39  ;;  %8291 = vmatpush3.bf16.msra.mxu0 %v8525_v43  ;;  %v4343_v39 = vsel %vm8933_vm11, %v10183_v51, %v10186_v0 }
 0x307   :  { %8328 = vmatprep.subr.bf16.mxu0 %v10157_v37 }
 0x308   :  { %8265 = vmatmul.mubr.msk.bf16.gmra.mxu0 %vm3736_vm1, %v3716_v60  ;;  %v10199_v60 = vsel %vm8944_vm12, %v7595_v55, %v4827_v34 }
 0x3ad   :  { %v8254_v4 = vpop.f32.mrf.mxu0 }
 0x3ae   :  { %v3808_v38 = vadd.f32 %v8254_v4, %v10171_v15 }
 0x3af   :  { %v3799_v31 = vpop.f32.mrf.mxu0 }
 0x3b0   :  { %v3864_v49 = vmax.f32 %v3808_v38, 0.0  ;;  %v3800_v1 = vadd.f32 %v10171_v15, %v3799_v31  ;;  %v10205_v38 = vld [vmem:[#allocation3 + $0x50] sm:$0xe] }
 0x3b1   :  { %v8255_v45 = vpop.f32.mrf.mxu0 }
 0x3b2   :  { %v7827_v27 = vpack.c.bf16 %v3864_v49, %v3864_v49  ;;  %v3862_v8 = vmax.f32 %v3800_v1, 0.0  ;;  %v3811_v32 = vadd.f32 %v8255_v45, %v10171_v15  ;;  %v4104_v45 = vld [vmem:[#allocation3 + $0x20] sm:$0xf] }
 0x3b3   :  { %v3802_v11 = vpop.f32.mrf.mxu0 }
 0x3b4   :  { %v3943_v12 = vshrl.u32 %v7827_v27, 16  ;;  %v7825_v35 = vpack.c.bf16 %v3862_v8, %v3862_v8  ;;  %v3865_v63 = vmax.f32 %v3811_v32, 0.0  ;;  %v3803_v40 = vadd.f32 %v10171_v15, %v3802_v11  ;;  %v4107_v8 = vld [vmem:[#allocation3 + $0x24] sm:$0x1] }
 0x3b5   :  { %v3946_v28 = vshll.u32 %v7827_v27, 16 }
 0x3b6   :  { %v3945_v58 = vrot.slane %v3943_v12, 7  ;;  %v3927_v61 = vshrl.u32 %v7825_v35, 16  ;;  %v7828_v18 = vpack.c.bf16 %v3865_v63, %v3865_v63  ;;  %v3930_v41 = vshll.u32 %v7825_v35, 16 }
 0x3b7   :  { %v3863_v54 = vmax.f32 %v3803_v40, 0.0  ;;  %v7603_v12 = vrot.slane %v10205_v38, 9  ;;  %v4859_v35 = vrot.slane %v10175_v13, 5 }
 0x3b8   :  { %v3948_v30 = vor.u32 %v3946_v28, %v3945_v58  ;;  %v3949_v22 = vrot.slane %v3945_v58, 4  ;;  %v3929_v42 = vrot.slane %v3927_v61, 7  ;;  %v3951_v9 = vshrl.u32 %v7828_v18, 16  ;;  %v8258_v20 = vpop.f32.mrf.mxu0  ;;  %v4092_v58 = vld [vmem:[#allocation3 + $0x10] sm:$0xf] }
 0x3b9   :  { %v7826_v29 = vpack.c.bf16 %v3863_v54, %v3863_v54  ;;  %v3824_v48 = vadd.f32 %v8258_v20, %v10171_v15  ;;  %v3954_v10 = vshll.u32 %v7828_v18, 16  ;;  %v4095_v28 = vld [vmem:[#allocation3 + $0x14] sm:$0x1] }
 0x3ba   :  { %v4099_v14 = vsel %vm8965_vm13, %v3948_v30, %v4098_v33  ;;  %v4102_v43 = vsel %vm8753_vm4, %v3949_v22, %v4101_v25  ;;  %v3932_v2 = vor.u32 %v3930_v41, %v3929_v42  ;;  %v3933_v57 = vrot.slane %v3929_v42, 4  ;;  %v3815_v50 = vpop.f32.mrf.mxu0 }
 0x3bb   :  { %4103 = vst [vmem:[#allocation3 + $0x1c] sm:$0x1] %v4102_v43  ;;  %4100 = vst [vmem:[#allocation3 + $0x18] sm:$0xf] %v4099_v14  ;;  %v3953_v56 = vrot.slane %v3951_v9, 7  ;;  %v3935_v46 = vshrl.u32 %v7826_v29, 16  ;;  %v3816_v53 = vadd.f32 %v10171_v15, %v3815_v50 }
 0x3bc   :  { %v3868_v4 = vmax.f32 %v3824_v48, 0.0  ;;  %v4087_v17 = vsel %vm8965_vm13, %v3932_v2, %v4086_v3  ;;  %v4090_v31 = vsel %vm8753_vm4, %v3933_v57, %v4089_v21  ;;  %v3938_v36 = vshll.u32 %v7826_v29, 16  ;;  %v8259_v49 = vpop.f32.mrf.mxu0 }
 0x3bd   :  { %4088 = vst [vmem:[#allocation3 + $0x8] sm:$0xf] %v4087_v17  ;;  %4091 = vst [vmem:[#allocation3 + $0xc] sm:$0x1] %v4090_v31  ;;  %v3956_v1 = vor.u32 %v3954_v10, %v3953_v56  ;;  %v3957_v16 = vrot.slane %v3953_v56, 4  ;;  %v3937_v62 = vrot.slane %v3935_v46, 7  ;;  %v3827_v7 = vadd.f32 %v8259_v49, %v10171_v15 }
 0x3be   :  { %v7831_v27 = vpack.c.bf16 %v3868_v4, %v3868_v4  ;;  %v3866_v32 = vmax.f32 %v3816_v53, 0.0  ;;  %v3818_v11 = vpop.f32.mrf.mxu0  ;;  %v4122_v10 = vld [vmem:[#allocation3 + $0x38] sm:$0xf]  ;;  %v4125_v31 = vld [vmem:[#allocation3 + $0x3c] sm:$0x1] }
 0x3bf   :  { %v4105_v63 = vsel %vm8965_vm13, %v3956_v1, %v4104_v45  ;;  %v4108_v40 = vsel %vm8753_vm4, %v3957_v16, %v4107_v8  ;;  %v3940_v55 = vor.u32 %v3938_v36, %v3937_v62  ;;  %v3941_v34 = vrot.slane %v3937_v62, 4  ;;  %v4110_v8 = vld [vmem:[#allocation3 + $0x28] sm:$0xf] }
 0x3c0   :  { %4109 = vst [vmem:[#allocation3 + $0x24] sm:$0x1] %v4108_v40  ;;  %4106 = vst [vmem:[#allocation3 + $0x20] sm:$0xf] %v4105_v63  ;;  %v3975_v61 = vshrl.u32 %v7831_v27, 16  ;;  %v3978_v18 = vshll.u32 %v7831_v27, 16  ;;  %v7829_v41 = vpack.c.bf16 %v3866_v32, %v3866_v32  ;;  %v8262_v30 = vpop.f32.mrf.mxu0  ;;  %v3819_v9 = vadd.f32 %v10171_v15, %v3818_v11 }
 0x3c1   :  { %v3869_v54 = vmax.f32 %v3827_v7, 0.0  ;;  %v4093_v22 = vsel %vm8965_vm13, %v3940_v55, %v4092_v58  ;;  %v4096_v42 = vsel %vm8753_vm4, %v3941_v34, %v4095_v28  ;;  %v3840_v20 = vadd.f32 %v8262_v30, %v10171_v15  ;;  %v4113_v7 = vld [vmem:[#allocation3 + $0x2c] sm:$0x1]  ;;  %v4128_v28 = vld [vmem:[#allocation3 + $0x40] sm:$0xf] }
 0x3c2   :  { %4097 = vst [vmem:[#allocation3 + $0x14] sm:$0x1] %v4096_v42  ;;  %4094 = vst [vmem:[#allocation3 + $0x10] sm:$0xf] %v4093_v22  ;;  %v3977_v33 = vrot.slane %v3975_v61, 7  ;;  %v3959_v25 = vshrl.u32 %v7829_v41, 16  ;;  %v3831_v14 = vpop.f32.mrf.mxu0 }
 0x3c3   :  { %v3962_v29 = vshll.u32 %v7829_v41, 16  ;;  %v7832_v48 = vpack.c.bf16 %v3869_v54, %v3869_v54  ;;  %v10225_v43 = vld [vmem:[#allocation3 + $0x18] sm:$0xf]  ;;  %v3867_v2 = vmax.f32 %v3819_v9, 0.0  ;;  %v3872_v57 = vmax.f32 %v3840_v20, 0.0 }
 0x3c4   :  { %v3832_v3 = vadd.f32 %v10171_v15, %v3831_v14  ;;  %v4261_v21 = vshrl.u32 %v10225_v43, 16  ;;  %v3980_v50 = vor.u32 %v3978_v18, %v3977_v33  ;;  %v3981_v56 = vrot.slane %v3977_v33, 4  ;;  %v8263_v17 = vpop.f32.mrf.mxu0  ;;  %v4131_v30 = vld [vmem:[#allocation3 + $0x44] sm:$0x1] }
 0x3c5   :  { %v3961_v46 = vrot.slane %v3959_v25, 7  ;;  %v3983_v4 = vshrl.u32 %v7832_v48, 16  ;;  %v3986_v36 = vshll.u32 %v7832_v48, 16  ;;  %v7830_v53 = vpack.c.bf16 %v3867_v2, %v3867_v2 }
 0x3c6   :  { %v7835_v49 = vpack.c.bf16 %v3872_v57, %v3872_v57  ;;  %v3870_v1 = vmax.f32 %v3832_v3, 0.0  ;;  %v4123_v16 = vsel %vm8965_vm13, %v3980_v50, %v4122_v10  ;;  %v4126_v45 = vsel %vm8753_vm4, %v3981_v56, %v4125_v31  ;;  %v3834_v32 = vpop.f32.mrf.mxu0  ;;  %v4116_v50 = vld [vmem:[#allocation3 + $0x30] sm:$0xf]  ;;  %v4119_v56 = vld [vmem:[#allocation3 + $0x34] sm:$0x1] }
 0x3c7   :  { %v3964_v62 = vor.u32 %v3962_v29, %v3961_v46  ;;  %v3965_v27 = vrot.slane %v3961_v46, 4  ;;  %4127 = vst [vmem:[#allocation3 + $0x3c] sm:$0x1] %v4126_v45  ;;  %4124 = vst [vmem:[#allocation3 + $0x38] sm:$0xf] %v4123_v16  ;;  %v3985_v11 = vrot.slane %v3983_v4, 7  ;;  %v3843_v33 = vadd.f32 %v8263_v17, %v10171_v15 }
 0x3c8   :  { %v3967_v63 = vshrl.u32 %v7830_v53, 16  ;;  %v3970_v40 = vshll.u32 %v7830_v53, 16  ;;  %v4007_v55 = vshrl.u32 %v7835_v49, 16  ;;  %v4010_v61 = vshll.u32 %v7835_v49, 16  ;;  %v4183_v29 = vld [vmem:[#allocation3 + $0x8] sm:$0xf]  ;;  %v8266_v48 = vpop.f32.mrf.mxu0 }
 0x3c9   :  { %v4111_v34 = vsel %vm8965_vm13, %v3964_v62, %v4110_v8  ;;  %v4114_v58 = vsel %vm8753_vm4, %v3965_v27, %v4113_v7  ;;  %v7833_v18 = vpack.c.bf16 %v3870_v1, %v3870_v1  ;;  %v3988_v41 = vor.u32 %v3986_v36, %v3985_v11  ;;  %v4146_v53 = vld [vmem:[#allocation3 + $0x68] sm:$0xf]  ;;  %v4149_v49 = vld [vmem:[#allocation3 + $0x6c] sm:$0x1]  ;;  %v4137_v7 = vld [vmem:[#allocation3 + $0x5c] sm:$0x1] }
 0x3ca   :  { %4115 = vst [vmem:[#allocation3 + $0x2c] sm:$0x1] %v4114_v58  ;;  %4112 = vst [vmem:[#allocation3 + $0x28] sm:$0xf] %v4111_v34  ;;  %v3989_v54 = vrot.slane %v3985_v11, 4  ;;  %v3969_v22 = vrot.slane %v3967_v63, 7  ;;  %v3835_v25 = vadd.f32 %v10171_v15, %v3834_v32  ;;  %v3847_v11 = vpop.f32.mrf.mxu0 }
 0x3cb   :  { %v4009_v42 = vrot.slane %v4007_v55, 7  ;;  %v3991_v9 = vshrl.u32 %v7833_v18, 16  ;;  %v3994_v20 = vshll.u32 %v7833_v18, 16  ;;  %v4129_v14 = vsel %vm8965_vm13, %v3988_v41, %v4128_v28  ;;  %v4134_v32 = vld [vmem:[#allocation3 + $0x58] sm:$0xf] }
 0x3cc   :  { %v4132_v2 = vsel %vm8753_vm4, %v3989_v54, %v4131_v30  ;;  %v3972_v57 = vor.u32 %v3970_v40, %v3969_v22  ;;  %v3973_v3 = vrot.slane %v3969_v22, 4  ;;  %4130 = vst [vmem:[#allocation3 + $0x40] sm:$0xf] %v4129_v14  ;;  %v3873_v17 = vmax.f32 %v3843_v33, 0.0  ;;  %v10253_v58 = vld [vmem:[#allocation3 + $0x10] sm:$0xf]  ;;  %v8267_v14 = vpop.f32.mrf.mxu0 }
 0x3cd   :  { %4133 = vst [vmem:[#allocation3 + $0x44] sm:$0x1] %v4132_v2  ;;  %v4012_v10 = vor.u32 %v4010_v61, %v4009_v42  ;;  %v4013_v46 = vrot.slane %v4009_v42, 4  ;;  %v3993_v4 = vrot.slane %v3991_v9, 7  ;;  %v3871_v1 = vmax.f32 %v3835_v25, 0.0 }
 0x3ce   :  { %v4117_v31 = vsel %vm8965_vm13, %v3972_v57, %v4116_v50  ;;  %v4120_v36 = vsel %vm8753_vm4, %v3973_v3, %v4119_v56  ;;  %v4233_v16 = vshrl.u32 %v4183_v29, 16  ;;  %v7836_v63 = vpack.c.bf16 %v3873_v17, %v3873_v17  ;;  %v4155_v17 = vld [vmem:[#allocation3 + $0x74] sm:$0x1]  ;;  %v4189_v24 = vld [vmem:[#allocation3 + $0x38] sm:$0xf] }
 0x3cf   :  { %4121 = vst [vmem:[#allocation3 + $0x34] sm:$0x1] %v4120_v36  ;;  %4118 = vst [vmem:[#allocation3 + $0x30] sm:$0xf] %v4117_v31  ;;  %v4147_v45 = vsel %vm8965_vm13, %v4012_v10, %v4146_v53  ;;  %v4150_v62 = vsel %vm8753_vm4, %v4013_v46, %v4149_v49  ;;  %v3996_v27 = vor.u32 %v3994_v20, %v3993_v4  ;;  %v3997_v8 = vrot.slane %v3993_v4, 4 }
 0x3d0   :  { %4151 = vst [vmem:[#allocation3 + $0x6c] sm:$0x1] %v4150_v62  ;;  %4148 = vst [vmem:[#allocation3 + $0x68] sm:$0xf] %v4147_v45  ;;  %v7834_v40 = vpack.c.bf16 %v3871_v1, %v3871_v1  ;;  %v10251_v55 = vrot.slane %v4233_v16, 4  ;;  %v4236_v34 = vshll.u32 %v4183_v29, 16  ;;  %v7577_v18 = vcombine.low %v10160_v47, %v4183_v29 }
 0x3d1   :  { %v4135_v28 = vsel %vm8965_vm13, %v3996_v27, %v4134_v32  ;;  %v4138_v61 = vsel %vm8753_vm4, %v3997_v8, %v4137_v7  ;;  %v3856_v41 = vadd.f32 %v8266_v48, %v10171_v15  ;;  %v4015_v54 = vshrl.u32 %v7836_v63, 16  ;;  %v4152_v48 = vld [vmem:[#allocation3 + $0x70] sm:$0xf]  ;;  %v4140_v53 = vld [vmem:[#allocation3 + $0x60] sm:$0xf] }
 0x3d2   :  { %4136 = vst [vmem:[#allocation3 + $0x58] sm:$0xf] %v4135_v28  ;;  %4139 = vst [vmem:[#allocation3 + $0x5c] sm:$0x1] %v4138_v61  ;;  %v4018_v30 = vshll.u32 %v7836_v63, 16  ;;  %v3999_v22 = vshrl.u32 %v7834_v40, 16  ;;  %8292 = vmatprep.mubr.msk.bf16.mxu0 %vm1070_vm14, %v7577_v18  ;;  %v3848_v33 = vadd.f32 %v10171_v15, %v3847_v11 }
 0x3d3   :  { %v4002_v42 = vshll.u32 %v7834_v40, 16  ;;  %v4238_v9 = vrot.slane %v4236_v34, 5  ;;  %v3876_v20 = vmax.f32 %v3856_v41, 0.0  ;;  %v4247_v25 = vshrl.u32 %v10253_v58, 16  ;;  %v4143_v49 = vld [vmem:[#allocation3 + $0x64] sm:$0x1] }
 0x3d4   :  { %v4017_v2 = vrot.slane %v4015_v54, 7  ;;  %v4001_v57 = vrot.slane %v3999_v22, 7  ;;  %v4250_v47 = vshll.u32 %v10253_v58, 16  ;;  %v10267_v29 = vrot.slane %v4261_v21, 4  ;;  %v3850_v21 = vpop.f32.mrf.mxu0  ;;  %v10282_v11 = vld [vmem:[#allocation3 + $0xc] sm:$0x1] }
 0x3d5   :  { %v7839_v3 = vpack.c.bf16 %v3876_v20, %v3876_v20  ;;  %v3874_v50 = vmax.f32 %v3848_v33, 0.0  ;;  %v10269_v56 = vrot.slane %v4247_v25, 4  ;;  %v4264_v10 = vshll.u32 %v10225_v43, 16  ;;  %v10286_v61 = vld [vmem:[#allocation3 + $0x20] sm:$0xf] }
 0x3d6   :  { %v4020_v46 = vor.u32 %v4018_v30, %v4017_v2  ;;  %v4021_v4 = vrot.slane %v4017_v2, 4  ;;  %v4004_v31 = vor.u32 %v4002_v42, %v4001_v57  ;;  %v4005_v36 = vrot.slane %v4001_v57, 4  ;;  %v4170_v18 = vld [vmem:[#allocation3 + $0x88] sm:$0xf]  ;;  %v8538_v42 = vld [vmem:[%s11302_s11 + $0x30] sm:$0xff]  }
 0x3d7   :  { %v4039_v1 = vshrl.u32 %v7839_v3, 16  ;;  %v4042_v16 = vshll.u32 %v7839_v3, 16  ;;  %v7837_v45 = vpack.c.bf16 %v3874_v50, %v3874_v50  ;;  %v10272_v62 = vrot.slane %v4250_v47, 5  ;;  %v4173_v25 = vld [vmem:[#allocation3 + $0x8c] sm:$0x1] }
 0x3d8   :  { %v4153_v27 = vsel %vm8965_vm13, %v4020_v46, %v4152_v48  ;;  %v4156_v8 = vsel %vm8753_vm4, %v4021_v4, %v4155_v17  ;;  %v4141_v32 = vsel %vm8965_vm13, %v4004_v31, %v4140_v53  ;;  %v4144_v7 = vsel %vm8753_vm4, %v4005_v36, %v4143_v49  ;;  %v4158_v50 = vld [vmem:[#allocation3 + $0x78] sm:$0xf] }
 0x3d9   :  { %4157 = vst [vmem:[#allocation3 + $0x74] sm:$0x1] %v4156_v8  ;;  %4154 = vst [vmem:[#allocation3 + $0x70] sm:$0xf] %v4153_v27  ;;  %v4041_v63 = vrot.slane %v4039_v1, 7  ;;  %v4023_v40 = vshrl.u32 %v7837_v45, 16  ;;  %v7578_v41 = vcombine.low %v10253_v58, %v10225_v43  ;;  %v3859_v54 = vadd.f32 %v8267_v14, %v10171_v15 }
 0x3da   :  { %4145 = vst [vmem:[#allocation3 + $0x64] sm:$0x1] %v4144_v7  ;;  %4142 = vst [vmem:[#allocation3 + $0x60] sm:$0xf] %v4141_v32  ;;  %v4026_v34 = vshll.u32 %v7837_v45, 16  ;;  %v10284_v28 = vrot.slane %v4264_v10, 5  ;;  %v3851_v30 = vadd.f32 %v10171_v15, %v3850_v21  ;;  %v4239_v22 = vor.u32 %v4238_v9, %v10251_v55 }
 0x3db   :  { %v4044_v20 = vor.u32 %v4042_v16, %v4041_v63  ;;  %v4045_v33 = vrot.slane %v4041_v63, 4  ;;  %v4025_v2 = vrot.slane %v4023_v40, 7  ;;  %v4242_v57 = vshll.u32 %v10282_v11, 16  ;;  %8293 = vmatmul.mubr.msk.bf16.vlgmr.msra.gmra.mxu0 %vm1070_vm14, %v7578_v41  ;;  %v4187_v14 = vld [vmem:[#allocation3 + $0x28] sm:$0xf]  ;;  %v10309_v36 = vld [vmem:[%s11302_s11 + $0x58] sm:$0xff]  }
 0x3dc   :  { %v3877_v47 = vmax.f32 %v3859_v54, 0.0  ;;  %v3875_v43 = vmax.f32 %v3851_v30, 0.0  ;;  %v4240_v58 = vrot.slane %v4239_v22, 4  ;;  %v4275_v15 = vshrl.u32 %v10286_v61, 16  ;;  %8329 = vmatpush3.bf16.msra.mxu0 %v10157_v37  ;;  %v4161_v10 = vld [vmem:[#allocation3 + $0x7c] sm:$0x1] }
 0x3dd   :  { %v4171_v55 = vsel %vm8965_vm13, %v4044_v20, %v4170_v18  ;;  %v4174_v9 = vsel %vm8753_vm4, %v4045_v33, %v4173_v25  ;;  %v4028_v48 = vor.u32 %v4026_v34, %v4025_v2  ;;  %v4029_v3 = vrot.slane %v4025_v2, 4  ;;  %8330 = vmatprep.subr.bf16.mxu0 %v8538_v42  ;;  %v10316_v8 = vld [vmem:[#allocation3 + $0x14] sm:$0x1]  ;;  %v10330_v30 = vld [vmem:[#allocation3 + $0x1c] sm:$0x1] }
 0x3de   :  { %4175 = vst [vmem:[#allocation3 + $0x8c] sm:$0x1] %v4174_v9  ;;  %4172 = vst [vmem:[#allocation3 + $0x88] sm:$0xf] %v4171_v55  ;;  %v7840_v46 = vpack.c.bf16 %v3877_v47, %v3877_v47  ;;  %v7838_v4 = vpack.c.bf16 %v3875_v43, %v3875_v43  ;;  %v4244_v17 = vrot.slane %v4242_v57, 5  ;;  %v10304_v31 = vrot.slane %v4275_v15, 4 }
 0x3df   :  { %v4159_v53 = vsel %vm8965_vm13, %v4028_v48, %v4158_v50  ;;  %v4162_v37 = vsel %vm8753_vm4, %v4029_v3, %v4161_v10  ;;  %v4278_v49 = vshll.u32 %v10286_v61, 16  ;;  %v4289_v1 = vshrl.u32 %v4187_v14, 16  ;;  %v4176_v22 = vld [vmem:[#allocation3 + $0x90] sm:$0xf]  ;;  %v4179_v20 = vld [vmem:[#allocation3 + $0x94] sm:$0x1] }
 0x3e0   :  { %4163 = vst [vmem:[#allocation3 + $0x7c] sm:$0x1] %v4162_v37  ;;  %4160 = vst [vmem:[#allocation3 + $0x78] sm:$0xf] %v4159_v53  ;;  %v4047_v16 = vshrl.u32 %v7840_v46, 16  ;;  %v4050_v45 = vshll.u32 %v7840_v46, 16  ;;  %v4245_v32 = vsel %vm8933_vm11, %v4240_v58, %v4244_v17  ;;  %8331 = vmatpush3.bf16.msra.mxu0 %v8538_v42  ;;  %v7579_v54 = vcombine.low %v10286_v61, %v4187_v14 }
 0x3e1   :  { %v4031_v21 = vshrl.u32 %v7838_v4, 16  ;;  %v4034_v27 = vshll.u32 %v7838_v4, 16  ;;  %v10320_v7 = vrot.slane %v4278_v49, 5  ;;  %v10322_v63 = vrot.slane %v4289_v1, 4  ;;  %8368 = vmatprep.subr.bf16.mxu0 %v10309_v36  ;;  %v4164_v33 = vld [vmem:[#allocation3 + $0x80] sm:$0xf] }
 0x3e2   :  { %v4292_v40 = vshll.u32 %v4187_v14, 16  ;;  %v4049_v34 = vrot.slane %v4047_v16, 7  ;;  %v7559_v41 = vcombine.low %v4231_v19, %v4245_v32  ;;  %v4167_v25 = vld [vmem:[#allocation3 + $0x84] sm:$0x1]  ;;  %v4253_v42 = vor.u32 %v10272_v62, %v10269_v56  ;;  %8296 = vmatprep.mubr.msk.bf16.mxu0 %vm1070_vm14, %v7579_v54  ;;  %v4188_v58 = vld [vmem:[#allocation3 + $0x30] sm:$0xf] }
 0x3e3   :  { %v4033_v18 = vrot.slane %v4031_v21, 7  ;;  %v4256_v57 = vshll.u32 %v10316_v8, 16  ;;  %v4267_v59 = vor.u32 %v10284_v28, %v10267_v29  ;;  %v4270_v56 = vshll.u32 %v10330_v30, 16  ;;  %v4191_v62 = vld [vmem:[#allocation3 + $0x58] sm:$0xf] }
 0x3e4   :  { %v10333_v2 = vrot.slane %v4292_v40, 5  ;;  %v4052_v19 = vor.u32 %v4050_v45, %v4049_v34  ;;  %v4053_v61 = vrot.slane %v4049_v34, 4  ;;  %8272 = vmatprep.mubr.msk.bf16.mxu1 %vm1070_vm14, %v7559_v41  ;;  %v4254_v14 = vrot.slane %v4253_v42, 4  ;;  %v10353_v4 = vld [vmem:[#allocation3 + $0x24] sm:$0x1] }
 0x3e5   :  { %v4036_v47 = vor.u32 %v4034_v27, %v4033_v18  ;;  %v4037_v43 = vrot.slane %v4033_v18, 4  ;;  %v4258_v15 = vrot.slane %v4256_v57, 5  ;;  %v4268_v55 = vrot.slane %v4267_v59, 4  ;;  %v10355_v49 = vld [vmem:[#allocation3 + $0x2c] sm:$0x1]  ;;  %v8535_v41 = vld [vmem:[%s11302_s11 + $0x20] sm:$0xff]  }
 0x3e6   :  { %v4177_v9 = vsel %vm8965_vm13, %v4052_v19, %v4176_v22  ;;  %v4180_v29 = vsel %vm8753_vm4, %v4053_v61, %v4179_v20  ;;  %v4272_v50 = vrot.slane %v4270_v56, 5  ;;  %v4303_v10 = vshrl.u32 %v4188_v58, 16  ;;  %v4192_v45 = vld [vmem:[#allocation3 + $0x60] sm:$0xf]  ;;  %v4193_v18 = vld [vmem:[#allocation3 + $0x68] sm:$0xf] }
 0x3e7   :  { %v4165_v28 = vsel %vm8965_vm13, %v4036_v47, %v4164_v33  ;;  %v4168_v48 = vsel %vm8753_vm4, %v4037_v43, %v4167_v25  ;;  %4178 = vst [vmem:[#allocation3 + $0x90] sm:$0xf] %v4177_v9  ;;  %4181 = vst [vmem:[#allocation3 + $0x94] sm:$0x1] %v4180_v29  ;;  %v4259_v3 = vsel %vm8933_vm11, %v4254_v14, %v4258_v15  ;;  %v4306_v46 = vshll.u32 %v4188_v58, 16 }
 0x3e8   :  { %4169 = vst [vmem:[#allocation3 + $0x84] sm:$0x1] %v4168_v48  ;;  %4166 = vst [vmem:[#allocation3 + $0x80] sm:$0xf] %v4165_v28  ;;  %v4317_v17 = vshrl.u32 %v4189_v24, 16  ;;  %v4320_v53 = vshll.u32 %v4189_v24, 16  ;;  %v7580_v37 = vcombine.low %v4188_v58, %v4189_v24  ;;  %v4273_v26 = vsel %vm8933_vm11, %v4268_v55, %v4272_v50 }
 0x3e9   :  { %v4345_v23 = vshrl.u32 %v4191_v62, 16  ;;  %v4305_v1 = vrot.slane %v4303_v10, 4  ;;  %v4348_v16 = vshll.u32 %v4191_v62, 16  ;;  %v10365_v21 = vsel %vm8944_vm12, %v7603_v12, %v4859_v35  ;;  %v10381_v25 = vld [vmem:[#allocation3 + $0x3c] sm:$0x1] }
 0x3ea   :  { %v7560_v27 = vcombine.low %v4259_v3, %v4273_v26  ;;  %v4308_v32 = vrot.slane %v4306_v46, 5  ;;  %v4319_v40 = vrot.slane %v4317_v17, 4  ;;  %v4322_v34 = vrot.slane %v4320_v53, 5  ;;  %8297 = vmatmul.mubr.msk.bf16.gmra.mxu0 %vm1070_vm14, %v7580_v37  ;;  %v4194_v61 = vld [vmem:[#allocation3 + $0x70] sm:$0xf] }
 0x3eb   :  { %v10371_v54 = vrot.slane %v4345_v23, 4  ;;  %v7581_v13 = vcombine.low %v10162_v6, %v4191_v62  ;;  %v4281_v38 = vor.u32 %v10320_v7, %v10304_v31  ;;  %v4284_v12 = vshll.u32 %v10353_v4, 16  ;;  %v10386_v6 = vld [vmem:[%s11302_s11 + $0x48] sm:$0xff]   ;;  %v4195_v14 = vld [vmem:[#allocation3 + $0x78] sm:$0xf] }
 0x3ec   :  { %8273 = vmatmul.mubr.msk.bf16.vlgmr.msra.gmra.mxu1 %vm1070_vm14, %v7560_v27  ;;  %v4295_v35 = vor.u32 %v10333_v2, %v10322_v63  ;;  %v4298_v22 = vshll.u32 %v10355_v49, 16  ;;  %v4359_v20 = vshrl.u32 %v4192_v45, 16  ;;  %v4362_v33 = vshll.u32 %v4192_v45, 16  ;;  %v10390_v63 = vld [vmem:[#allocation3 + $0x34] sm:$0x1] }
 0x3ed   :  { %8309 = vmatpush3.bf16.msra.mxu1 %v10151_v52  ;;  %v4350_v31 = vrot.slane %v4348_v16, 5  ;;  %8300 = vmatprep.mubr.msk.bf16.mxu0 %vm1070_vm14, %v7581_v13  ;;  %v4282_v7 = vrot.slane %v4281_v38, 4  ;;  %v4286_v42 = vrot.slane %v4284_v12, 5  ;;  %v4373_v57 = vshrl.u32 %v4193_v18, 16  ;;  %v10402_v3 = vld [vmem:[#allocation3 + $0x5c] sm:$0x1] }
 0x3ee   :  { %v4296_v2 = vrot.slane %v4295_v35, 4  ;;  %v4300_v59 = vrot.slane %v4298_v22, 5  ;;  %v10392_v24 = vrot.slane %v4359_v20, 4  ;;  %v4376_v19 = vshll.u32 %v4193_v18, 16  ;;  %8310 = vmatprep.subr.bf16.mxu1 %v8535_v41  ;;  %v4197_v16 = vld [vmem:[#allocation3 + $0x88] sm:$0xf] }
 0x3ef   :  { %v4287_v47 = vsel %vm8933_vm11, %v4282_v7, %v4286_v42  ;;  %v4364_v43 = vrot.slane %v4362_v33, 5  ;;  %v10396_v52 = vrot.slane %v4373_v57, 4  ;;  %v7582_v58 = vcombine.low %v4192_v45, %v4193_v18  ;;  %v4196_v53 = vld [vmem:[#allocation3 + $0x80] sm:$0xf]  ;;  %v10413_v38 = vld [vmem:[#allocation3 + $0x64] sm:$0x1] }
 0x3f0   :  { %v4301_v15 = vsel %vm8933_vm11, %v4296_v2, %v4300_v59  ;;  %v4309_v55 = vor.u32 %v4308_v32, %v4305_v1  ;;  %v4312_v56 = vshll.u32 %v10390_v63, 16  ;;  %v4323_v62 = vor.u32 %v4322_v34, %v4319_v40  ;;  %v10416_v33 = vld [vmem:[#allocation3 + $0x6c] sm:$0x1] }
 0x3f1   :  { %v7561_v9 = vcombine.low %v4287_v47, %v4301_v15  ;;  %v4326_v29 = vshll.u32 %v10381_v25, 16  ;;  %v4387_v28 = vshrl.u32 %v4194_v61, 16  ;;  %v4390_v48 = vshll.u32 %v4194_v61, 16  ;;  %8311 = vmatpush3.bf16.msra.mxu1 %v8535_v41 }
 0x3f2   :  { %8301 = vmatmul.mubr.msk.bf16.gmra.mxu0 %vm1070_vm14, %v7582_v58  ;;  %v4310_v50 = vrot.slane %v4309_v55, 4  ;;  %v4314_v10 = vrot.slane %v4312_v56, 5  ;;  %v4324_v46 = vrot.slane %v4323_v62, 4  ;;  %v4401_v17 = vshrl.u32 %v4195_v14, 16  ;;  %8348 = vmatprep.subr.bf16.mxu1 %v10386_v6  ;;  %v10425_v55 = vld [vmem:[#allocation3 + $0x74] sm:$0x1] }
 0x3f3   :  { %8276 = vmatprep.mubr.msk.bf16.mxu1 %vm1070_vm14, %v7561_v9  ;;  %v4378_v37 = vrot.slane %v4376_v19, 5  ;;  %v4328_v23 = vrot.slane %v4326_v29, 5  ;;  %v4389_v26 = vrot.slane %v4387_v28, 4  ;;  %v4404_v1 = vshll.u32 %v4195_v14, 16  ;;  %v10427_v56 = vld [vmem:[#allocation3 + $0x7c] sm:$0x1] }
 0x3f4   :  { %v4315_v45 = vsel %vm8933_vm11, %v4310_v50, %v4314_v10  ;;  %v4392_v27 = vrot.slane %v4390_v48, 5  ;;  %v7583_v32 = vcombine.low %v4194_v61, %v4195_v14  ;;  %v4351_v40 = vor.u32 %v4350_v31, %v10371_v54  ;;  %v8537_v61 = vld [vmem:[#allocation3 + $0x8] ss:$8 sps:$4 sm:$0xff]   ;;  %v10435_v29 = vld [vmem:[#allocation3 + $0x84] sm:$0x1] }
 0x3f5   :  { %v4329_v34 = vsel %vm8933_vm11, %v4324_v46, %v4328_v23  ;;  %v4403_v18 = vrot.slane %v4401_v17, 4  ;;  %v4354_v41 = vshll.u32 %v10402_v3, 16  ;;  %v4415_v13 = vshrl.u32 %v4196_v53, 16  ;;  %v10444_v46 = vld [vmem:[#allocation3 + $0x8c] sm:$0x1] }
 0x3f6   :  { %v7562_v12 = vcombine.low %v4315_v45, %v4329_v34  ;;  %8304 = vmatprep.mubr.msk.bf16.mxu0 %vm1070_vm14, %v7583_v32  ;;  %v4352_v35 = vrot.slane %v4351_v40, 4  ;;  %v4418_v22 = vshll.u32 %v4196_v53, 16  ;;  %v4429_v20 = vshrl.u32 %v4197_v16, 16  ;;  %v8539_v32 = vld [vmem:[#allocation3 + $0x18] ss:$8 sps:$4 sm:$0xff]  }
 0x3f7   :  { %v4406_v7 = vrot.slane %v4404_v1, 5  ;;  %v4356_v42 = vrot.slane %v4354_v41, 5  ;;  %v4432_v54 = vshll.u32 %v4197_v16, 16  ;;  %v7584_v31 = vcombine.low %v4196_v53, %v4197_v16 }
 0x3f8   :  { %8277 = vmatmul.mubr.msk.bf16.gmra.mxu1 %vm1070_vm14, %v7562_v12  ;;  %v4417_v57 = vrot.slane %v4415_v13, 4  ;;  %v4420_v2 = vrot.slane %v4418_v22, 5  ;;  %v4365_v59 = vor.u32 %v4364_v43, %v10392_v24  ;;  %v4368_v19 = vshll.u32 %v10413_v38, 16  ;;  %v4779_v13 = vld [vmem:[#allocation3 + $0x10] sm:$0xe] }
 0x3f9   :  { %v4357_v47 = vsel %vm8933_vm11, %v4352_v35, %v4356_v42  ;;  %v4431_v58 = vrot.slane %v4429_v20, 4  ;;  %v4379_v14 = vor.u32 %v4378_v37, %v10396_v52  ;;  %v4382_v15 = vshll.u32 %v10416_v33, 16  ;;  %v4781_v42 = vld [vmem:[#allocation3 + $0x20] sm:$0xe] }
 0x3fa   :  { %v7563_v24 = vcombine.low %v4343_v39, %v4357_v47  ;;  %v4434_v43 = vrot.slane %v4432_v54, 5  ;;  %8305 = vmatmul.mubr.msk.bf16.gmra.mxu0 %vm1070_vm14, %v7584_v31  ;;  %v4366_v62 = vrot.slane %v4365_v59, 4  ;;  %v4370_v9 = vrot.slane %v4368_v19, 5  ;;  %v8540_v59 = vld [vmem:[#allocation3 + $0x28] ss:$8 sps:$4 sm:$0xff]  }
 0x3fb   :  { %v4380_v52 = vrot.slane %v4379_v14, 4  ;;  %v4384_v28 = vrot.slane %v4382_v15, 5  ;;  %v4867_v48 = vrot.slane %v10413_v38, 5  ;;  %8332 = vmatprep.mubr.msk.bf16.mxu0 %vm1070_vm14, %v8537_v61  ;;  %v4393_v50 = vor.u32 %v4392_v27, %v4389_v26  ;;  %v4778_v26 = vld [vmem:[#allocation3 + $0x8] sm:$0xe]  ;;  %v8549_v19 = vld [vmem:[%s11302_s11 + $0x50] sm:$0xff]  }
 0x3fc   :  { %8280 = vmatprep.mubr.msk.bf16.mxu1 %vm1070_vm14, %v7563_v24  ;;  %v4371_v51 = vsel %vm8933_vm11, %v4366_v62, %v4370_v9  ;;  %v4396_v0 = vshll.u32 %v10425_v55, 16  ;;  %v4407_v39 = vor.u32 %v4406_v7, %v4403_v18  ;;  %v4410_v10 = vshll.u32 %v10427_v56, 16  ;;  %v4780_v7 = vld [vmem:[#allocation3 + $0x18] sm:$0xe]  ;;  %v4782_v15 = vld [vmem:[#allocation3 + $0x28] sm:$0xe] }
 0x3fd   :  { %v4385_v17 = vsel %vm8933_vm11, %v4380_v52, %v4384_v28  ;;  %v4394_v53 = vrot.slane %v4393_v50, 4  ;;  %v4421_v37 = vor.u32 %v4420_v2, %v4417_v57  ;;  %v4424_v23 = vshll.u32 %v10435_v29, 16  ;;  %v4784_v24 = vld [vmem:[#allocation3 + $0x38] sm:$0xe]  ;;  %v4783_v28 = vld [vmem:[#allocation3 + $0x30] sm:$0xe] }
 0x3fe   :  { %v7564_v1 = vcombine.low %v4371_v51, %v4385_v17  ;;  %v4398_v16 = vrot.slane %v4396_v0, 5  ;;  %v4408_v45 = vrot.slane %v4407_v39, 4  ;;  %v4412_v27 = vrot.slane %v4410_v10, 5  ;;  %v4786_v0 = vld [vmem:[#allocation3 + $0x58] sm:$0xe] }
 0x3ff   :  { %v4422_v40 = vrot.slane %v4421_v37, 4  ;;  %v4426_v34 = vrot.slane %v4424_v23, 5  ;;  %v4435_v18 = vor.u32 %v4434_v43, %v4431_v58  ;;  %v4438_v41 = vshll.u32 %v10444_v46, 16  ;;  %v4788_v39 = vld [vmem:[#allocation3 + $0x68] sm:$0xe] }
 0x400   :  { %8281 = vmatmul.mubr.msk.bf16.gmra.mxu1 %vm1070_vm14, %v7564_v1  ;;  %v4871_v12 = vrot.slane %v10416_v33, 5  ;;  %v4399_v35 = vsel %vm8933_vm11, %v4394_v53, %v4398_v16  ;;  %v4413_v22 = vsel %vm8933_vm11, %v4408_v45, %v4412_v27  ;;  %v4883_v20 = vrot.slane %v10435_v29, 5  ;;  %v10478_v10 = vld [vmem:[#allocation3 + $0xc] sm:$0x1]  ;;  %v4787_v23 = vld [vmem:[#allocation3 + $0x60] sm:$0xe] }
 0x401   :  { %v7565_v54 = vcombine.low %v4399_v35, %v4413_v22  ;;  %v4427_v31 = vsel %vm8933_vm11, %v4422_v40, %v4426_v34  ;;  %v4436_v57 = vrot.slane %v4435_v18, 4  ;;  %v4440_v2 = vrot.slane %v4438_v41, 5  ;;  %v10495_v27 = vld [vmem:[#allocation3 + $0x14] sm:$0x1]  ;;  %v5712_v41 = vld [vmem:[#allocation3 + $0x10] sm:$0xe] }
 0x402   :  { %8333 = vmatmul.mubr.msk.bf16.vlgmr.msra.gmra.mxu0 %vm1070_vm14, %v8539_v32  ;;  %v7596_v61 = vrot.slane %v4778_v26, 9  ;;  %v4831_v47 = vrot.slane %v10282_v11, 5  ;;  %v7597_v58 = vrot.slane %v4779_v13, 9  ;;  %v4835_v14 = vrot.slane %v10316_v8, 5  ;;  %v8541_v26 = vld [vmem:[#allocation3 + $0x38] ss:$8 sps:$4 sm:$0xff]  }
 0x403   :  { %8284 = vmatprep.mubr.msk.bf16.mxu1 %vm1070_vm14, %v7565_v54  ;;  %v4441_v43 = vsel %vm8933_vm11, %v4436_v57, %v4440_v2  ;;  %8336 = vmatprep.mubr.msk.bf16.mxu0 %vm1070_vm14, %v8540_v59  ;;  %v7598_v62 = vrot.slane %v4780_v7, 9  ;;  %v4839_v9 = vrot.slane %v10330_v30, 5  ;;  %v7599_v52 = vrot.slane %v4781_v42, 9  ;;  %v5711_v32 = vld [vmem:[#allocation3 + $0x8] sm:$0xe] }
 0x404   :  { %v7566_v50 = vcombine.low %v4427_v31, %v4441_v43  ;;  %v4832_v11 = vsel %vm8944_vm12, %v7596_v61, %v4831_v47  ;;  %v10474_v8 = vsel %vm8944_vm12, %v7597_v58, %v4835_v14  ;;  %v4843_v51 = vrot.slane %v10353_v4, 5  ;;  %8369 = vmatpush3.bf16.msra.mxu0 %v10309_v36  ;;  %v10489_v4 = vld [vmem:[%s11302_s11 + $0x78] sm:$0xff]   ;;  %v4789_v7 = vld [vmem:[#allocation3 + $0x70] sm:$0xe]  ;;  %v10518_v59 = vld [vmem:[#allocation3 + $0x24] sm:$0x1] }
 0x405   :  { %v4887_v30 = vrot.slane %v10444_v46, 5  ;;  %v10483_v17 = vsel %vm8944_vm12, %v7598_v62, %v4839_v9  ;;  %v7600_v53 = vrot.slane %v4782_v15, 9  ;;  %v4847_v37 = vrot.slane %v10355_v49, 5  ;;  %8370 = vmatprep.subr.bf16.mxu0 %v8549_v19  ;;  %v10510_v42 = vld [vmem:[#allocation3 + $0x1c] sm:$0x1]  ;;  %v10616_v46 = vld [vmem:[%s11302_s11 + $0x68] sm:$0xff]  }
 0x406   :  { %v7615_v36 = vcombine.low %v10199_v60, %v4832_v11  ;;  %v7616_v1 = vcombine.low %v10474_v8, %v10483_v17  ;;  %v7601_v16 = vrot.slane %v4783_v28, 9  ;;  %v4851_v45 = vrot.slane %v10390_v63, 5  ;;  %v8543_v60 = vld [vmem:[#allocation3 + $0x58] ss:$8 sps:$4 sm:$0xff]  }
 0x407   :  { %v10499_v49 = vsel %vm8944_vm12, %v7600_v53, %v4847_v37  ;;  %v7602_v40 = vrot.slane %v4784_v24, 9  ;;  %v4855_v34 = vrot.slane %v10381_v25, 5  ;;  %v7604_v18 = vrot.slane %v4786_v0, 9  ;;  %v4790_v2 = vld [vmem:[#allocation3 + $0x78] sm:$0xe]  ;;  %v8547_v53 = vld [vmem:[%s11302_s11 + $0x40] sm:$0xff]  }
 0x408   :  { %8285 = vmatmul.mubr.msk.bf16.gmra.mxu1 %vm1070_vm14, %v7566_v50  ;;  %v4844_v13 = vsel %vm8944_vm12, %v7599_v52, %v4843_v51  ;;  %v10507_v63 = vsel %vm8944_vm12, %v7601_v16, %v4851_v45  ;;  %v4863_v35 = vrot.slane %v10402_v3, 5  ;;  %v7605_v22 = vrot.slane %v4787_v23, 9  ;;  %8371 = vmatpush3.bf16.msra.mxu0 %v8549_v19  ;;  %v5713_v58 = vld [vmem:[#allocation3 + $0x18] sm:$0xe]  ;;  %v5714_v14 = vld [vmem:[#allocation3 + $0x20] sm:$0xe] }
 0x409   :  { %8312 = vmatprep.mubr.msk.bf16.mxu1 %vm1070_vm14, %v7615_v36  ;;  %v10515_v25 = vsel %vm8944_vm12, %v7602_v40, %v4855_v34  ;;  %v7606_v54 = vrot.slane %v4788_v39, 9  ;;  %v7677_v31 = vrot.slane %v5711_v32, 9  ;;  %v5761_v57 = vrot.slane %v10478_v10, 5  ;;  %8408 = vmatprep.subr.bf16.mxu0 %v10489_v4  ;;  %v4791_v9 = vld [vmem:[#allocation3 + $0x80] sm:$0xe] }
 0x40a   :  { %8337 = vmatmul.mubr.msk.bf16.gmra.mxu0 %vm1070_vm14, %v8541_v26  ;;  %v7617_v3 = vcombine.low %v4844_v13, %v10499_v49  ;;  %v7618_v19 = vcombine.low %v10507_v63, %v10515_v25  ;;  %v10527_v61 = vsel %vm8944_vm12, %v7604_v18, %v4863_v35  ;;  %v7678_v47 = vrot.slane %v5712_v41, 9  ;;  %v4792_v52 = vld [vmem:[#allocation3 + $0x88] sm:$0xe]  ;;  %v5716_v26 = vld [vmem:[#allocation3 + $0x30] sm:$0xe] }
 0x40b   :  { %8340 = vmatprep.mubr.msk.bf16.mxu0 %vm1070_vm14, %v8543_v60  ;;  %v7619_v15 = vcombine.low %v10365_v21, %v10527_v61  ;;  %v10536_v24 = vsel %vm8944_vm12, %v7605_v22, %v4867_v48  ;;  %v10542_v43 = vsel %vm8944_vm12, %v7606_v54, %v4871_v12  ;;  %v5765_v62 = vrot.slane %v10495_v27, 5  ;;  %v10550_v48 = vld [vmem:[#allocation3 + $0x2c] sm:$0x1]  ;;  %v5715_v39 = vld [vmem:[#allocation3 + $0x28] sm:$0xe] }
 0x40c   :  { %v10547_v28 = vsel %vm8944_vm12, %v7677_v31, %v5761_v57  ;;  %v7607_v50 = vrot.slane %v4789_v7, 9  ;;  %v4875_v38 = vrot.slane %v10425_v55, 5  ;;  %v7608_v11 = vrot.slane %v4790_v2, 9  ;;  %v10574_v49 = vld [vmem:[#allocation3 + $0x34] sm:$0x1] }
 0x40d   :  { %v10554_v33 = vsel %vm8944_vm12, %v7678_v47, %v5765_v62  ;;  %v4879_v12 = vrot.slane %v10427_v56, 5  ;;  %v7679_v51 = vrot.slane %v5713_v58, 9  ;;  %v5769_v0 = vrot.slane %v10510_v42, 5  ;;  %v5277_v40 = vld [vmem:[#allocation3 + $0x8] sm:$0xf] }
 0x40e   :  { %v7620_v55 = vcombine.low %v10536_v24, %v10542_v43  ;;  %v7697_v37 = vcombine.low %v10547_v28, %v10554_v33  ;;  %v7680_v23 = vrot.slane %v5714_v14, 9  ;;  %v5773_v36 = vrot.slane %v10518_v59, 5  ;;  %v8544_v34 = vld [vmem:[#allocation3 + $0x68] ss:$8 sps:$4 sm:$0xff]   ;;  %v8545_v8 = vld [vmem:[#allocation3 + $0x78] ss:$8 sps:$4 sm:$0xff]  }
 0x40f   :  { %v10568_v56 = vsel %vm8944_vm12, %v7607_v50, %v4875_v38  ;;  %v10572_v16 = vsel %vm8944_vm12, %v7608_v11, %v4879_v12  ;;  %v7609_v45 = vrot.slane %v4791_v9, 9  ;;  %v7610_v32 = vrot.slane %v4792_v52, 9  ;;  %v5279_v35 = vld [vmem:[#allocation3 + $0x10] sm:$0xf]  ;;  %v10611_v57 = vld [vmem:[#allocation3 + $0x3c] sm:$0x1] }
 0x410   :  { %8313 = vmatmul.mubr.msk.bf16.vlgmr.msra.gmra.mxu1 %vm1070_vm14, %v7616_v1  ;;  %v10582_v18 = vsel %vm8944_vm12, %v7679_v51, %v5769_v0  ;;  %v10586_v41 = vsel %vm8944_vm12, %v7680_v23, %v5773_v36  ;;  %v7681_v60 = vrot.slane %v5715_v39, 9  ;;  %v5777_v13 = vrot.slane %v10550_v48, 5  ;;  %v5718_v58 = vld [vmem:[#allocation3 + $0x40] sm:$0xe]  ;;  %v10628_v52 = vld [vmem:[#allocation3 + $0x44] sm:$0x1] }
 0x411   :  { %8349 = vmatpush3.bf16.msra.mxu1 %v10386_v6  ;;  %8316 = vmatprep.mubr.msk.bf16.mxu1 %vm1070_vm14, %v7617_v3  ;;  %v7621_v17 = vcombine.low %v10568_v56, %v10572_v16  ;;  %v10597_v1 = vsel %vm8944_vm12, %v7609_v45, %v4883_v20  ;;  %v10603_v22 = vsel %vm8944_vm12, %v7610_v32, %v4887_v30  ;;  %v7682_v7 = vrot.slane %v5716_v26, 9  ;;  %v5717_v6 = vld [vmem:[#allocation3 + $0x38] sm:$0xe]  ;;  %v5283_v0 = vld [vmem:[#allocation3 + $0x20] sm:$0xf] }
 0x412   :  { %8341 = vmatmul.mubr.msk.bf16.gmra.mxu0 %vm1070_vm14, %v8544_v34  ;;  %8350 = vmatprep.subr.bf16.mxu1 %v8547_v53  ;;  %v7698_v54 = vcombine.low %v10582_v18, %v10586_v41  ;;  %v7622_v29 = vcombine.low %v10597_v1, %v10603_v22  ;;  %v5781_v20 = vrot.slane %v10574_v49, 5  ;;  %v5310_v31 = vshrl.u32 %v5277_v40, 16  ;;  %v5281_v38 = vld [vmem:[#allocation3 + $0x18] sm:$0xf]  ;;  %v8546_v39 = vld [vmem:[#allocation3 + $0x88] ss:$8 sps:$4 sm:$0xff]  }
 0x413   :  { %8344 = vmatprep.mubr.msk.bf16.mxu0 %vm1070_vm14, %v8545_v8  ;;  %v5313_v30 = vshll.u32 %v5277_v40, 16  ;;  %v5319_v2 = vshll.u32 %v10478_v10, 16  ;;  %v5324_v3 = vshrl.u32 %v5279_v35, 16  ;;  %v5327_v47 = vshll.u32 %v5279_v35, 16  ;;  %v10645_v8 = vld [vmem:[#allocation3 + $0x5c] sm:$0x1] }
 0x414   :  { %v10622_v14 = vsel %vm8944_vm12, %v7681_v60, %v5777_v13  ;;  %v10626_v62 = vsel %vm8944_vm12, %v7682_v7, %v5781_v20  ;;  %v5312_v9 = vrot.slane %v5310_v31, 4  ;;  %v7683_v50 = vrot.slane %v5717_v6, 9  ;;  %v5719_v7 = vld [vmem:[#allocation3 + $0x58] sm:$0xe]  ;;  %v10655_v20 = vld [vmem:[#allocation3 + $0x64] sm:$0x1] }
 0x415   :  { %8351 = vmatpush3.bf16.msra.mxu1 %v8547_v53  ;;  %v7699_v10 = vcombine.low %v10622_v14, %v10626_v62  ;;  %v5315_v11 = vrot.slane %v5313_v30, 5  ;;  %v5326_v12 = vrot.slane %v5324_v3, 4  ;;  %v5333_v51 = vshll.u32 %v10495_v27, 16  ;;  %v5720_v31 = vld [vmem:[#allocation3 + $0x60] sm:$0xe] }
 0x416   :  { %v5321_v23 = vrot.slane %v5319_v2, 5  ;;  %v5329_v36 = vrot.slane %v5327_v47, 5  ;;  %v5785_v26 = vrot.slane %v10611_v57, 5  ;;  %v7684_v45 = vrot.slane %v5718_v58, 9  ;;  %8388 = vmatprep.subr.bf16.mxu1 %v10616_v46  ;;  %v5285_v61 = vld [vmem:[#allocation3 + $0x28] sm:$0xf] }
 0x417   :  { %v5316_v32 = vor.u32 %v5315_v11, %v5312_v9  ;;  %v5789_v40 = vrot.slane %v10628_v52, 5  ;;  %v5338_v53 = vshrl.u32 %v5281_v38, 16  ;;  %v5341_v34 = vshll.u32 %v5281_v38, 16  ;;  %v5287_v9 = vld [vmem:[#allocation3 + $0x30] sm:$0xf] }
 0x418   :  { %8317 = vmatmul.mubr.msk.bf16.gmra.mxu1 %vm1070_vm14, %v7618_v19  ;;  %v5330_v27 = vor.u32 %v5329_v36, %v5326_v12  ;;  %v10642_v60 = vsel %vm8944_vm12, %v7683_v50, %v5785_v26  ;;  %v5347_v13 = vshll.u32 %v10510_v42, 16  ;;  %v5352_v35 = vshrl.u32 %v5283_v0, 16  ;;  %v10673_v26 = vld [vmem:[#allocation3 + $0x6c] sm:$0x1]  ;;  %v5295_v1 = vld [vmem:[#allocation3 + $0x60] sm:$0xf] }
 0x419   :  { %8320 = vmatprep.mubr.msk.bf16.mxu1 %vm1070_vm14, %v7619_v15  ;;  %v5317_v6 = vrot.slane %v5316_v32, 4  ;;  %v10653_v63 = vsel %vm8944_vm12, %v7684_v45, %v5789_v40  ;;  %v5340_v25 = vrot.slane %v5338_v53, 4  ;;  %v5343_v19 = vrot.slane %v5341_v34, 5  ;;  %v10680_v53 = vld [vmem:[#allocation3 + $0x74] sm:$0x1] }
 0x41a   :  { %8345 = vmatmul.mubr.msk.bf16.gmra.mxu0 %vm1070_vm14, %v8546_v39  ;;  %v5331_v42 = vrot.slane %v5330_v27, 4  ;;  %v5335_v30 = vrot.slane %v5333_v51, 5  ;;  %v7700_v2 = vcombine.low %v10642_v60, %v10653_v63  ;;  %v5354_v21 = vrot.slane %v5352_v35, 4  ;;  %v5721_v34 = vld [vmem:[#allocation3 + $0x68] sm:$0xe] }
 0x41b   :  { %8372 = vmatprep.mubr.msk.bf16.mxu0 %vm1070_vm14, %v7697_v37  ;;  %v5322_v15 = vsel %vm8933_vm11, %v5317_v6, %v5321_v23  ;;  %v5344_v3 = vor.u32 %v5343_v19, %v5340_v25  ;;  %v5355_v47 = vshll.u32 %v5283_v0, 16  ;;  %v5361_v58 = vshll.u32 %v10518_v59, 16  ;;  %v5722_v6 = vld [vmem:[#allocation3 + $0x70] sm:$0xe]  ;;  %v5289_v19 = vld [vmem:[#allocation3 + $0x38] sm:$0xf] }
 0x41c   :  { %v5336_v50 = vsel %vm8933_vm11, %v5331_v42, %v5335_v30  ;;  %v7685_v38 = vrot.slane %v5719_v7, 9  ;;  %v5793_v11 = vrot.slane %v10645_v8, 5  ;;  %v7686_v12 = vrot.slane %v5720_v31, 9 }
 0x41d   :  { %v10670_v51 = vcombine.low %v5322_v15, %v5336_v50  ;;  %v5345_v28 = vrot.slane %v5344_v3, 4  ;;  %v5349_v33 = vrot.slane %v5347_v13, 5  ;;  %v5357_v37 = vrot.slane %v5355_v47, 5  ;;  %v5291_v15 = vld [vmem:[#allocation3 + $0x40] sm:$0xf] }
 0x41e   :  { %v5363_v39 = vrot.slane %v5361_v58, 5  ;;  %v5797_v23 = vrot.slane %v10655_v20, 5  ;;  %v5366_v36 = vshrl.u32 %v5285_v61, 16  ;;  %v5369_v0 = vshll.u32 %v5285_v61, 16  ;;  %v10721_v47 = vld [vmem:[#allocation3 + $0x7c] sm:$0x1] }
 0x41f   :  { %v5358_v59 = vor.u32 %v5357_v37, %v5354_v21  ;;  %v10677_v45 = vsel %vm8944_vm12, %v7685_v38, %v5793_v11  ;;  %v5375_v32 = vshll.u32 %v10550_v48, 16  ;;  %v5380_v40 = vshrl.u32 %v5287_v9, 16  ;;  %v8553_v48 = vld [vmem:[%s11302_s11 + $0x70] sm:$0xff]   ;;  %v10723_v58 = vld [vmem:[#allocation3 + $0x84] sm:$0x1] }
 0x420   :  { %8321 = vmatmul.mubr.msk.bf16.gmra.mxu1 %vm1070_vm14, %v7620_v55  ;;  %v10688_v27 = vsel %vm8944_vm12, %v7686_v12, %v5797_v23  ;;  %v5368_v13 = vrot.slane %v5366_v36, 4  ;;  %v5371_v35 = vrot.slane %v5369_v0, 5  ;;  %v5383_v7 = vshll.u32 %v5287_v9, 16  ;;  %v5723_v11 = vld [vmem:[#allocation3 + $0x78] sm:$0xe] }
 0x421   :  { %8324 = vmatprep.mubr.msk.bf16.mxu1 %vm1070_vm14, %v7621_v17  ;;  %v5350_v24 = vsel %vm8933_vm11, %v5345_v28, %v5349_v33  ;;  %v5359_v43 = vrot.slane %v5358_v59, 4  ;;  %v7701_v55 = vcombine.low %v10677_v45, %v10688_v27  ;;  %v5382_v25 = vrot.slane %v5380_v40, 4  ;;  %v5293_v59 = vld [vmem:[#allocation3 + $0x58] sm:$0xf] }
 0x422   :  { %8373 = vmatmul.mubr.msk.bf16.vlgmr.msra.gmra.mxu0 %vm1070_vm14, %v7698_v54  ;;  %v5372_v31 = vor.u32 %v5371_v35, %v5368_v13  ;;  %v5385_v42 = vrot.slane %v5383_v7, 5  ;;  %v5389_v56 = vshll.u32 %v10574_v49, 16  ;;  %v7687_v16 = vrot.slane %v5721_v34, 9 }
 0x423   :  { %8376 = vmatprep.mubr.msk.bf16.mxu0 %vm1070_vm14, %v7699_v10  ;;  %v5364_v17 = vsel %vm8933_vm11, %v5359_v43, %v5363_v39  ;;  %v5801_v30 = vrot.slane %v10673_v26, 5  ;;  %v7688_v21 = vrot.slane %v5722_v6, 9  ;;  %v5805_v18 = vrot.slane %v10680_v53, 5  ;;  %8409 = vmatpush3.bf16.msra.mxu0 %v10489_v4  ;;  %v5724_v39 = vld [vmem:[#allocation3 + $0x80] sm:$0xe] }
 0x424   :  { %v10715_v41 = vcombine.low %v5350_v24, %v5364_v17  ;;  %v5373_v54 = vrot.slane %v5372_v31, 4  ;;  %v5377_v49 = vrot.slane %v5375_v32, 5  ;;  %v5386_v61 = vor.u32 %v5385_v42, %v5382_v25  ;;  %8410 = vmatprep.subr.bf16.mxu0 %v8553_v48  ;;  %v10750_v6 = vld [vmem:[#allocation3 + $0x8c] sm:$0x1]  ;;  %v10755_v24 = vld [vmem:[#allocation3 + $0x94] sm:$0x1] }
 0x425   :  { %v5391_v14 = vrot.slane %v5389_v56, 5  ;;  %v10719_v62 = vsel %vm8944_vm12, %v7688_v21, %v5805_v18  ;;  %v5394_v10 = vshrl.u32 %v5289_v19, 16  ;;  %v5397_v3 = vshll.u32 %v5289_v19, 16  ;;  %v5725_v43 = vld [vmem:[#allocation3 + $0x88] sm:$0xe] }
 0x426   :  { %v5378_v4 = vsel %vm8933_vm11, %v5373_v54, %v5377_v49  ;;  %v5387_v9 = vrot.slane %v5386_v61, 4  ;;  %v10729_v50 = vsel %vm8944_vm12, %v7687_v16, %v5801_v30  ;;  %v5403_v38 = vshll.u32 %v10611_v57, 16  ;;  %v5726_v42 = vld [vmem:[#allocation3 + $0x90] sm:$0xe]  ;;  %v5297_v56 = vld [vmem:[#allocation3 + $0x68] sm:$0xf] }
 0x427   :  { %v5396_v12 = vrot.slane %v5394_v10, 4  ;;  %v5399_v28 = vrot.slane %v5397_v3, 5  ;;  %v5408_v33 = vshrl.u32 %v5291_v15, 16  ;;  %v5411_v37 = vshll.u32 %v5291_v15, 16  ;;  %8411 = vmatpush3.bf16.msra.mxu0 %v8553_v48  ;;  %v5299_v18 = vld [vmem:[#allocation3 + $0x70] sm:$0xf] }
 0x428   :  { %8325 = vmatmul.mubr.msk.bf16.gmra.mxu1 %vm1070_vm14, %v7622_v29  ;;  %v5392_v23 = vsel %vm8933_vm11, %v5387_v9, %v5391_v14  ;;  %v7702_v36 = vcombine.low %v10729_v50, %v10719_v62  ;;  %v5405_v0 = vrot.slane %v5403_v38, 5  ;;  %v5417_v57 = vshll.u32 %v10628_v52, 16 }
 0x429   :  { %8352 = vmatprep.mubr.msk.bf16.mxu1 %vm1070_vm14, %v10670_v51  ;;  %v5400_v45 = vor.u32 %v5399_v28, %v5396_v12  ;;  %v5410_v32 = vrot.slane %v5408_v33, 4  ;;  %v5413_v40 = vrot.slane %v5411_v37, 5  ;;  %v7689_v34 = vrot.slane %v5723_v11, 9  ;;  %v10778_v28 = vld [vmem:[%s11302_s11 + $0x88] sm:$0xff]  }
 0x42a   :  { %8377 = vmatmul.mubr.msk.bf16.gmra.mxu0 %vm1070_vm14, %v7700_v2  ;;  %v7661_v22 = vcombine.low %v5378_v4, %v5392_v23  ;;  %v5809_v29 = vrot.slane %v10721_v47, 5  ;;  %v7690_v27 = vrot.slane %v5724_v39, 9  ;;  %v5813_v52 = vrot.slane %v10723_v58, 5  ;;  %v6211_v23 = vld [vmem:[#allocation3 + $0x10] sm:$0xf] }
 0x42b   :  { %8380 = vmatprep.mubr.msk.bf16.mxu0 %vm1070_vm14, %v7701_v55  ;;  %v5401_v13 = vrot.slane %v5400_v45, 4  ;;  %v5414_v51 = vor.u32 %v5413_v40, %v5410_v32  ;;  %v5422_v35 = vshrl.u32 %v5293_v59, 16  ;;  %v5425_v7 = vshll.u32 %v5293_v59, 16  ;;  %v10787_v59 = vld [vmem:[#allocation3 + $0x14] sm:$0x1] }
 0x42c   :  { %v5419_v48 = vrot.slane %v5417_v57, 5  ;;  %v5814_v60 = vsel %vm8944_vm12, %v7690_v27, %v5813_v52  ;;  %v5431_v63 = vshll.u32 %v10645_v8, 16  ;;  %v5436_v2 = vshrl.u32 %v5295_v1, 16  ;;  %v8551_v8 = vld [vmem:[%s11302_s11 + $0x60] sm:$0xff]   ;;  %v10792_v27 = vld [vmem:[#allocation3 + $0x1c] sm:$0x1] }
 0x42d   :  { %v5406_v25 = vsel %vm8933_vm11, %v5401_v13, %v5405_v0  ;;  %v5415_v55 = vrot.slane %v5414_v51, 4  ;;  %v5810_v19 = vsel %vm8944_vm12, %v7689_v34, %v5809_v29  ;;  %v5424_v31 = vrot.slane %v5422_v35, 4 }
 0x42e   :  { %v7703_v16 = vcombine.low %v5810_v19, %v5814_v60  ;;  %v5427_v17 = vrot.slane %v5425_v7, 5  ;;  %v5438_v30 = vrot.slane %v5436_v2, 4  ;;  %v5439_v21 = vshll.u32 %v5295_v1, 16  ;;  %v6213_v1 = vld [vmem:[#allocation3 + $0x18] sm:$0xf] }
 0x42f   :  { %v5420_v54 = vsel %vm8933_vm11, %v5415_v55, %v5419_v48  ;;  %v5433_v49 = vrot.slane %v5431_v63, 5  ;;  %v5445_v61 = vshll.u32 %v10655_v20, 16  ;;  %v7691_v15 = vrot.slane %v5725_v43, 9  ;;  %v5301_v60 = vld [vmem:[#allocation3 + $0x78] sm:$0xf] }
 0x430   :  { %8353 = vmatmul.mubr.msk.bf16.vlgmr.msra.gmra.mxu1 %vm1070_vm14, %v10715_v41  ;;  %v5428_v14 = vor.u32 %v5427_v17, %v5424_v31  ;;  %v5441_v62 = vrot.slane %v5439_v21, 5  ;;  %v5817_v10 = vrot.slane %v10750_v6, 5  ;;  %v7692_v3 = vrot.slane %v5726_v42, 9  ;;  %v5303_v17 = vld [vmem:[#allocation3 + $0x80] sm:$0xf] }
 0x431   :  { %8389 = vmatpush3.bf16.msra.mxu1 %v10616_v46  ;;  %8356 = vmatprep.mubr.msk.bf16.mxu1 %vm1070_vm14, %v7661_v22  ;;  %v7662_v4 = vcombine.low %v5406_v25, %v5420_v54  ;;  %v5447_v9 = vrot.slane %v5445_v61, 5  ;;  %v5821_v50 = vrot.slane %v10755_v24, 5  ;;  %v5450_v38 = vshrl.u32 %v5297_v56, 16 }
 0x432   :  { %8381 = vmatmul.mubr.msk.bf16.gmra.mxu0 %vm1070_vm14, %v7702_v36  ;;  %v5429_v20 = vrot.slane %v5428_v14, 4  ;;  %v5442_v11 = vor.u32 %v5441_v62, %v5438_v30  ;;  %8390 = vmatprep.subr.bf16.mxu1 %v8551_v8  ;;  %v5453_v41 = vshll.u32 %v5297_v56, 16  ;;  %v5459_v12 = vshll.u32 %v10673_v26, 16 }
 0x433   :  { %8384 = vmatprep.mubr.msk.bf16.mxu0 %vm1070_vm14, %v7703_v16  ;;  %v5822_v46 = vsel %vm8944_vm12, %v7692_v3, %v5821_v50  ;;  %v5452_v33 = vrot.slane %v5450_v38, 4  ;;  %v5464_v37 = vshrl.u32 %v5299_v18, 16  ;;  %v5467_v39 = vshll.u32 %v5299_v18, 16  ;;  %v10805_v50 = vld [vmem:[#allocation3 + $0x24] sm:$0x1] }
 0x434   :  { %v5434_v36 = vsel %vm8933_vm11, %v5429_v20, %v5433_v49  ;;  %v5443_v0 = vrot.slane %v5442_v11, 4  ;;  %v5818_v26 = vsel %vm8944_vm12, %v7691_v15, %v5817_v10  ;;  %v5455_v57 = vrot.slane %v5453_v41, 5  ;;  %v6215_v49 = vld [vmem:[#allocation3 + $0x20] sm:$0xf]  ;;  %v6217_v41 = vld [vmem:[#allocation3 + $0x28] sm:$0xf] }
 0x435   :  { %v7704_v45 = vcombine.low %v5818_v26, %v5822_v46  ;;  %v5466_v32 = vrot.slane %v5464_v37, 4  ;;  %v5469_v40 = vrot.slane %v5467_v39, 5  ;;  %v5473_v34 = vshll.u32 %v10680_v53, 16  ;;  %8391 = vmatpush3.bf16.msra.mxu1 %v8551_v8 }
 0x436   :  { %v5448_v22 = vsel %vm8933_vm11, %v5443_v0, %v5447_v9  ;;  %v5456_v29 = vor.u32 %v5455_v57, %v5452_v33  ;;  %v6244_v52 = vshrl.u32 %v6211_v23, 16  ;;  %v6247_v13 = vshll.u32 %v6211_v23, 16  ;;  %8428 = vmatprep.subr.bf16.mxu1 %v10778_v28  ;;  %v10811_v23 = vld [vmem:[#allocation3 + $0x2c] sm:$0x1] }
 0x437   :  { %v7663_v51 = vcombine.low %v5434_v36, %v5448_v22  ;;  %v5461_v35 = vrot.slane %v5459_v12, 5  ;;  %v5470_v7 = vor.u32 %v5469_v40, %v5466_v32  ;;  %v6253_v48 = vshll.u32 %v10787_v59, 16  ;;  %v5305_v40 = vld [vmem:[#allocation3 + $0x88] sm:$0xf] }
 0x438   :  { %8357 = vmatmul.mubr.msk.bf16.gmra.mxu1 %vm1070_vm14, %v7662_v4  ;;  %v5457_v53 = vrot.slane %v5456_v29, 4  ;;  %v6246_v63 = vrot.slane %v6244_v52, 4  ;;  %v6249_v2 = vrot.slane %v6247_v13, 5  ;;  %v6258_v43 = vshrl.u32 %v6213_v1, 16  ;;  %v5307_v52 = vld [vmem:[#allocation3 + $0x90] sm:$0xf] }
 0x439   :  { %8360 = vmatprep.mubr.msk.bf16.mxu1 %vm1070_vm14, %v7663_v51  ;;  %v5471_v25 = vrot.slane %v5470_v7, 4  ;;  %v5475_v55 = vrot.slane %v5473_v34, 5  ;;  %v6261_v19 = vshll.u32 %v6213_v1, 16  ;;  %v6267_v31 = vshll.u32 %v10792_v27, 16 }
 0x43a   :  { %8385 = vmatmul.mubr.msk.bf16.gmra.mxu0 %vm1070_vm14, %v7704_v45  ;;  %v6250_v42 = vor.u32 %v6249_v2, %v6246_v63  ;;  %v6255_v56 = vrot.slane %v6253_v48, 5  ;;  %v6260_v16 = vrot.slane %v6258_v43, 4  ;;  %v5478_v30 = vshrl.u32 %v5301_v60, 16 }
 0x43b   :  { %v5462_v21 = vsel %vm8933_vm11, %v5457_v53, %v5461_v35  ;;  %v5476_v8 = vsel %vm8933_vm11, %v5471_v25, %v5475_v55  ;;  %v6263_v18 = vrot.slane %v6261_v19, 5  ;;  %v5481_v54 = vshll.u32 %v5301_v60, 16  ;;  %v6219_v19 = vld [vmem:[#allocation3 + $0x30] sm:$0xf] }
 0x43c   :  { %v6251_v61 = vrot.slane %v6250_v42, 4  ;;  %v6269_v15 = vrot.slane %v6267_v31, 5  ;;  %v5480_v14 = vrot.slane %v5478_v30, 4  ;;  %v5487_v62 = vshll.u32 %v10721_v47, 16 }
 0x43d   :  { %v6264_v10 = vor.u32 %v6263_v18, %v6260_v16  ;;  %v5483_v3 = vrot.slane %v5481_v54, 5  ;;  %v5492_v4 = vshrl.u32 %v5303_v17, 16  ;;  %v5495_v9 = vshll.u32 %v5303_v17, 16  ;;  %v10823_v17 = vld [vmem:[#allocation3 + $0x34] sm:$0x1] }
 0x43e   :  { %v7664_v38 = vcombine.low %v5462_v21, %v5476_v8  ;;  %v6256_v20 = vsel %vm8933_vm11, %v6251_v61, %v6255_v56  ;;  %v5501_v11 = vshll.u32 %v10723_v58, 16  ;;  %v6272_v12 = vshrl.u32 %v6215_v49, 16  ;;  %v6221_v54 = vld [vmem:[#allocation3 + $0x38] sm:$0xf] }
 0x43f   :  { %v6265_v46 = vrot.slane %v6264_v10, 4  ;;  %v5484_v33 = vor.u32 %v5483_v3, %v5480_v14  ;;  %v5494_v37 = vrot.slane %v5492_v4, 4  ;;  %v5497_v39 = vrot.slane %v5495_v9, 5  ;;  %v10827_v10 = vld [vmem:[#allocation3 + $0x3c] sm:$0x1] }
 0x440   :  { %8361 = vmatmul.mubr.msk.bf16.gmra.mxu1 %vm1070_vm14, %v7664_v38  ;;  %v5489_v47 = vrot.slane %v5487_v62, 5  ;;  %v6274_v36 = vrot.slane %v6272_v12, 4  ;;  %v6275_v0 = vshll.u32 %v6215_v49, 16  ;;  %v6281_v26 = vshll.u32 %v10805_v50, 16 }
 0x441   :  { %v6270_v57 = vsel %vm8933_vm11, %v6265_v46, %v6269_v15  ;;  %v5485_v45 = vrot.slane %v5484_v33, 4  ;;  %v5498_v58 = vor.u32 %v5497_v39, %v5494_v37  ;;  %v6286_v32 = vshrl.u32 %v6217_v41, 16 }
 0x442   :  { %v7741_v34 = vcombine.low %v6256_v20, %v6270_v57  ;;  %v5503_v1 = vrot.slane %v5501_v11, 5  ;;  %v6277_v22 = vrot.slane %v6275_v0, 5  ;;  %v6289_v29 = vshll.u32 %v6217_v41, 16  ;;  %v6223_v41 = vld [vmem:[#allocation3 + $0x40] sm:$0xf] }
 0x443   :  { %v5499_v13 = vrot.slane %v5498_v58, 4  ;;  %v6283_v51 = vrot.slane %v6281_v26, 5  ;;  %v6288_v35 = vrot.slane %v6286_v32, 4  ;;  %v6295_v7 = vshll.u32 %v10811_v23, 16  ;;  %v6225_v0 = vld [vmem:[#allocation3 + $0x48] sm:$0xf] }
 0x444   :  { %8412 = vmatprep.mubr.msk.bf16.mxu0 %vm1070_vm14, %v7741_v34  ;;  %v6278_v48 = vor.u32 %v6277_v22, %v6274_v36  ;;  %v6291_v60 = vrot.slane %v6289_v29, 5  ;;  %v5506_v53 = vshrl.u32 %v5305_v40, 16  ;;  %v5509_v63 = vshll.u32 %v5305_v40, 16  ;;  %v10836_v58 = vld [vmem:[#allocation3 + $0x44] sm:$0x1] }
 0x445   :  { %v5490_v2 = vsel %vm8933_vm11, %v5485_v45, %v5489_v47  ;;  %v5504_v43 = vsel %vm8933_vm11, %v5499_v13, %v5503_v1  ;;  %v5515_v25 = vshll.u32 %v10750_v6, 16  ;;  %v5520_v55 = vshrl.u32 %v5307_v52, 16  ;;  %v10840_v22 = vld [vmem:[#allocation3 + $0x4c] sm:$0x1] }
 0x446   :  { %v7665_v31 = vcombine.low %v5490_v2, %v5504_v43  ;;  %v6279_v42 = vrot.slane %v6278_v48, 4  ;;  %v6292_v56 = vor.u32 %v6291_v60, %v6288_v35  ;;  %v5508_v16 = vrot.slane %v5506_v53, 4  ;;  %v10845_v2 = vld [vmem:[#allocation3 + $0x64] sm:$0x1]  ;;  %v6229_v43 = vld [vmem:[#allocation3 + $0x68] sm:$0xf] }
 0x447   :  { %v6297_v30 = vrot.slane %v6295_v7, 5  ;;  %v5511_v21 = vrot.slane %v5509_v63, 5  ;;  %v5522_v8 = vrot.slane %v5520_v55, 4  ;;  %v5523_v18 = vshll.u32 %v5307_v52, 16  ;;  %v6227_v7 = vld [vmem:[#allocation3 + $0x60] sm:$0xf] }
 0x448   :  { %8364 = vmatprep.mubr.msk.bf16.mxu1 %vm1070_vm14, %v7665_v31  ;;  %v6293_v49 = vrot.slane %v6292_v56, 4  ;;  %v5517_v61 = vrot.slane %v5515_v25, 5  ;;  %v5529_v15 = vshll.u32 %v10755_v24, 16  ;;  %v6300_v6 = vshrl.u32 %v6219_v19, 16  ;;  %v8554_v55 = vld [vmem:[#allocation3 + $0x10] ss:$8 sps:$4 sm:$0xff]  }
 0x449   :  { %v5512_v14 = vor.u32 %v5511_v21, %v5508_v16  ;;  %v5525_v62 = vrot.slane %v5523_v18, 5  ;;  %v6303_v3 = vshll.u32 %v6219_v19, 16  ;;  %v6309_v4 = vshll.u32 %v10823_v17, 16  ;;  %v10852_v18 = vld [vmem:[#allocation3 + $0x6c] sm:$0x1] }
 0x44a   :  { %v6284_v9 = vsel %vm8933_vm11, %v6279_v42, %v6283_v51  ;;  %v6298_v38 = vsel %vm8933_vm11, %v6293_v49, %v6297_v30  ;;  %v6302_v20 = vrot.slane %v6300_v6, 4  ;;  %v6314_v11 = vshrl.u32 %v6221_v54, 16 }
 0x44b   :  { %v7742_v12 = vcombine.low %v6284_v9, %v6298_v38  ;;  %v5513_v46 = vrot.slane %v5512_v14, 4  ;;  %v5526_v24 = vor.u32 %v5525_v62, %v5522_v8  ;;  %v6305_v33 = vrot.slane %v6303_v3, 5  ;;  %v6231_v62 = vld [vmem:[#allocation3 + $0x70] sm:$0xf] }
 0x44c   :  { %v5531_v37 = vrot.slane %v5529_v15, 5  ;;  %v6316_v39 = vrot.slane %v6314_v11, 4  ;;  %v6317_v47 = vshll.u32 %v6221_v54, 16  ;;  %v6323_v36 = vshll.u32 %v10827_v10, 16  ;;  %v8556_v11 = vld [vmem:[#allocation3 + $0x20] ss:$8 sps:$4 sm:$0xff]  }
 0x44d   :  { %8413 = vmatmul.mubr.msk.bf16.vlgmr.msra.gmra.mxu0 %vm1070_vm14, %v7742_v12  ;;  %v5527_v26 = vrot.slane %v5526_v24, 4  ;;  %v6306_v57 = vor.u32 %v6305_v33, %v6302_v20  ;;  %v6311_v45 = vrot.slane %v6309_v4, 5  ;;  %v6328_v32 = vshrl.u32 %v6223_v41, 16  ;;  %v6233_v20 = vld [vmem:[#allocation3 + $0x78] sm:$0xf] }
 0x44e   :  { %v5518_v40 = vsel %vm8933_vm11, %v5513_v46, %v5517_v61  ;;  %v6319_v34 = vrot.slane %v6317_v47, 5  ;;  %v6325_v1 = vrot.slane %v6323_v36, 5  ;;  %v6331_v29 = vshll.u32 %v6223_v41, 16  ;;  %v10858_v33 = vld [vmem:[#allocation3 + $0x74] sm:$0x1] }
 0x44f   :  { %v5532_v52 = vsel %vm8933_vm11, %v5527_v26, %v5531_v37  ;;  %v6307_v13 = vrot.slane %v6306_v57, 4  ;;  %v6330_v51 = vrot.slane %v6328_v32, 4  ;;  %v6342_v35 = vshrl.u32 %v6225_v0, 16  ;;  %v8557_v47 = vld [vmem:[#allocation3 + $0x30] ss:$8 sps:$4 sm:$0xff]   ;;  %v8560_v57 = vld [vmem:[%s11302_s11 + $0x80] sm:$0xff]  }
 0x450   :  { %v7666_v48 = vcombine.low %v5518_v40, %v5532_v52  ;;  %v6320_v60 = vor.u32 %v6319_v34, %v6316_v39  ;;  %v6333_v53 = vrot.slane %v6331_v29, 5  ;;  %v6337_v63 = vshll.u32 %v10836_v58, 16  ;;  %v10863_v36 = vld [vmem:[#allocation3 + $0x7c] sm:$0x1] }
 0x451   :  { %v6312_v25 = vsel %vm8933_vm11, %v6307_v13, %v6311_v45  ;;  %v6344_v19 = vrot.slane %v6342_v35, 4  ;;  %v6345_v31 = vshll.u32 %v6225_v0, 16  ;;  %v6351_v42 = vshll.u32 %v10840_v22, 16  ;;  %v6237_v35 = vld [vmem:[#allocation3 + $0x88] sm:$0xf] }
 0x452   :  { %8365 = vmatmul.mubr.msk.bf16.gmra.mxu1 %vm1070_vm14, %v7666_v48  ;;  %v6321_v56 = vrot.slane %v6320_v60, 4  ;;  %v6334_v16 = vor.u32 %v6333_v53, %v6330_v51  ;;  %v6356_v30 = vshrl.u32 %v6227_v7, 16  ;;  %v6359_v21 = vshll.u32 %v6227_v7, 16 }
 0x453   :  { %8392 = vmatprep.mubr.msk.bf16.mxu1 %vm1070_vm14, %v8554_v55  ;;  %v6347_v8 = vrot.slane %v6345_v31, 5  ;;  %v6365_v54 = vshll.u32 %v10845_v2, 16  ;;  %v6370_v49 = vshrl.u32 %v6229_v43, 16  ;;  %v6339_v4 = vrot.slane %v6337_v63, 5  ;;  %v10876_v55 = vld [vmem:[#allocation3 + $0x84] sm:$0x1] }
 0x454   :  { %v6326_v61 = vsel %vm8933_vm11, %v6321_v56, %v6325_v1  ;;  %v6335_v15 = vrot.slane %v6334_v16, 4  ;;  %v6358_v6 = vrot.slane %v6356_v30, 4  ;;  %v6361_v14 = vrot.slane %v6359_v21, 5  ;;  %v6235_v1 = vld [vmem:[#allocation3 + $0x80] sm:$0xf] }
 0x455   :  { %v7743_v3 = vcombine.low %v6312_v25, %v6326_v61  ;;  %v6348_v9 = vor.u32 %v6347_v8, %v6344_v19  ;;  %v6353_v38 = vrot.slane %v6351_v42, 5  ;;  %v6372_v12 = vrot.slane %v6370_v49, 4  ;;  %v10880_v56 = vld [vmem:[#allocation3 + $0x8c] sm:$0x1] }
 0x456   :  { %v6362_v41 = vor.u32 %v6361_v14, %v6358_v6  ;;  %v6373_v46 = vshll.u32 %v6229_v43, 16  ;;  %v6379_v24 = vshll.u32 %v10852_v18, 16  ;;  %v6340_v37 = vsel %vm8933_vm11, %v6335_v15, %v6339_v4  ;;  %v6241_v14 = vld [vmem:[#allocation3 + $0x98] sm:$0xf]  ;;  %v8558_v4 = vld [vmem:[#allocation3 + $0x40] ss:$8 sps:$4 sm:$0xff]  }
 0x457   :  { %8416 = vmatprep.mubr.msk.bf16.mxu0 %vm1070_vm14, %v7743_v3  ;;  %v6349_v39 = vrot.slane %v6348_v9, 4  ;;  %v6384_v0 = vshrl.u32 %v6231_v62, 16  ;;  %v6387_v26 = vshll.u32 %v6231_v62, 16  ;;  %v6367_v32 = vrot.slane %v6365_v54, 5  ;;  %v6239_v54 = vld [vmem:[#allocation3 + $0x90] sm:$0xf] }
 0x458   :  { %v6363_v45 = vrot.slane %v6362_v41, 4  ;;  %v6375_v40 = vrot.slane %v6373_v46, 5  ;;  %v6398_v34 = vshrl.u32 %v6233_v20, 16  ;;  %v6393_v51 = vshll.u32 %v10858_v33, 16  ;;  %v10885_v41 = vld [vmem:[#allocation3 + $0x94] sm:$0x1] }
 0x459   :  { %v6354_v29 = vsel %vm8933_vm11, %v6349_v39, %v6353_v38  ;;  %v6386_v52 = vrot.slane %v6384_v0, 4  ;;  %v6389_v13 = vrot.slane %v6387_v26, 5  ;;  %v6381_v53 = vrot.slane %v6379_v24, 5 }
 0x45a   :  { %v7744_v7 = vcombine.low %v6340_v37, %v6354_v29  ;;  %8393 = vmatmul.mubr.msk.bf16.vlgmr.msra.gmra.mxu1 %vm1070_vm14, %v8556_v11  ;;  %v6368_v48 = vsel %vm8933_vm11, %v6363_v45, %v6367_v32  ;;  %v6376_v60 = vor.u32 %v6375_v40, %v6372_v12  ;;  %v6400_v43 = vrot.slane %v6398_v34, 4 }
 0x45b   :  { %8429 = vmatpush3.bf16.msra.mxu1 %v10778_v28  ;;  %8396 = vmatprep.mubr.msk.bf16.mxu1 %vm1070_vm14, %v8557_v47  ;;  %v6390_v63 = vor.u32 %v6389_v13, %v6386_v52  ;;  %v6401_v25 = vshll.u32 %v6233_v20, 16  ;;  %v6412_v19 = vshrl.u32 %v6235_v1, 16  ;;  %v6407_v42 = vshll.u32 %v10863_v36, 16  ;;  %v8559_v47 = vld [vmem:[#allocation3 + $0x60] ss:$8 sps:$4 sm:$0xff]  }
 0x45c   :  { %8417 = vmatmul.mubr.msk.bf16.gmra.mxu0 %vm1070_vm14, %v7744_v7  ;;  %v6377_v31 = vrot.slane %v6376_v60, 4  ;;  %v6415_v16 = vshll.u32 %v6235_v1, 16  ;;  %v6426_v30 = vshrl.u32 %v6237_v35, 16  ;;  %8430 = vmatprep.subr.bf16.mxu1 %v8560_v57  ;;  %v6395_v21 = vrot.slane %v6393_v51, 5  ;;  %v10896_v13 = vld [vmem:[#allocation3 + $0x9c] sm:$0x1] }
 0x45d   :  { %v6403_v28 = vrot.slane %v6401_v25, 5  ;;  %v6414_v8 = vrot.slane %v6412_v19, 4  ;;  %v6391_v61 = vrot.slane %v6390_v63, 4  ;;  %v6421_v6 = vshll.u32 %v10876_v55, 16 }
 0x45e   :  { %v6382_v49 = vsel %vm8933_vm11, %v6377_v31, %v6381_v53  ;;  %v6417_v15 = vrot.slane %v6415_v16, 5  ;;  %v6428_v9 = vrot.slane %v6426_v30, 4  ;;  %v6429_v38 = vshll.u32 %v6237_v35, 16  ;;  %v6645_v31 = vld [vmem:[#allocation3 + $0x10] sm:$0xe] }
 0x45f   :  { %v7745_v62 = vcombine.low %v6368_v48, %v6382_v49  ;;  %v6404_v3 = vor.u32 %v6403_v28, %v6400_v43  ;;  %8431 = vmatpush3.bf16.msra.mxu1 %v8560_v57  ;;  %v6409_v20 = vrot.slane %v6407_v42, 5  ;;  %v6440_v12 = vshrl.u32 %v6239_v54, 16  ;;  %v8561_v28 = vld [vmem:[#allocation3 + $0x70] ss:$8 sps:$4 sm:$0xff]  }
 0x460   :  { %v6418_v11 = vor.u32 %v6417_v15, %v6414_v8  ;;  %v6443_v46 = vshll.u32 %v6239_v54, 16  ;;  %v6431_v37 = vrot.slane %v6429_v38, 5  ;;  %v6435_v39 = vshll.u32 %v10880_v56, 16  ;;  %v8562_v8 = vld [vmem:[#allocation3 + $0x80] ss:$8 sps:$4 sm:$0xff]  }
 0x461   :  { %8420 = vmatprep.mubr.msk.bf16.mxu0 %vm1070_vm14, %v7745_v62  ;;  %v6405_v24 = vrot.slane %v6404_v3, 4  ;;  %v6454_v0 = vshrl.u32 %v6241_v14, 16  ;;  %v6423_v45 = vrot.slane %v6421_v6, 5  ;;  %v6442_v32 = vrot.slane %v6440_v12, 4  ;;  %v6646_v54 = vld [vmem:[#allocation3 + $0x18] sm:$0xe] }
 0x462   :  { %8397 = vmatmul.mubr.msk.bf16.gmra.mxu1 %vm1070_vm14, %v8558_v4  ;;  %v6419_v26 = vrot.slane %v6418_v11, 4  ;;  %v6445_v57 = vrot.slane %v6443_v46, 5  ;;  %v6396_v40 = vsel %vm8933_vm11, %v6391_v61, %v6395_v21  ;;  %v6432_v1 = vor.u32 %v6431_v37, %v6428_v9  ;;  %v6648_v38 = vld [vmem:[#allocation3 + $0x28] sm:$0xe]  ;;  %v8563_v11 = vld [vmem:[#allocation3 + $0x90] ss:$8 sps:$4 sm:$0xff]  }
 0x463   :  { %v6410_v34 = vsel %vm8933_vm11, %v6405_v24, %v6409_v20  ;;  %8400 = vmatprep.mubr.msk.bf16.mxu1 %vm1070_vm14, %v8559_v47  ;;  %v6449_v29 = vshll.u32 %v10885_v41, 16  ;;  %v6456_v35 = vrot.slane %v6454_v0, 4  ;;  %v6457_v7 = vshll.u32 %v6241_v14, 16  ;;  %v6649_v20 = vld [vmem:[#allocation3 + $0x30] sm:$0xe] }
 0x464   :  { %v7746_v52 = vcombine.low %v6396_v40, %v6410_v34  ;;  %v6446_v51 = vor.u32 %v6445_v57, %v6442_v32  ;;  %v6424_v48 = vsel %vm8933_vm11, %v6419_v26, %v6423_v45  ;;  %v6433_v60 = vrot.slane %v6432_v1, 4  ;;  %v6647_v12 = vld [vmem:[#allocation3 + $0x20] sm:$0xe]  ;;  %v6650_v37 = vld [vmem:[#allocation3 + $0x38] sm:$0xe] }
 0x465   :  { %v6437_v53 = vrot.slane %v6435_v39, 5  ;;  %v6463_v63 = vshll.u32 %v10896_v13, 16  ;;  %v6459_v25 = vrot.slane %v6457_v7, 5  ;;  %v6451_v16 = vrot.slane %v6449_v29, 5  ;;  %v6651_v57 = vld [vmem:[#allocation3 + $0x40] sm:$0xe] }
 0x466   :  { %8421 = vmatmul.mubr.msk.bf16.gmra.mxu0 %vm1070_vm14, %v7746_v52  ;;  %v6447_v43 = vrot.slane %v6446_v51, 4  ;;  %v7759_v15 = vrot.slane %v6645_v31, 9  ;;  %v6695_v6 = vrot.slane %v10787_v59, 5  ;;  %v7760_v62 = vrot.slane %v6646_v54, 9  ;;  %v6652_v40 = vld [vmem:[#allocation3 + $0x48] sm:$0xe] }
 0x467   :  { %v6438_v19 = vsel %vm8933_vm11, %v6433_v60, %v6437_v53  ;;  %v6460_v30 = vor.u32 %v6459_v25, %v6456_v35  ;;  %v6465_v21 = vrot.slane %v6463_v63, 5  ;;  %v6699_v3 = vrot.slane %v10792_v27, 5  ;;  %v6654_v7 = vld [vmem:[#allocation3 + $0x68] sm:$0xe]  ;;  %v6656_v25 = vld [vmem:[#allocation3 + $0x78] sm:$0xe] }
 0x468   :  { %v7747_v42 = vcombine.low %v6424_v48, %v6438_v19  ;;  %v6452_v49 = vsel %vm8933_vm11, %v6447_v43, %v6451_v16  ;;  %v6696_v9 = vsel %vm8944_vm12, %v7759_v15, %v6695_v6  ;;  %v7762_v24 = vrot.slane %v6648_v38, 9  ;;  %v6657_v19 = vld [vmem:[#allocation3 + $0x80] sm:$0xe] }
 0x469   :  { %v6461_v61 = vrot.slane %v6460_v30, 4  ;;  %v6700_v59 = vsel %vm8944_vm12, %v7760_v62, %v6699_v3  ;;  %v6707_v5 = vrot.slane %v10811_v23, 5  ;;  %v7763_v27 = vrot.slane %v6649_v20, 9  ;;  %v6660_v62 = vld [vmem:[#allocation3 + $0x98] sm:$0xe] }
 0x46a   :  { %8424 = vmatprep.mubr.msk.bf16.mxu0 %vm1070_vm14, %v7747_v42  ;;  %8401 = vmatmul.mubr.msk.bf16.gmra.mxu1 %vm1070_vm14, %v8561_v28  ;;  %v7779_v46 = vcombine.low %v6696_v9, %v6700_v59  ;;  %v6711_v39 = vrot.slane %v10823_v17, 5  ;;  %v7761_v47 = vrot.slane %v6647_v12, 9  ;;  %v6703_v0 = vrot.slane %v10805_v50, 5  ;;  %v6653_v17 = vld [vmem:[#allocation3 + $0x60] sm:$0xe] }
 0x46b   :  { %8404 = vmatprep.mubr.msk.bf16.mxu1 %vm1070_vm14, %v8562_v8  ;;  %v6466_v14 = vsel %vm8933_vm11, %v6461_v61, %v6465_v21  ;;  %v7764_v26 = vrot.slane %v6650_v37, 9  ;;  %v6715_v45 = vrot.slane %v10827_v10, 5  ;;  %v6708_v32 = vsel %vm8944_vm12, %v7762_v24, %v6707_v5  ;;  %v6655_v42 = vld [vmem:[#allocation3 + $0x70] sm:$0xe]  ;;  %v6658_v21 = vld [vmem:[#allocation3 + $0x88] sm:$0xe] }
 0x46c   :  { %v7748_v4 = vcombine.low %v6452_v49, %v6466_v14  ;;  %v6712_v23 = vsel %vm8944_vm12, %v7763_v27, %v6711_v39  ;;  %v6704_v34 = vsel %vm8944_vm12, %v7761_v47, %v6703_v0  ;;  %v7765_v50 = vrot.slane %v6651_v57, 9  ;;  %v6659_v14 = vld [vmem:[#allocation3 + $0x90] sm:$0xe] }
 0x46d   :  { %v7780_v1 = vcombine.low %v6704_v34, %v6708_v32  ;;  %v6716_v29 = vsel %vm8944_vm12, %v7764_v26, %v6715_v45  ;;  %v6719_v10 = vrot.slane %v10836_v58, 5  ;;  %v7766_v51 = vrot.slane %v6652_v40, 9 }
 0x46e   :  { %8425 = vmatmul.mubr.msk.bf16.gmra.mxu0 %vm1070_vm14, %v7748_v4  ;;  %v7781_v52 = vcombine.low %v6712_v23, %v6716_v29  ;;  %v6723_v35 = vrot.slane %v10840_v22, 5  ;;  %v7767_v48 = vrot.slane %v6653_v17, 9  ;;  %v6727_v60 = vrot.slane %v10845_v2, 5 }
 0x46f   :  { %v7768_v53 = vrot.slane %v6654_v7, 9  ;;  %v6731_v63 = vrot.slane %v10852_v18, 5  ;;  %v6720_v43 = vsel %vm8944_vm12, %v7765_v50, %v6719_v10  ;;  %v7770_v30 = vrot.slane %v6656_v25, 9 }
 0x470   :  { %v6724_v58 = vsel %vm8944_vm12, %v7766_v51, %v6723_v35  ;;  %v6728_v22 = vsel %vm8944_vm12, %v7767_v48, %v6727_v60  ;;  %v6739_v18 = vrot.slane %v10863_v36, 5  ;;  %v7771_v28 = vrot.slane %v6657_v19, 9 }
 0x471   :  { %v7782_v31 = vcombine.low %v6720_v43, %v6724_v58  ;;  %v6732_v2 = vsel %vm8944_vm12, %v7768_v53, %v6731_v63  ;;  %v6743_v8 = vrot.slane %v10876_v55, 5  ;;  %v7769_v54 = vrot.slane %v6655_v42, 9 }
 0x472   :  { %8405 = vmatmul.mubr.msk.bf16.gmra.mxu1 %vm1070_vm14, %v8563_v11  ;;  %v7783_v16 = vcombine.low %v6728_v22, %v6732_v2  ;;  %v6735_v49 = vrot.slane %v10858_v33, 5  ;;  %v7772_v61 = vrot.slane %v6658_v21, 9  ;;  %v6747_v15 = vrot.slane %v10880_v56, 5 }
 0x473   :  { %8432 = vmatprep.mubr.msk.bf16.mxu1 %vm1070_vm14, %v7779_v46  ;;  %v6740_v6 = vsel %vm8944_vm12, %v7770_v30, %v6739_v18  ;;  %v6744_v36 = vsel %vm8944_vm12, %v7771_v28, %v6743_v8  ;;  %v7773_v9 = vrot.slane %v6659_v14, 9  ;;  %v6751_v38 = vrot.slane %v10885_v41, 5 }
 0x474   :  { %v6736_v3 = vsel %vm8944_vm12, %v7769_v54, %v6735_v49  ;;  %v6748_v4 = vsel %vm8944_vm12, %v7772_v61, %v6747_v15  ;;  %v7774_v56 = vrot.slane %v6660_v62, 9  ;;  %v6755_v20 = vrot.slane %v10896_v13, 5 }
 0x475   :  { %v7784_v55 = vcombine.low %v6736_v3, %v6740_v6  ;;  %v7785_v33 = vcombine.low %v6744_v36, %v6748_v4  ;;  %v6752_v11 = vsel %vm8944_vm12, %v7773_v9, %v6751_v38 }
 0x476   :  { %v6756_v59 = vsel %vm8944_vm12, %v7774_v56, %v6755_v20 }
 0x477   :  { %v7786_v12 = vcombine.low %v6752_v11, %v6756_v59 }
 0x47a   :  { %8433 = vmatmul.mubr.msk.bf16.vlgmr.msra.gmra.mxu1 %vm1070_vm14, %v7780_v1 }
 0x47b   :  { %8436 = vmatprep.mubr.msk.bf16.mxu1 %vm1070_vm14, %v7781_v52 }
 0x482   :  { %8437 = vmatmul.mubr.msk.bf16.gmra.mxu1 %vm1070_vm14, %v7782_v31 }
 0x483   :  { %8440 = vmatprep.mubr.msk.bf16.mxu1 %vm1070_vm14, %v7783_v16 }
 0x48a   :  { %8441 = vmatmul.mubr.msk.bf16.gmra.mxu1 %vm1070_vm14, %v7784_v55 }
 0x48b   :  { %8444 = vmatprep.mubr.msk.bf16.mxu1 %vm1070_vm14, %v7785_v33 }
 0x492   :  { %8445 = vmatmul.mubr.msk.bf16.gmra.mxu1 %vm1070_vm14, %v7786_v12 }
 0x49b   :  { %v8294_v46 = vpop.f32.mrf.mxu0 }
 0x49d   :  { %v4714_v24 = vpop.f32.mrf.mxu0 }
 0x49f   :  { %v8295_v5 = vpop.f32.mrf.mxu0 }
 0x4a1   :  { %v4717_v41 = vpop.f32.mrf.mxu0 }
 0x4aa   :  { %v8298_v37 = vpop.f32.mrf.mxu0 }
 0x4ac   :  { %v8274_v27 = vpop.f32.mrf.mxu1  ;;  %v4730_v13 = vpop.f32.mrf.mxu0 }
 0x4ad   :  { %v4723_v39 = vadd.f32 %v8294_v46, %v8274_v27 }
 0x4ae   :  { %v4541_v47 = vpop.f32.mrf.mxu1  ;;  %v8299_v0 = vpop.f32.mrf.mxu0 }
 0x4af   :  { %v4715_v26 = vadd.f32 %v4714_v24, %v4541_v47 }
 0x4b0   :  { %v8275_v45 = vpop.f32.mrf.mxu1  ;;  %v4733_v32 = vpop.f32.mrf.mxu0 }
 0x4b1   :  { %v4726_v57 = vadd.f32 %v8295_v5, %v8275_v45 }
 0x4b2   :  { %v4544_v23 = vpop.f32.mrf.mxu1  ;;  %v8302_v44 = vpop.f32.mrf.mxu0 }
 0x4b3   :  { %v4718_v40 = vadd.f32 %v4717_v41, %v4544_v23 }
 0x4b4   :  { %v4746_v34 = vpop.f32.mrf.mxu0 }
 0x4b6   :  { %v8303_v17 = vpop.f32.mrf.mxu0 }
 0x4b8   :  { %v8278_v1 = vpop.f32.mrf.mxu1  ;;  %v4749_v29 = vpop.f32.mrf.mxu0 }
 0x4b9   :  { %v4739_v50 = vadd.f32 %v8298_v37, %v8278_v1 }
 0x4ba   :  { %v4557_v52 = vpop.f32.mrf.mxu1  ;;  %v8306_v10 = vpop.f32.mrf.mxu0 }
 0x4bb   :  { %v4731_v51 = vadd.f32 %v4730_v13, %v4557_v52 }
 0x4bc   :  { %v8279_v35 = vpop.f32.mrf.mxu1  ;;  %v4762_v7 = vpop.f32.mrf.mxu0 }
 0x4bd   :  { %v4742_v48 = vadd.f32 %v8299_v0, %v8279_v35 }
 0x4be   :  { %v4560_v60 = vpop.f32.mrf.mxu1  ;;  %v8307_v53 = vpop.f32.mrf.mxu0 }
 0x4bf   :  { %v4734_v63 = vadd.f32 %v4733_v32, %v4560_v60 }
 0x4c0   :  { %v8282_v43 = vpop.f32.mrf.mxu1  ;;  %v4765_v58 = vpop.f32.mrf.mxu0 }
 0x4c1   :  { %v4755_v22 = vadd.f32 %v8302_v44, %v8282_v43 }
 0x4c2   :  { %v4573_v25 = vpop.f32.mrf.mxu1  ;;  %v10969_v19 = vpop.f32.mrf.mxu0 }
 0x4c3   :  { %v4747_v31 = vadd.f32 %v4746_v34, %v4573_v25 }
 0x4c4   :  { %v8283_v2 = vpop.f32.mrf.mxu1  ;;  %v10971_v42 = vpop.f32.mrf.mxu0 }
 0x4c5   :  { %v4758_v16 = vadd.f32 %v8303_v17, %v8283_v2  ;;  %v8564_v17 = vld [vmem:[%s11304_s13 + $0x8] sm:$0xff]  }
 0x4c6   :  { %v4576_v30 = vpop.f32.mrf.mxu1  ;;  %v10973_v18 = vpop.f32.mrf.mxu0  ;;  %8448 = vmatprep.subr.bf16.mxu0 %v8564_v17 }
 0x4c7   :  { %v4750_v21 = vadd.f32 %v4749_v29, %v4576_v30  ;;  %8449 = vmatpush3.bf16.msra.mxu0 %v8564_v17 }
 0x4c8   :  { %v8286_v28 = vpop.f32.mrf.mxu1  ;;  %v10975_v8 = vpop.f32.mrf.mxu0 }
 0x4c9   :  { %v4771_v54 = vadd.f32 %v8306_v10, %v8286_v28 }
 0x4ca   :  { %v4589_v49 = vpop.f32.mrf.mxu1  ;;  %v10977_v61 = vpop.f32.mrf.mxu0 }
 0x4cb   :  { %v4763_v15 = vadd.f32 %v4762_v7, %v4589_v49 }
 0x4cc   :  { %v8287_v6 = vpop.f32.mrf.mxu1  ;;  %v10979_v14 = vpop.f32.mrf.mxu0 }
 0x4cd   :  { %v4774_v36 = vadd.f32 %v8307_v53, %v8287_v6 }
 0x4ce   :  { %v4592_v62 = vpop.f32.mrf.mxu1  ;;  %v10981_v3 = vpop.f32.mrf.mxu0 }
 0x4cf   :  { %v4766_v55 = vadd.f32 %v4765_v58, %v4592_v62 }
 0x4d0   :  { %v8314_v4 = vpop.f32.mrf.mxu1  ;;  %v10983_v9 = vpop.f32.mrf.mxu0 }
 0x4d1   :  { %v10985_v33 = vadd.f32 %v8314_v4, %v4723_v39 }
 0x4d2   :  { %v4988_v38 = vpop.f32.mrf.mxu1  ;;  %v10987_v56 = vpop.f32.mrf.mxu0 }
 0x4d3   :  { %v10989_v20 = vadd.f32 %v4988_v38, %v4715_v26 }
 0x4d4   :  { %v8315_v11 = vpop.f32.mrf.mxu1  ;;  %v10991_v59 = vpop.f32.mrf.mxu0 }
 0x4d5   :  { %v10993_v12 = vadd.f32 %v8315_v11, %v4726_v57 }
 0x4d6   :  { %v4991_v46 = vpop.f32.mrf.mxu1  ;;  %v10995_v24 = vpop.f32.mrf.mxu0 }
 0x4d7   :  { %v10997_v5 = vadd.f32 %v4991_v46, %v4718_v40 }
 0x4d8   :  { %v8318_v41 = vpop.f32.mrf.mxu1  ;;  %v10999_v37 = vpop.f32.mrf.mxu0 }
 0x4d9   :  { %v11001_v27 = vadd.f32 %v8318_v41, %v4739_v50 }
 0x4da   :  { %v5004_v13 = vpop.f32.mrf.mxu1  ;;  %v11003_v39 = vpop.f32.mrf.mxu0 }
 0x4db   :  { %11401 = vst [vmem:[#allocation23_spill] sm:$0xff] %v11003_v39  ;;  %v11005_v47 = vadd.f32 %v5004_v13, %v4731_v51 }
 0x4dc   :  { %v8319_v0 = vpop.f32.mrf.mxu1  ;;  %v11007_v26 = vpop.f32.mrf.mxu0 }
 0x4dd   :  { %11402 = vst [vmem:[#allocation27_spill] sm:$0xff] %v11007_v26  ;;  %v11009_v45 = vadd.f32 %v8319_v0, %v4742_v48  ;;  %v5261_v26 = vadd.f32 %v10971_v42, %v10989_v20  ;;  %v8565_v42 = vld [vmem:[%s11304_s13] sm:$0xff]   ;;  %v5264_v20 = vadd.f32 %v10973_v18, %v10993_v12  ;;  %v5267_v18 = vadd.f32 %v10977_v61, %v11001_v27 }
 0x4de   :  { %v5007_v32 = vpop.f32.mrf.mxu1  ;;  %v11011_v57 = vpop.f32.mrf.mxu0  ;;  %8450 = vmatprep.subr.bf16.mxu0 %v8565_v42 }
 0x4df   :  { %11403 = vst [vmem:[#allocation40_spill] sm:$0xff] %v11011_v57  ;;  %v11013_v23 = vadd.f32 %v5007_v32, %v4734_v63  ;;  %8451 = vmatpush3.bf16.msra.mxu0 %v8565_v42 }
 0x4e0   :  { %v8322_v44 = vpop.f32.mrf.mxu1  ;;  %v11015_v40 = vpop.f32.mrf.mxu0 }
 0x4e1   :  { %11404 = vst [vmem:[#allocation12_spill] sm:$0xff] %v11015_v40  ;;  %v11017_v34 = vadd.f32 %v8322_v44, %v4755_v22 }
 0x4e2   :  { %v5020_v1 = vpop.f32.mrf.mxu1  ;;  %v11022_v29 = vpop.f32.mrf.mxu0 }
 0x4e3   :  { %v11024_v50 = vadd.f32 %v5020_v1, %v4747_v31 }
 0x4e4   :  { %v8323_v52 = vpop.f32.mrf.mxu1  ;;  %v11026_v10 = vpop.f32.mrf.mxu0 }
 0x4e5   :  { %v11028_v51 = vadd.f32 %v8323_v52, %v4758_v16 }
 0x4e6   :  { %v5023_v35 = vpop.f32.mrf.mxu1  ;;  %v11030_v7 = vpop.f32.mrf.mxu0 }
 0x4e7   :  { %v11032_v48 = vadd.f32 %v5023_v35, %v4750_v21 }
 0x4e8   :  { %v8326_v60 = vpop.f32.mrf.mxu1  ;;  %v11034_v53 = vpop.f32.mrf.mxu0 }
 0x4e9   :  { %v11036_v63 = vadd.f32 %v8326_v60, %v4771_v54 }
 0x4ea   :  { %v5036_v43 = vpop.f32.mrf.mxu1  ;;  %v11038_v58 = vpop.f32.mrf.mxu0 }
 0x4eb   :  { %11405 = vst [vmem:[#allocation11_spill] sm:$0xff] %v11036_v63  ;;  %v11040_v22 = vadd.f32 %v5036_v43, %v4763_v15 }
 0x4ec   :  { %v8327_v25 = vpop.f32.mrf.mxu1  ;;  %v11044_v16 = vpop.f32.mrf.mxu0 }
 0x4ed   :  { %11406 = vst [vmem:[#allocation18_spill] sm:$0xff] %v11040_v22  ;;  %v11042_v31 = vadd.f32 %v8327_v25, %v4774_v36 }
 0x4ee   :  { %v5039_v2 = vpop.f32.mrf.mxu1  ;;  %v11048_v49 = vpop.f32.mrf.mxu0 }
 0x4ef   :  { %11407 = vst [vmem:[#allocation13_spill] sm:$0xff] %v11042_v31  ;;  %v11046_v30 = vadd.f32 %v5039_v2, %v4766_v55 }
 0x4f0   :  { %v8354_v21 = vpop.f32.mrf.mxu1  ;;  %v11050_v54 = vpop.f32.mrf.mxu0 }
 0x4f1   :  { %11408 = vst [vmem:[#allocation25_spill] sm:$0xff] %v11046_v30 }
 0x4f2   :  { %v5632_v28 = vpop.f32.mrf.mxu1  ;;  %v11054_v15 = vpop.f32.mrf.mxu0 }
 0x4f3   :  { %11409 = vst [vmem:[#allocation32_spill] sm:$0xff] %v11054_v15 }
 0x4f4   :  { %v8355_v6 = vpop.f32.mrf.mxu1  ;;  %v11058_v11 = vpop.f32.mrf.mxu0 }
 0x4f5   :  { %11410 = vst [vmem:[#allocation39_spill] sm:$0xff] %v11058_v11 }
 0x4f6   :  { %v5635_v62 = vpop.f32.mrf.mxu1  ;;  %v11062_v55 = vpop.f32.mrf.mxu0 }
 0x4f7   :  { %11411 = vst [vmem:[#allocation41_spill] sm:$0xff] %v11062_v55 }
 0x4f8   :  { %v11052_v4 = vpop.f32.mrf.mxu1  ;;  %v11066_v13 = vpop.f32.mrf.mxu0 }
 0x4f9   :  { %11412 = vst [vmem:[#allocation22_spill] sm:$0xff] %v11066_v13 }
 0x4fa   :  { %v5648_v38 = vpop.f32.mrf.mxu1  ;;  %v11070_v32 = vpop.f32.mrf.mxu0 }
 0x4fb   :  { %11413 = vst [vmem:[#allocation30_spill] sm:$0xff] %v11070_v32 }
 0x4fc   :  { %v11056_v36 = vpop.f32.mrf.mxu1  ;;  %v11074_v17 = vpop.f32.mrf.mxu0 }
 0x4fd   :  { %11415 = vst [vmem:[#allocation15_spill] sm:$0xff] %v11074_v17 }
 0x4fe   :  { %v11060_v46 = vpop.f32.mrf.mxu1  ;;  %v11078_v52 = vpop.f32.mrf.mxu0 }
 0x4ff   :  { %11417 = vst [vmem:[#allocation24_spill] sm:$0xff] %v11078_v52 }
 0x500   :  { %v11064_v41 = vpop.f32.mrf.mxu1  ;;  %v11084_v43 = vpop.f32.mrf.mxu0 }
 0x501   :  { %11420 = vst [vmem:[#allocation35_spill] sm:$0xff] %v11084_v43 }
 0x502   :  { %v11068_v0 = vpop.f32.mrf.mxu1 }
 0x504   :  { %v11072_v44 = vpop.f32.mrf.mxu1 }
 0x505   :  { %11414 = vst [vmem:[#allocation20_spill] sm:$0xff] %v11072_v44  ;;  %v5263_v44 = vadd.f32 %v10969_v19, %v10985_v33  ;;  %v5265_v33 = vadd.f32 %v10979_v14, %v11005_v47  ;;  %v5266_v14 = vadd.f32 %v10983_v9, %v11013_v23 }
 0x506   :  { %v11076_v1 = vpop.f32.mrf.mxu1 }
 0x507   :  { %11416 = vst [vmem:[#allocation43_spill] sm:$0xff] %v11076_v1 }
 0x50d   :  { %v8414_v57 = vpop.f32.mrf.mxu0 }
 0x50f   :  { %v6566_v55 = vpop.f32.mrf.mxu0 }
 0x511   :  { %v11090_v30 = vpop.f32.mrf.mxu0 }
 0x512   :  { %v11080_v35 = vpop.f32.mrf.mxu1 }
 0x513   :  { %11418 = vst [vmem:[#allocation19_spill] sm:$0xff] %v11080_v35  ;;  %v6569_v35 = vpop.f32.mrf.mxu0 }
 0x514   :  { %v11082_v60 = vpop.f32.mrf.mxu1 }
 0x515   :  { %11419 = vst [vmem:[#allocation14_spill] sm:$0xff] %v11082_v60 }
 0x516   :  { %v11086_v25 = vpop.f32.mrf.mxu1 }
 0x517   :  { %11421 = vst [vmem:[#allocation42_spill] sm:$0xff] %v11086_v25 }
 0x518   :  { %v11088_v2 = vpop.f32.mrf.mxu1 }
 0x519   :  { %11422 = vst [vmem:[#allocation28_spill] sm:$0xff] %v11088_v2 }
 0x51a   :  { %v8394_v32 = vpop.f32.mrf.mxu1 }
 0x51c   :  { %v6132_v31 = vpop.f32.mrf.mxu1  ;;  %v11098_v43 = vpop.f32.mrf.mxu0 }
 0x51d   :  { %11424 = vst [vmem:[#allocation17_spill] sm:$0xff] %v11098_v43 }
 0x51e   :  { %v8395_v40 = vpop.f32.mrf.mxu1  ;;  %v11104_v63 = vpop.f32.mrf.mxu0 }
 0x520   :  { %v6135_v17 = vpop.f32.mrf.mxu1  ;;  %v11114_v11 = vpop.f32.mrf.mxu0 }
 0x522   :  { %v11092_v13 = vpop.f32.mrf.mxu1 }
 0x524   :  { %v6148_v52 = vpop.f32.mrf.mxu1 }
 0x526   :  { %v11094_v39 = vpop.f32.mrf.mxu1 }
 0x527   :  { %11423 = vst [vmem:[#allocation34_spill] sm:$0xff] %v11094_v39  ;;  %v5695_v39 = vadd.f32 %v5632_v28, %v5261_v26  ;;  %v11130_v26 = vpop.f32.mrf.mxu0 }
 0x528   :  { %v11096_v60 = vpop.f32.mrf.mxu1 }
 0x529   :  { %v5985_v19 = vadd.f32 %v11026_v10, %v5695_v39  ;;  %v11142_v47 = vpop.f32.mrf.mxu0 }
 0x52a   :  { %v11100_v25 = vpop.f32.mrf.mxu1 }
 0x52b   :  { %11425 = vst [vmem:[#allocation26_spill] sm:$0xff] %v11100_v25  ;;  %v5697_v25 = vadd.f32 %v8354_v21, %v5263_v44  ;;  %v6195_v28 = vadd.f32 %v6132_v31, %v5985_v19  ;;  %v5699_v44 = vadd.f32 %v5648_v38, %v5265_v33  ;;  %v5268_v38 = vadd.f32 %v10981_v3, %v11009_v45  ;;  %v11429_v19 = vld [vmem:[#allocation43_spill] sm:$0xff] }
 0x52c   :  { %v11102_v2 = vpop.f32.mrf.mxu1 }
 0x52d   :  { %11426 = vst [vmem:[#allocation21_spill] sm:$0xff] %v11102_v2  ;;  %v5262_v2 = vadd.f32 %v10975_v8, %v10997_v5  ;;  %v5698_v8 = vadd.f32 %v8355_v6, %v5264_v20  ;;  %v5987_v5 = vadd.f32 %v11022_v29, %v5697_v25  ;;  %v5701_v6 = vadd.f32 %v11052_v4, %v5267_v18  ;;  %v6598_v25 = vpop.f32.mrf.mxu0 }
 0x52e   :  { %v11106_v15 = vpop.f32.mrf.mxu1  ;;  %v5989_v61 = vadd.f32 %v11044_v16, %v5699_v44  ;;  %v5702_v23 = vadd.f32 %v11056_v36, %v5268_v38  ;;  %v5269_v4 = vadd.f32 %v10991_v59, %v11024_v50  ;;  %v5271_v36 = vadd.f32 %v10987_v56, %v11017_v34 }
 0x52f   :  { %11427 = vst [vmem:[#allocation16_spill] sm:$0xff] %v11106_v15  ;;  %v5696_v15 = vadd.f32 %v5635_v62, %v5262_v2  ;;  %v6197_v12 = vadd.f32 %v8394_v32, %v5987_v5  ;;  %v5988_v29 = vadd.f32 %v11030_v7, %v5698_v8  ;;  %v6629_v62 = vadd.f32 %v6566_v55, %v6195_v28  ;;  %v11156_v55 = vld [vmem:[%s11303_s12] ss:$0 sm:$0xff]  ;;  %s8590_s12 = smov 24   ;;  %v11170_v42 = vpop.f32.mrf.mxu0  ;;  %v11431_v5 = vld [vmem:[#allocation34_spill] sm:$0xff]  ;;  %v11432_v28 = vld [vmem:[#allocation17_spill] sm:$0xff] }
 0x530   :  { %v11110_v22 = vpop.f32.mrf.mxu1  ;;  %v6199_v7 = vadd.f32 %v6148_v52, %v5989_v61  ;;  %v5991_v45 = vadd.f32 %v11038_v58, %v5701_v6  ;;  %v5705_v58 = vadd.f32 %v11064_v41, %v5271_v36  ;;  %v5992_v56 = vadd.f32 %v11048_v49, %v5702_v23  ;;  %v11443_v36 = vld [vmem:[#allocation19_spill] sm:$0xff] }
 0x531   :  { %v5986_v39 = vadd.f32 %v11034_v53, %v5696_v15  ;;  %v5700_v53 = vadd.f32 %v11060_v46, %v5266_v14  ;;  %v6198_v15 = vadd.f32 %v8395_v40, %v5988_v29  ;;  %v6631_v32 = vadd.f32 %v8414_v57, %v6197_v12  ;;  %v11434_v12 = vld [vmem:[#allocation18_spill] sm:$0xff] }
 0x532   :  { %v11116_v43 = vpop.f32.mrf.mxu1  ;;  %v5703_v46 = vadd.f32 %v11068_v0, %v5269_v4  ;;  %v6201_v50 = vadd.f32 %v11092_v13, %v5991_v45  ;;  %v6633_v13 = vadd.f32 %v11104_v63, %v6199_v7  ;;  %v5272_v41 = vadd.f32 %v10995_v24, %v11028_v51  ;;  %v6601_v24 = vpop.f32.mrf.mxu0  ;;  %v11436_v51 = vld [vmem:[#allocation32_spill] sm:$0xff]  ;;  %v11441_v4 = vld [vmem:[#allocation22_spill] sm:$0xff] }
 0x533   :  { %11428 = vst [vmem:[#allocation38_spill] sm:$0xff] %v11116_v43  ;;  %v6196_v31 = vadd.f32 %v6135_v17, %v5986_v39  ;;  %v5990_v17 = vadd.f32 %v11050_v54, %v5700_v53  ;;  %v6632_v52 = vadd.f32 %v11090_v30, %v6198_v15  ;;  %v6202_v49 = vadd.f32 %v11431_v5, %v5992_v56  ;;  %v11435_v39 = vld [vmem:[#allocation27_spill] sm:$0xff]  ;;  %v11442_v45 = vld [vmem:[#allocation26_spill] sm:$0xff] }
 0x534   :  { %v11120_v1 = vpop.f32.mrf.mxu1  ;;  %v6635_v44 = vadd.f32 %v11432_v28, %v6201_v50  ;;  %v5273_v14 = vadd.f32 %v11435_v39, %v11434_v12  ;;  %v11437_v6 = vld [vmem:[#allocation21_spill] sm:$0xff]  ;;  %v11438_v53 = vld [vmem:[#allocation11_spill] sm:$0xff] }
 0x535   :  { %v6630_v57 = vadd.f32 %v6569_v35, %v6196_v31  ;;  %v5270_v35 = vadd.f32 %v10999_v37, %v11032_v48  ;;  %v6200_v54 = vadd.f32 %v11096_v60, %v5990_v17  ;;  %v11430_v37 = vld [vmem:[#allocation39_spill] sm:$0xff]  ;;  %v11433_v60 = vld [vmem:[#allocation20_spill] sm:$0xff]  ;;  %v8426_v17 = vpop.f32.mrf.mxu0 }
 0x536   :  { %v11132_v21 = vpop.f32.mrf.mxu1  ;;  %v5993_v48 = vadd.f32 %v11430_v37, %v5703_v46  ;;  %v5706_v18 = vadd.f32 %v11433_v60, %v5272_v41  ;;  %v11439_v15 = vld [vmem:[#allocation23_spill] sm:$0xff] }
 0x537   :  { %v5704_v33 = vadd.f32 %v11429_v19, %v5270_v35  ;;  %v11450_v19 = vld [vmem:[#allocation15_spill] sm:$0xff]  ;;  %v6614_v28 = vpop.f32.mrf.mxu0 }
 0x538   :  { %v11135_v43 = vpop.f32.mrf.mxu1  ;;  %v6203_v29 = vadd.f32 %v11437_v6, %v5993_v48  ;;  %v11451_v48 = vld [vmem:[#allocation16_spill] sm:$0xff] }
 0x539   :  { %v5994_v7 = vadd.f32 %v11441_v4, %v5704_v33 }
 0x53a   :  { %v8434_v10 = vpop.f32.mrf.mxu1  ;;  %v6637_v35 = vadd.f32 %v6598_v25, %v6203_v29  ;;  %v11455_v29 = vld [vmem:[#allocation38_spill] sm:$0xff] }
 0x53b   :  { %v6921_v16 = vadd.f32 %v8434_v10, %v6631_v32  ;;  %v5995_v10 = vadd.f32 %v11436_v51, %v5705_v58  ;;  %v5275_v32 = vadd.f32 %v11439_v15, %v11438_v53  ;;  %v6204_v56 = vadd.f32 %v11110_v22, %v5994_v7  ;;  %v11452_v22 = vld [vmem:[#allocation42_spill] sm:$0xff] }
 0x53c   :  { %v6856_v27 = vpop.f32.mrf.mxu1 }
 0x53d   :  { %v6919_v9 = vadd.f32 %v6856_v27, %v6629_v62  ;;  %v6944_v30 = vadd.f32 %v11156_v55, %v6921_v16  ;;  %v6634_v27 = vadd.f32 %v11130_v26, %v6200_v54  ;;  %v6205_v16 = vadd.f32 %v11442_v45, %v5995_v10  ;;  %v11444_v26 = vld [vmem:[#allocation25_spill] sm:$0xff] }
 0x53e   :  { %v8435_v3 = vpop.f32.mrf.mxu1  ;;  %v5709_v46 = vadd.f32 %v11443_v36, %v5275_v32  ;;  %v11447_v54 = vld [vmem:[#allocation13_spill] sm:$0xff]  ;;  %v6638_v51 = vadd.f32 %v6601_v24, %v6204_v56 }
 0x53f   :  { %v6942_v40 = vadd.f32 %v11156_v55, %v6919_v9  ;;  %v6922_v0 = vadd.f32 %v8435_v3, %v6632_v52  ;;  %v11440_v9 = vld [vmem:[#allocation14_spill] sm:$0xff]  ;;  %v11446_v52 = vld [vmem:[#allocation41_spill] sm:$0xff]  ;;  %v6639_v5 = vadd.f32 %v11142_v47, %v6205_v16  ;;  %v11454_v47 = vld [vmem:[#allocation35_spill] sm:$0xff] }
 0x540   :  { %v6859_v59 = vpop.f32.mrf.mxu1  ;;  %v5707_v23 = vadd.f32 %v11440_v9, %v5273_v14 }
 0x541   :  { %v6920_v2 = vadd.f32 %v6859_v59, %v6630_v57  ;;  %6974 = vrot.lane.b32.xlu0 %v6942_v40, %s8590_s12  ;;  %v6945_v62 = vadd.f32 %v11156_v55, %v6922_v0  ;;  %v6636_v40 = vadd.f32 %v11114_v11, %v6202_v49  ;;  %v11445_v59 = vld [vmem:[#allocation12_spill] sm:$0xff] }
 0x542   :  { %v8438_v34 = vpop.f32.mrf.mxu1  ;;  %v5274_v50 = vadd.f32 %v11445_v59, %v11444_v26  ;;  %v5997_v33 = vadd.f32 %v11450_v19, %v5707_v23 }
 0x543   :  { %v6943_v20 = vadd.f32 %v11156_v55, %v6920_v2  ;;  %v6925_v38 = vadd.f32 %v8438_v34, %v6635_v44  ;;  %v5996_v2 = vadd.f32 %v11446_v52, %v5706_v18  ;;  %v11453_v44 = vld [vmem:[#allocation30_spill] sm:$0xff] }
 0x544   :  { %v6872_v8 = vpop.f32.mrf.mxu1  ;;  %v6207_v60 = vadd.f32 %v11120_v1, %v5997_v33  ;;  %v8427_v1 = vpop.f32.mrf.mxu0 }
 0x545   :  { %v6923_v63 = vadd.f32 %v6872_v8, %v6633_v13  ;;  %6978 = vrot.lane.b32.xlu0 %v6944_v30, %s8590_s12  ;;  %6976 = vrot.lane.b32.xlu1 %v6943_v20, %s8590_s12  ;;  %v6948_v34 = vadd.f32 %v11156_v55, %v6925_v38  ;;  %v11448_v30 = vld [vmem:[#allocation40_spill] sm:$0xff]  ;;  %v6206_v8 = vadd.f32 %v11451_v48, %v5996_v2 }
 0x546   :  { %v8439_v31 = vpop.f32.mrf.mxu1  ;;  %v5276_v0 = vadd.f32 %v11448_v30, %v11447_v54  ;;  %v11449_v20 = vld [vmem:[#allocation28_spill] sm:$0xff]  ;;  %v6641_v15 = vadd.f32 %v6614_v28, %v6207_v60  ;;  %v6617_v45 = vpop.f32.mrf.mxu0 }
 0x547   :  { %v6946_v61 = vadd.f32 %v11156_v55, %v6923_v63  ;;  %v6926_v11 = vadd.f32 %v8439_v31, %v6636_v40  ;;  %v5708_v41 = vadd.f32 %v11449_v20, %v5274_v50  ;;  %v5999_v63 = vadd.f32 %v11453_v44, %v5709_v46 }
 0x548   :  { %v6875_v3 = vpop.f32.mrf.mxu1  ;;  %v5710_v49 = vadd.f32 %v11452_v22, %v5276_v0 }
 0x549   :  { %v6924_v57 = vadd.f32 %v6875_v3, %v6634_v27  ;;  %6980 = vrot.lane.b32.xlu1 %v6945_v62, %s8590_s12  ;;  %6982 = vrot.lane.b32.xlu0 %v6946_v61, %s8590_s12  ;;  %v6949_v12 = vadd.f32 %v11156_v55, %v6926_v11  ;;  %v5998_v10 = vadd.f32 %v11454_v47, %v5708_v41  ;;  %v11456_v61 = vld [vmem:[#allocation24_spill] sm:$0xff] }
 0x54a   :  { %v8442_v58 = vpop.f32.mrf.mxu1  ;;  %v6209_v31 = vadd.f32 %v11455_v29, %v5999_v63  ;;  %v6640_v62 = vadd.f32 %v11170_v42, %v6206_v8  ;;  %v6000_v27 = vadd.f32 %v11456_v61, %v5710_v49 }
 0x54b   :  { %v6947_v13 = vadd.f32 %v11156_v55, %v6924_v57  ;;  %v6929_v39 = vadd.f32 %v8442_v58, %v6639_v5  ;;  %v6208_v32 = vadd.f32 %v11135_v43, %v5998_v10 }
 0x54c   :  { %v6888_v37 = vpop.f32.mrf.mxu1  ;;  %v6210_v42 = vadd.f32 %v11132_v21, %v6000_v27  ;;  %v6643_v7 = vadd.f32 %v8426_v17, %v6209_v31  ;;  %v11270_v27 = vld [vmem:[%s11305_s14] ss:$0 sm:$0xff]  ;;  %s8591_s14 = smov [#allocation4]  }
 0x54d   :  { %v6927_v25 = vadd.f32 %v6888_v37, %v6637_v35  ;;  %6986 = vrot.lane.b32.xlu0 %v6948_v34, %s8590_s12  ;;  %6984 = vrot.lane.b32.xlu1 %v6947_v13, %s8590_s12  ;;  %v6952_v24 = vadd.f32 %v11156_v55, %v6929_v39  ;;  %v6642_v36 = vadd.f32 %v6617_v45, %v6208_v32  ;;  %s7244_s0 = sshll.u32 %s8591_s14, 4  ;;  %s7245_s0 = int_to_ptr.vmem [resolvable:$true] %s7244_s0 }
 0x54e   :  { %v8443_v18 = vpop.f32.mrf.mxu1  ;;  %v6644_v26 = vadd.f32 %v8427_v1, %v6210_v42  ;;  %s8566_s2 = scalar_lea.vmem %s7245_s0, 2048  ;;  %p8571_p1 = scmp.lt.s32.totalorder %s7245_s0, %s7245_s0 }
 0x54f   :  { %v6950_v14 = vadd.f32 %v11156_v55, %v6927_v25  ;;  %v6930_v9 = vadd.f32 %v8443_v18, %v6640_v62  ;;  %p8567_p0 = scmp.ne.s32.totalorder %s7245_s0, %s8566_s2  ;;  %p8572_p2 = scmp.lt.s32.totalorder %s8566_s2, %s8566_s2 }
 0x550   :  { %v6891_v6 = vpop.f32.mrf.mxu1 }
 0x551   :  { %v6928_v38 = vadd.f32 %v6891_v6, %v6638_v51  ;;  %6988 = vrot.lane.b32.xlu1 %v6949_v12, %s8590_s12  ;;  %6990 = vrot.lane.b32.xlu0 %v6950_v14, %s8590_s12  ;;  %v6953_v40 = vadd.f32 %v11156_v55, %v6930_v9  ;;  %p8573_p3 = por %p8572_p2, %p8571_p1 }
 0x552   :  { %v8446_v53 = vpop.f32.mrf.mxu1 }
 0x553   :  { %v6951_v23 = vadd.f32 %v11156_v55, %v6928_v38  ;;  %v6933_v57 = vadd.f32 %v8446_v53, %v6643_v7  ;;  %p8574_p4 = pnand %p8573_p3, %p8567_p0 }
 0x554   :  { %v6904_v4 = vpop.f32.mrf.mxu1 }
 0x555   :  { %v6931_v3 = vadd.f32 %v6904_v4, %v6641_v15  ;;  %6994 = vrot.lane.b32.xlu0 %v6952_v24, %s8590_s12  ;;  %6992 = vrot.lane.b32.xlu1 %v6951_v23, %s8590_s12  ;;  %v6956_v21 = vadd.f32 %v11156_v55, %v6933_v57 }
 0x556   :  { %v8447_v16 = vpop.f32.mrf.mxu1 }
 0x557   :  { %v6954_v43 = vadd.f32 %v11156_v55, %v6931_v3  ;;  %v6934_v50 = vadd.f32 %v8447_v16, %v6644_v26 }
 0x558   :  { %v6907_v46 = vpop.f32.mrf.mxu1 }
 0x559   :  { %v6932_v59 = vadd.f32 %v6907_v46, %v6642_v36  ;;  %6996 = vrot.lane.b32.xlu1 %v6953_v40, %s8590_s12  ;;  %6998 = vrot.lane.b32.xlu0 %v6954_v43, %s8590_s12  ;;  %v6957_v52 = vadd.f32 %v11156_v55, %v6934_v50 }
 0x55b   :  { %v6955_v17 = vadd.f32 %v11156_v55, %v6932_v59 }
 0x55d   :  { %7002 = vrot.lane.b32.xlu0 %v6956_v21, %s8590_s12  ;;  %7000 = vrot.lane.b32.xlu1 %v6955_v17, %s8590_s12 }
 0x561   :  { %7004 = vrot.lane.b32.xlu1 %v6957_v52, %s8590_s12 }
 0x5b3   :  { %v6975_v2 = vpop.permute.xlu0 %6974 }
 0x5b4   :  { %7023 = vst.msk [vmem:[#allocation2] sm:$0xff] %vm7022_vm2, %v6975_v2 }
 0x5b7   :  { %v6979_v58 = vpop.permute.xlu0 %6978  ;;  %v6977_v35 = vpop.permute.xlu1 %6976 }
 0x5b8   :  { %7025 = vst.msk [vmem:[#allocation2 + $0x10] sm:$0xff] %vm7022_vm2, %v6979_v58  ;;  %7024 = vst.msk [vmem:[#allocation2 + $0x8] sm:$0xff] %vm7022_vm2, %v6977_v35 }
 0x5bb   :  { %v6981_v56 = vpop.permute.xlu1 %6980  ;;  %v6983_v34 = vpop.permute.xlu0 %6982  ;;  %v7039_v13 = vld [vmem:[#allocation2] sm:$0xff] }
 0x5bc   :  { %7026 = vst.msk [vmem:[#allocation2 + $0x18] sm:$0xff] %vm7022_vm2, %v6981_v56  ;;  %7027 = vst.msk [vmem:[#allocation2 + $0x20] sm:$0xff] %vm7022_vm2, %v6983_v34 }
 0x5bf   :  { %v6987_v11 = vpop.permute.xlu0 %6986  ;;  %v6985_v55 = vpop.permute.xlu1 %6984  ;;  %v7040_v54 = vld [vmem:[#allocation2 + $0x8] sm:$0xff]  ;;  %v7041_v41 = vld [vmem:[#allocation2 + $0x10] sm:$0xff] }
 0x5c0   :  { %7029 = vst.msk [vmem:[#allocation2 + $0x30] sm:$0xff] %vm7022_vm2, %v6987_v11  ;;  %7028 = vst.msk [vmem:[#allocation2 + $0x28] sm:$0xff] %vm7022_vm2, %v6985_v55  ;;  %v7055_v30 = vpack.c.bf16 %v7040_v54, %v7039_v13 }
 0x5c2   :  { %8452 = vmatprep.mubr.msk.bf16.mxu0 %vm1070_vm14, %v7055_v30 }
 0x5c3   :  { %v6989_v0 = vpop.permute.xlu1 %6988  ;;  %v6991_v20 = vpop.permute.xlu0 %6990  ;;  %v7042_v19 = vld [vmem:[#allocation2 + $0x18] sm:$0xff]  ;;  %v7043_v8 = vld [vmem:[#allocation2 + $0x20] sm:$0xff] }
 0x5c4   :  { %7030 = vst.msk [vmem:[#allocation2 + $0x38] sm:$0xff] %vm7022_vm2, %v6989_v0  ;;  %7031 = vst.msk [vmem:[#allocation2 + $0x40] sm:$0xff] %vm7022_vm2, %v6991_v20  ;;  %v7056_v33 = vpack.c.bf16 %v7042_v19, %v7041_v41 }
 0x5c6   :  { %8453 = vmatmul.mubr.msk.bf16.vlgmr.msra.gmra.mxu0 %vm1070_vm14, %v7056_v33 }
 0x5c7   :  { %v6995_v37 = vpop.permute.xlu0 %6994  ;;  %v6993_v48 = vpop.permute.xlu1 %6992  ;;  %v7044_v5 = vld [vmem:[#allocation2 + $0x28] sm:$0xff]  ;;  %v7045_v28 = vld [vmem:[#allocation2 + $0x30] sm:$0xff] }
 0x5c8   :  { %7033 = vst.msk [vmem:[#allocation2 + $0x50] sm:$0xff] %vm7022_vm2, %v6995_v37  ;;  %7032 = vst.msk [vmem:[#allocation2 + $0x48] sm:$0xff] %vm7022_vm2, %v6993_v48  ;;  %v7057_v25 = vpack.c.bf16 %v7044_v5, %v7043_v8 }
 0x5ca   :  { %8456 = vmatprep.mubr.msk.bf16.mxu0 %vm1070_vm14, %v7057_v25 }
 0x5cb   :  { %v6997_v22 = vpop.permute.xlu1 %6996  ;;  %v6999_v49 = vpop.permute.xlu0 %6998  ;;  %v7046_v44 = vld [vmem:[#allocation2 + $0x38] sm:$0xff]  ;;  %v7047_v12 = vld [vmem:[#allocation2 + $0x40] sm:$0xff] }
 0x5cc   :  { %7034 = vst.msk [vmem:[#allocation2 + $0x58] sm:$0xff] %vm7022_vm2, %v6997_v22  ;;  %7035 = vst.msk [vmem:[#allocation2 + $0x60] sm:$0xff] %vm7022_vm2, %v6999_v49  ;;  %v7058_v63 = vpack.c.bf16 %v7046_v44, %v7045_v28 }
 0x5ce   :  { %8457 = vmatmul.mubr.msk.bf16.gmra.mxu0 %vm1070_vm14, %v7058_v63 }
 0x5cf   :  { %v7003_v60 = vpop.permute.xlu0 %7002  ;;  %v7001_v18 = vpop.permute.xlu1 %7000  ;;  %v7048_v39 = vld [vmem:[#allocation2 + $0x48] sm:$0xff]  ;;  %v7049_v47 = vld [vmem:[#allocation2 + $0x50] sm:$0xff] }
 0x5d0   :  { %7037 = vst.msk [vmem:[#allocation2 + $0x70] sm:$0xff] %vm7022_vm2, %v7003_v60  ;;  %7036 = vst.msk [vmem:[#allocation2 + $0x68] sm:$0xff] %vm7022_vm2, %v7001_v18  ;;  %v7059_v14 = vpack.c.bf16 %v7048_v39, %v7047_v12 }
 0x5d2   :  { %8460 = vmatprep.mubr.msk.bf16.mxu0 %vm1070_vm14, %v7059_v14 }
 0x5d3   :  { %v7005_v51 = vpop.permute.xlu1 %7004  ;;  %v7050_v10 = vld [vmem:[#allocation2 + $0x58] sm:$0xff]  ;;  %v7051_v29 = vld [vmem:[#allocation2 + $0x60] sm:$0xff] }
 0x5d4   :  { %7038 = vst.msk [vmem:[#allocation2 + $0x78] sm:$0xff] %vm7022_vm2, %v7005_v51  ;;  %v7060_v6 = vpack.c.bf16 %v7050_v10, %v7049_v47 }
 0x5d6   :  { %8461 = vmatmul.mubr.msk.bf16.gmra.mxu0 %vm1070_vm14, %v7060_v6 }
 0x5d7   :  { %v7052_v31 = vld [vmem:[#allocation2 + $0x68] sm:$0xff]  ;;  %v7053_v38 = vld [vmem:[#allocation2 + $0x70] sm:$0xff] }
 0x5d8   :  { %v7061_v62 = vpack.c.bf16 %v7052_v31, %v7051_v29 }
 0x5da   :  { %8464 = vmatprep.mubr.msk.bf16.mxu0 %vm1070_vm14, %v7061_v62 }
 0x5db   :  { %v7054_v1 = vld [vmem:[#allocation2 + $0x78] sm:$0xff] }
 0x5dc   :  { %v7062_v61 = vpack.c.bf16 %v7054_v1, %v7053_v38 }
 0x5de   :  { %8465 = vmatmul.mubr.msk.bf16.gmra.mxu0 %vm1070_vm14, %v7062_v61 }
 0x686   :  { %v8454_v53 = vpop.f32.mrf.mxu0 }
 0x687   :  { %v7153_v15 = vadd.f32 %v8454_v53, %v11270_v27 }
 0x688   :  { %v7144_v32 = vpop.f32.mrf.mxu0 }
 0x689   :  { %v7209_v24 = vmax.f32 %v7153_v15, 0.0  ;;  %v7145_v9 = vadd.f32 %v11270_v27, %v7144_v32 }
 0x68a   :  { %v8455_v23 = vpop.f32.mrf.mxu0 }
 0x68b   :  { %7225 = vst [vmem:[#allocation4 + $0x10] sm:$0xff] %v7209_v24  ;;  %v7207_v4 = vmax.f32 %v7145_v9, 0.0  ;;  %v7156_v42 = vadd.f32 %v8455_v23, %v11270_v27 }
 0x68c   :  { %v7147_v7 = vpop.f32.mrf.mxu0 }
 0x68d   :  { %7223 = vst [vmem:[#allocation4] sm:$0xff] %v7207_v4  ;;  %v7210_v3 = vmax.f32 %v7156_v42, 0.0  ;;  %v7148_v45 = vadd.f32 %v11270_v27, %v7147_v7 }
 0x68e   :  { %v8458_v16 = vpop.f32.mrf.mxu0 }
 0x68f   :  { %7226 = vst [vmem:[#allocation4 + $0x18] sm:$0xff] %v7210_v3  ;;  %v7208_v40 = vmax.f32 %v7148_v45, 0.0  ;;  %v7169_v57 = vadd.f32 %v8458_v16, %v11270_v27 }
 0x690   :  { %v7160_v43 = vpop.f32.mrf.mxu0 }
 0x691   :  { %7224 = vst [vmem:[#allocation4 + $0x8] sm:$0xff] %v7208_v40  ;;  %v7213_v36 = vmax.f32 %v7169_v57, 0.0  ;;  %v7161_v46 = vadd.f32 %v11270_v27, %v7160_v43 }
 0x692   :  { %v8459_v26 = vpop.f32.mrf.mxu0 }
 0x693   :  { %7229 = vst [vmem:[#allocation4 + $0x30] sm:$0xff] %v7213_v36  ;;  %v7211_v59 = vmax.f32 %v7161_v46, 0.0  ;;  %v7172_v21 = vadd.f32 %v8459_v26, %v11270_v27 }
 0x694   :  { %v7163_v50 = vpop.f32.mrf.mxu0 }
 0x695   :  { %7227 = vst [vmem:[#allocation4 + $0x20] sm:$0xff] %v7211_v59  ;;  %v7214_v17 = vmax.f32 %v7172_v21, 0.0  ;;  %v7164_v52 = vadd.f32 %v11270_v27, %v7163_v50 }
 0x696   :  { %v8462_v2 = vpop.f32.mrf.mxu0 }
 0x697   :  { %7230 = vst [vmem:[#allocation4 + $0x38] sm:$0xff] %v7214_v17  ;;  %v7212_v58 = vmax.f32 %v7164_v52, 0.0  ;;  %v7185_v35 = vadd.f32 %v8462_v2, %v11270_v27 }
 0x698   :  { %v7176_v56 = vpop.f32.mrf.mxu0 }
 0x699   :  { %7228 = vst [vmem:[#allocation4 + $0x28] sm:$0xff] %v7212_v58  ;;  %v7217_v34 = vmax.f32 %v7185_v35, 0.0  ;;  %v7177_v11 = vadd.f32 %v11270_v27, %v7176_v56 }
 0x69a   :  { %v8463_v55 = vpop.f32.mrf.mxu0 }
 0x69b   :  { %7233 = vst [vmem:[#allocation4 + $0x50] sm:$0xff] %v7217_v34  ;;  %v7215_v13 = vmax.f32 %v7177_v11, 0.0  ;;  %v7188_v54 = vadd.f32 %v8463_v55, %v11270_v27 }
 0x69c   :  { %v7179_v30 = vpop.f32.mrf.mxu0 }
 0x69d   :  { %7231 = vst [vmem:[#allocation4 + $0x40] sm:$0xff] %v7215_v13  ;;  %v7218_v0 = vmax.f32 %v7188_v54, 0.0  ;;  %v7180_v20 = vadd.f32 %v11270_v27, %v7179_v30 }
 0x69e   :  { %v8466_v41 = vpop.f32.mrf.mxu0 }
 0x69f   :  { %7234 = vst [vmem:[#allocation4 + $0x58] sm:$0xff] %v7218_v0  ;;  %v7216_v19 = vmax.f32 %v7180_v20, 0.0  ;;  %v7201_v33 = vadd.f32 %v8466_v41, %v11270_v27 }
 0x6a0   :  { %v7192_v37 = vpop.f32.mrf.mxu0 }
 0x6a1   :  { %7232 = vst [vmem:[#allocation4 + $0x48] sm:$0xff] %v7216_v19  ;;  %v7221_v48 = vmax.f32 %v7201_v33, 0.0  ;;  %v7193_v8 = vadd.f32 %v11270_v27, %v7192_v37 }
 0x6a2   :  { %v8467_v5 = vpop.f32.mrf.mxu0 }
 0x6a3   :  { %7237 = vst [vmem:[#allocation4 + $0x70] sm:$0xff] %v7221_v48  ;;  %v7219_v25 = vmax.f32 %v7193_v8, 0.0  ;;  %v7204_v22 = vadd.f32 %v8467_v5, %v11270_v27 }
 0x6a4   :  { %v7195_v49 = vpop.f32.mrf.mxu0 }
 0x6a5   :  { %7235 = vst [vmem:[#allocation4 + $0x60] sm:$0xff] %v7219_v25  ;;  %v7222_v28 = vmax.f32 %v7204_v22, 0.0  ;;  %v7196_v44 = vadd.f32 %v11270_v27, %v7195_v49 }
 0x6a7   :  { %7238 = vst [vmem:[#allocation4 + $0x78] sm:$0xff] %v7222_v28  ;;  %v7220_v63 = vmax.f32 %v7196_v44, 0.0 }
 0x6a9   :  { %7236 = vst [vmem:[#allocation4 + $0x68] sm:$0xff] %v7220_v63 }
 0x6aa   :  { %8577 = shalt.err (!%p8574_p4)
}
 0x6ab   :  { %s8592_s23 = smov 128   ;;  %s8593_s6 = smov 8  }
 0x6ac   :  { %7250 = dma.vmem_to_hbm [thread:$0]  %s7245_s0, 2048, %s11306_s15, [#allocation5], %s8592_s23, %s8592_s23, %s8593_s6  }
 0x6ad   :  { %8586 = dma.done.wait [#allocation5], 2048  }
 0x6ae   :  { %8587 = vsyncadd [#allocation5], 4294965248 }
 0x6af   :  { %7254 = vsyncpa [#allocation5], 1 }

</bundles_post_ra>
